<compile_context>
chip_gen: v6e
topology: v6e:2x2x1
jax: 0.10.0
libtpu: 0.0.40
codegen_flags: <defaults>
</compile_context>

<pallas_src>
import math

import jax
import jax.numpy as jnp
from jax.experimental import pallas as pl
from jax.experimental.pallas import tpu as pltpu


def _round_up(n, m):
    return ((n + m - 1) // m) * m


def _pad2(a, rows, cols):
    r, c = a.shape
    return jnp.pad(a, ((0, rows - r), (0, cols - c)))


def _choose_tile_b(B):
    """Pick a batch tile: multiple of 16, divides B if possible, grid >= 4."""
    candidates = (256, 128, 64, 32, 16)
    divisors = [t for t in candidates if B % t == 0]
    for t in divisors:
        if B // t >= 4:           # >=4 grid steps -> pipelining + 2-TC (v7x)
            return t
    if divisors:
        return divisors[0]
    return 16                     # small/odd B: pad the batch up to 16 rows


def _make_pdnn_kernel(n_layers, alpha, out_f):
    """Fused MLP kernel: refs = (x, w1, b1, ..., wN, bN, out)."""
    def kernel(*refs):
        x_ref = refs[0]
        o_ref = refs[-1]
        wb = refs[1:-1]
        h = x_ref[...]
        for i in range(n_layers):
            w_ref, b_ref = wb[2 * i], wb[2 * i + 1]
            # MXU matmul (bf16 operands, f32 accumulation), f32 epilogue (VPU).
            y = jnp.dot(h, w_ref[...], preferred_element_type=jnp.float32)
            y = y + b_ref[...]
            y = jnp.maximum(y, alpha * y)              # LeakyReLU(alpha)
            h = y if i == n_layers - 1 else y.astype(w_ref.dtype)
        # Store only the unpadded output columns (lane-padded matmul N -> out_f).
        o_ref[...] = h[:, :out_f].astype(o_ref.dtype)
    return kernel


def prepare_pdnn_params(params, compute_dtype=jnp.bfloat16):
    """One-time prep: pad every feature dim to a multiple of 128 lanes and cast.

    params: list of (w, b) with w stored as [in, out] (transpose of PyTorch's
            [out, in]) and b as [1, out] or [out]. Reuse the returned dict
            across forward calls so pad/cast HBM traffic is paid once.
    """
    dims = [params[0][0].shape[0]] + [w.shape[1] for (w, _) in params]
    pdims = [_round_up(d, 128) for d in dims]
    flat = []
    for li, (w, b) in enumerate(params):
        kp, np_ = pdims[li], pdims[li + 1]
        w = jnp.asarray(w)
        b = jnp.asarray(b).reshape(1, -1)
        flat.append(_pad2(w, kp, np_).astype(compute_dtype))   # bf16 weights
        flat.append(_pad2(b, 1, np_).astype(jnp.float32))      # f32 bias
    flat = [jax.device_put(a) for a in flat]
    return dict(flat=flat, dims=dims, pdims=pdims, compute_dtype=compute_dtype)


def pdnn_forward(x, prepared, *, alpha=0.01, tile_b=None,
                 out_dtype=jnp.float32, output_shape=(361, 3, 4)):
    """Pallas implementation of PDNN.forward.

    x: [B, input_size] float32
    prepared: output of prepare_pdnn_params (padded/cast weights, reusable).
    Returns [B, *output_shape] in out_dtype (output_shape=None -> flat [B, out]).
    Note: bf16 MXU operands give ~1e-2-scale differences vs a strict f32
    PyTorch baseline; pass compute_dtype=jnp.float32 to prepare_pdnn_params
    if exact f32 parity is required.
    """
    flat = prepared["flat"]
    dims = prepared["dims"]
    pdims = prepared["pdims"]
    cdt = prepared["compute_dtype"]

    B, in_f = x.shape
    assert in_f == dims[0], f"expected input size {dims[0]}, got {in_f}"
    n_layers = len(dims) - 1
    out_f = dims[-1]
    out_itemsize = jnp.dtype(out_dtype).itemsize

    if tile_b is None:
        tile_b = _choose_tile_b(B)
    if tile_b % 16 != 0:
        raise ValueError("tile_b must be a multiple of 16 (bf16 sublane tile)")
    b_pad = _round_up(B, tile_b)          # == B whenever tile_b divides B
    grid = (b_pad // tile_b,)

    # Only the (tiny, genuinely 3-wide) input needs per-call padding/casting.
    x_p = _pad2(x, b_pad, pdims[0]).astype(cdt)

    in_specs = [pl.BlockSpec((tile_b, pdims[0]), lambda i: (i, 0))]   # x tile
    for li in range(n_layers):
        kp, np_ = pdims[li], pdims[li + 1]
        # Resident weights/biases: constant block index across the batch grid.
        in_specs.append(pl.BlockSpec((kp, np_), lambda i: (0, 0)))
        in_specs.append(pl.BlockSpec((1, np_), lambda i: (0, 0)))

    param_bytes = sum(int(a.size) * a.dtype.itemsize for a in flat)
    flops = 2 * B * sum(dims[i] * dims[i + 1] for i in range(n_layers))
    bytes_accessed = (int(x_p.size) * x_p.dtype.itemsize
                      + param_bytes
                      + b_pad * out_f * out_itemsize)
    cost = pl.CostEstimate(flops=int(flops), transcendentals=0,
                           bytes_accessed=int(bytes_accessed))

    # Right-sized VMEM: double-buffered x/out tiles + resident params +
    # f32 intermediates, x2 margin, clamped to [16 MiB, 60 MiB].
    io = 2 * tile_b * pdims[0] * jnp.dtype(cdt).itemsize \
        + 2 * tile_b * out_f * out_itemsize
    act = 2 * tile_b * max(pdims) * 4
    vmem_limit = int(min(60 * 2**20,
                         max(16 * 2**20, 2 * (io + 2 * param_bytes + act))))

    out = pl.pallas_call(
        _make_pdnn_kernel(n_layers, alpha, out_f),
        out_shape=jax.ShapeDtypeStruct((b_pad, out_f), out_dtype),
        grid_spec=pltpu.PrefetchScalarGridSpec(
            num_scalar_prefetch=0,
            grid=grid,
            in_specs=in_specs,
            # Full (unpadded) last dim: legal since it equals the array dim;
            # avoids any post-kernel slice copy.
            out_specs=pl.BlockSpec((tile_b, out_f), lambda i: (i, 0)),
        ),
        compiler_params=pltpu.CompilerParams(
            dimension_semantics=("parallel",),
            vmem_limit_bytes=vmem_limit,
        ),
        cost_estimate=cost,
    )(x_p, *flat)

    if b_pad != B:
        out = out[:B]
    if output_shape is not None:
        out = out.reshape(B, *output_shape)
    return out


def pdnn_layer_dims(input_size=3, num_layers=3, phi_k=64, s_c=1.2,
                    output_size=361 * 3 * 4):
    """Mirror PDNN.__init__: layer_count(l) = ceil(phi_k * s_c**(num_layers-l))."""
    layer_sizes = [int(math.ceil(phi_k * s_c ** (num_layers - l)))
                   for l in range(1, num_layers + 1)]
    return [input_size] + layer_sizes + [output_size]


def init_params(key, dims):
    """nn.Linear-style U(-1/sqrt(fan_in), 1/sqrt(fan_in)) init; w stored [in, out]."""
    params = []
    ks = jax.random.split(key, 2 * (len(dims) - 1))
    for i in range(len(dims) - 1):
        fan_in, fan_out = dims[i], dims[i + 1]
        bound = 1.0 / math.sqrt(fan_in)
        w = jax.random.uniform(ks[2 * i], (fan_in, fan_out), jnp.float32, -bound, bound)
        b = jax.random.uniform(ks[2 * i + 1], (1, fan_out), jnp.float32, -bound, bound)
        params.append((w, b))
    return params


def reference_forward(x, params, *, alpha=0.01, compute_dtype=jnp.bfloat16):
    """Pure-JAX reference using the same bf16-operand / f32-accumulate path."""
    h = x.astype(compute_dtype)
    n = len(params)
    for i, (w, b) in enumerate(params):
        y = jnp.dot(h, w.astype(compute_dtype),
                    preferred_element_type=jnp.float32) + b
        y = jnp.maximum(y, alpha * y)
        h = y if i == n - 1 else y.astype(compute_dtype)
    return h


if __name__ == "__main__":
    # PDNN defaults: input_size=3, num_layers=3, phi_k=64, s_c=1.2,
    # output_size=361*3*4 -> layer dims [3, 93, 77, 64, 4332].
    dims = pdnn_layer_dims()
    B = 256  # auto tile_b=64 -> grid=(4,): pipelined, 2 steps/TC on v7x

    key = jax.random.PRNGKey(0)
    kx, kp = jax.random.split(key)
    x = jax.random.normal(kx, (B, dims[0]), dtype=jnp.float32)
    params = init_params(kp, dims)

    # One-time prep (padding + bf16 cast), reused across forward calls.
    prepared = prepare_pdnn_params(params, compute_dtype=jnp.bfloat16)

    # f32-output path: correctness check vs pure-JAX reference.
    out = pdnn_forward(x, prepared, alpha=0.01, out_dtype=jnp.float32,
                       output_shape=(361, 3, 4))
    out = jax.block_until_ready(out)
    assert out.shape == (B, 361, 3, 4)

    ref = reference_forward(x, params, alpha=0.01).reshape(B, 361, 3, 4)
    max_err = float(jnp.max(jnp.abs(out - ref)))
    assert jnp.allclose(out, ref, atol=2e-2, rtol=2e-2), \
        f"mismatch vs reference (max abs err {max_err})"

    # bf16-output path (halves the dominant HBM write traffic) -- exercise it.
    out_bf16 = pdnn_forward(x, prepared, alpha=0.01, out_dtype=jnp.bfloat16,
                            output_shape=(361, 3, 4))
    out_bf16 = jax.block_until_ready(out_bf16)
    assert out_bf16.shape == (B, 361, 3, 4) and out_bf16.dtype == jnp.bfloat16

    print("KERNEL_OK")
</pallas_src>

<mosaic_0001>
module attributes {stable_mosaic.version = 11 : i64} {
  func.func @kernel(%arg0: i32, %arg1: memref<64x128xbf16, #tpu.memory_space<vmem>>, %arg2: memref<128x128xbf16, #tpu.memory_space<vmem>>, %arg3: memref<1x128xf32, #tpu.memory_space<vmem>>, %arg4: memref<128x128xbf16, #tpu.memory_space<vmem>>, %arg5: memref<1x128xf32, #tpu.memory_space<vmem>>, %arg6: memref<128x128xbf16, #tpu.memory_space<vmem>>, %arg7: memref<1x128xf32, #tpu.memory_space<vmem>>, %arg8: memref<128x4352xbf16, #tpu.memory_space<vmem>>, %arg9: memref<1x4352xf32, #tpu.memory_space<vmem>>, %arg10: memref<64x4332xf32, #tpu.memory_space<vmem>>) attributes {dimension_semantics = [#tpu.dimension_semantics<parallel>], iteration_bounds = array<i64: 4>, scalar_prefetch = 0 : i64, scratch_operands = 0 : i64, tpu.core_type = #tpu.core_type<tc>, window_params = [{transform_indices = @transform_0, window_bounds = array<i64: 64, 128>}, {pipeline_mode = #tpu.pipeline_mode<synchronous>, transform_indices = @transform_1, window_bounds = array<i64: 128, 128>}, {pipeline_mode = #tpu.pipeline_mode<synchronous>, transform_indices = @transform_2, window_bounds = array<i64: 1, 128>}, {pipeline_mode = #tpu.pipeline_mode<synchronous>, transform_indices = @transform_3, window_bounds = array<i64: 128, 128>}, {pipeline_mode = #tpu.pipeline_mode<synchronous>, transform_indices = @transform_4, window_bounds = array<i64: 1, 128>}, {pipeline_mode = #tpu.pipeline_mode<synchronous>, transform_indices = @transform_5, window_bounds = array<i64: 128, 128>}, {pipeline_mode = #tpu.pipeline_mode<synchronous>, transform_indices = @transform_6, window_bounds = array<i64: 1, 128>}, {pipeline_mode = #tpu.pipeline_mode<synchronous>, transform_indices = @transform_7, window_bounds = array<i64: 128, 4352>}, {pipeline_mode = #tpu.pipeline_mode<synchronous>, transform_indices = @transform_8, window_bounds = array<i64: 1, 4352>}, {transform_indices = @transform_9, window_bounds = array<i64: 64, 4332>}]} {
    %c0 = arith.constant 0 : index
    %c0_0 = arith.constant 0 : index
    %0 = vector.load %arg1[%c0, %c0_0] : memref<64x128xbf16, #tpu.memory_space<vmem>>, vector<64x128xbf16>
    %c0_1 = arith.constant 0 : index
    %c0_2 = arith.constant 0 : index
    %1 = vector.load %arg2[%c0_1, %c0_2] : memref<128x128xbf16, #tpu.memory_space<vmem>>, vector<128x128xbf16>
    %cst = arith.constant dense<0.000000e+00> : vector<64x128xf32>
    %2 = tpu.matmul %0, %1, %cst {dimension_numbers = #tpu.dot_dimension_numbers<[1], [0], [0], [1], [0, 0, 1, 1], [], []>} : vector<64x128xbf16>, vector<128x128xbf16>, vector<64x128xf32> -> vector<64x128xf32>
    %c0_3 = arith.constant 0 : index
    %c0_4 = arith.constant 0 : index
    %3 = vector.load %arg3[%c0_3, %c0_4] : memref<1x128xf32, #tpu.memory_space<vmem>>, vector<1x128xf32>
    %4 = vector.broadcast %3 : vector<1x128xf32> to vector<64x128xf32>
    %5 = arith.addf %2, %4 : vector<64x128xf32>
    %cst_5 = arith.constant 0.00999999977 : f32
    %6 = vector.broadcast %cst_5 : f32 to vector<64x128xf32>
    %7 = arith.mulf %6, %5 : vector<64x128xf32>
    %8 = arith.maximumf %5, %7 : vector<64x128xf32>
    %9 = arith.truncf %8 : vector<64x128xf32> to vector<64x128xbf16>
    %c0_6 = arith.constant 0 : index
    %c0_7 = arith.constant 0 : index
    %10 = vector.load %arg4[%c0_6, %c0_7] : memref<128x128xbf16, #tpu.memory_space<vmem>>, vector<128x128xbf16>
    %cst_8 = arith.constant dense<0.000000e+00> : vector<64x128xf32>
    %11 = tpu.matmul %9, %10, %cst_8 {dimension_numbers = #tpu.dot_dimension_numbers<[1], [0], [0], [1], [0, 0, 1, 1], [], []>} : vector<64x128xbf16>, vector<128x128xbf16>, vector<64x128xf32> -> vector<64x128xf32>
    %c0_9 = arith.constant 0 : index
    %c0_10 = arith.constant 0 : index
    %12 = vector.load %arg5[%c0_9, %c0_10] : memref<1x128xf32, #tpu.memory_space<vmem>>, vector<1x128xf32>
    %13 = vector.broadcast %12 : vector<1x128xf32> to vector<64x128xf32>
    %14 = arith.addf %11, %13 : vector<64x128xf32>
    %cst_11 = arith.constant 0.00999999977 : f32
    %15 = vector.broadcast %cst_11 : f32 to vector<64x128xf32>
    %16 = arith.mulf %15, %14 : vector<64x128xf32>
    %17 = arith.maximumf %14, %16 : vector<64x128xf32>
    %18 = arith.truncf %17 : vector<64x128xf32> to vector<64x128xbf16>
    %c0_12 = arith.constant 0 : index
    %c0_13 = arith.constant 0 : index
    %19 = vector.load %arg6[%c0_12, %c0_13] : memref<128x128xbf16, #tpu.memory_space<vmem>>, vector<128x128xbf16>
    %cst_14 = arith.constant dense<0.000000e+00> : vector<64x128xf32>
    %20 = tpu.matmul %18, %19, %cst_14 {dimension_numbers = #tpu.dot_dimension_numbers<[1], [0], [0], [1], [0, 0, 1, 1], [], []>} : vector<64x128xbf16>, vector<128x128xbf16>, vector<64x128xf32> -> vector<64x128xf32>
    %c0_15 = arith.constant 0 : index
    %c0_16 = arith.constant 0 : index
    %21 = vector.load %arg7[%c0_15, %c0_16] : memref<1x128xf32, #tpu.memory_space<vmem>>, vector<1x128xf32>
    %22 = vector.broadcast %21 : vector<1x128xf32> to vector<64x128xf32>
    %23 = arith.addf %20, %22 : vector<64x128xf32>
    %cst_17 = arith.constant 0.00999999977 : f32
    %24 = vector.broadcast %cst_17 : f32 to vector<64x128xf32>
    %25 = arith.mulf %24, %23 : vector<64x128xf32>
    %26 = arith.maximumf %23, %25 : vector<64x128xf32>
    %27 = arith.truncf %26 : vector<64x128xf32> to vector<64x128xbf16>
    %c0_18 = arith.constant 0 : index
    %c0_19 = arith.constant 0 : index
    %28 = vector.load %arg8[%c0_18, %c0_19] : memref<128x4352xbf16, #tpu.memory_space<vmem>>, vector<128x4352xbf16>
    %cst_20 = arith.constant dense<0.000000e+00> : vector<64x4352xf32>
    %29 = tpu.matmul %27, %28, %cst_20 {dimension_numbers = #tpu.dot_dimension_numbers<[1], [0], [0], [1], [0, 0, 1, 1], [], []>} : vector<64x128xbf16>, vector<128x4352xbf16>, vector<64x4352xf32> -> vector<64x4352xf32>
    %c0_21 = arith.constant 0 : index
    %c0_22 = arith.constant 0 : index
    %30 = vector.load %arg9[%c0_21, %c0_22] : memref<1x4352xf32, #tpu.memory_space<vmem>>, vector<1x4352xf32>
    %31 = vector.broadcast %30 : vector<1x4352xf32> to vector<64x4352xf32>
    %32 = arith.addf %29, %31 : vector<64x4352xf32>
    %cst_23 = arith.constant 0.00999999977 : f32
    %33 = vector.broadcast %cst_23 : f32 to vector<64x4352xf32>
    %34 = arith.mulf %33, %32 : vector<64x4352xf32>
    %35 = arith.maximumf %32, %34 : vector<64x4352xf32>
    %36 = vector.extract_strided_slice %35 {offsets = [0, 0], sizes = [64, 4332], strides = [1, 1]} : vector<64x4352xf32> to vector<64x4332xf32>
    %c0_24 = arith.constant 0 : index
    %c0_25 = arith.constant 0 : index
    %37 = vector.load %arg10[%c0_24, %c0_25] : memref<64x4332xf32, #tpu.memory_space<vmem>>, vector<64x4332xf32>
    tpu.vector_store %arg10[%c0_24, %c0_25], %36 {strides = array<i32>} : memref<64x4332xf32, #tpu.memory_space<vmem>>, vector<64x4332xf32>,
    return
  }
  func.func @transform_0(%arg0: i32) -> (i32, i32) {
    %c0_i32 = arith.constant 0 : i32
    %c0_i32_0 = arith.constant 0 : i32
    return %arg0, %c0_i32 : i32, i32
  }
  func.func @transform_1(%arg0: i32) -> (i32, i32) {
    %c0_i32 = arith.constant 0 : i32
    %c0_i32_0 = arith.constant 0 : i32
    %c0_i32_1 = arith.constant 0 : i32
    return %c0_i32, %c0_i32_0 : i32, i32
  }
  func.func @transform_2(%arg0: i32) -> (i32, i32) {
    %c0_i32 = arith.constant 0 : i32
    %c0_i32_0 = arith.constant 0 : i32
    %c0_i32_1 = arith.constant 0 : i32
    return %c0_i32, %c0_i32_0 : i32, i32
  }
  func.func @transform_3(%arg0: i32) -> (i32, i32) {
    %c0_i32 = arith.constant 0 : i32
    %c0_i32_0 = arith.constant 0 : i32
    %c0_i32_1 = arith.constant 0 : i32
    return %c0_i32, %c0_i32_0 : i32, i32
  }
  func.func @transform_4(%arg0: i32) -> (i32, i32) {
    %c0_i32 = arith.constant 0 : i32
    %c0_i32_0 = arith.constant 0 : i32
    %c0_i32_1 = arith.constant 0 : i32
    return %c0_i32, %c0_i32_0 : i32, i32
  }
  func.func @transform_5(%arg0: i32) -> (i32, i32) {
    %c0_i32 = arith.constant 0 : i32
    %c0_i32_0 = arith.constant 0 : i32
    %c0_i32_1 = arith.constant 0 : i32
    return %c0_i32, %c0_i32_0 : i32, i32
  }
  func.func @transform_6(%arg0: i32) -> (i32, i32) {
    %c0_i32 = arith.constant 0 : i32
    %c0_i32_0 = arith.constant 0 : i32
    %c0_i32_1 = arith.constant 0 : i32
    return %c0_i32, %c0_i32_0 : i32, i32
  }
  func.func @transform_7(%arg0: i32) -> (i32, i32) {
    %c0_i32 = arith.constant 0 : i32
    %c0_i32_0 = arith.constant 0 : i32
    %c0_i32_1 = arith.constant 0 : i32
    return %c0_i32, %c0_i32_0 : i32, i32
  }
  func.func @transform_8(%arg0: i32) -> (i32, i32) {
    %c0_i32 = arith.constant 0 : i32
    %c0_i32_0 = arith.constant 0 : i32
    %c0_i32_1 = arith.constant 0 : i32
    return %c0_i32, %c0_i32_0 : i32, i32
  }
  func.func @transform_9(%arg0: i32) -> (i32, i32) {
    %c0_i32 = arith.constant 0 : i32
    %c0_i32_0 = arith.constant 0 : i32
    return %arg0, %c0_i32 : i32, i32
  }
}

</mosaic_0001>

<bundles_post_ra>
// kernel: tpu_custom_call.1
= control target key start
LH: loop header
LB: loop body
LE: loop exit
PB: predicated region body
PF: predicated region fallthrough
CT: control target
= control target key end

     0   :  { %14 = vsyncpa [#allocation3], 0  ;;  %s7447_s0 = inlined_call_operand.hbm [shape: bf16[256,128], index: 0, kind: input, shape index: {}]   ;;  %s7448_s1 = inlined_call_operand.hbm [shape: bf16[128,128], index: 1, kind: input, shape index: {}]   ;;  %s7449_s2 = inlined_call_operand.hbm [shape: f32[1,128], index: 2, kind: input, shape index: {}]   ;;  %s7450_s3 = inlined_call_operand.hbm [shape: bf16[128,128], index: 3, kind: input, shape index: {}]   ;;  %s7451_s4 = inlined_call_operand.hbm [shape: f32[1,128], index: 4, kind: input, shape index: {}]   ;;  %s7452_s5 = inlined_call_operand.hbm [shape: bf16[128,128], index: 5, kind: input, shape index: {}]   ;;  %s7453_s6 = inlined_call_operand.hbm [shape: f32[1,128], index: 6, kind: input, shape index: {}]   ;;  %s7454_s7 = inlined_call_operand.hbm [shape: bf16[128,4352], index: 7, kind: input, shape index: {}]   ;;  %s7455_s8 = inlined_call_operand.hbm [shape: f32[1,4352], index: 8, kind: input, shape index: {}]   ;;  %s7456_s9 = inlined_call_operand.vmem [shape: f32[256,4332], index: 9, kind: output, shape index: {}]  }
   0x1   :  { %16 = vsyncpa [#allocation3 + $0x1], 0 }
   0x2   :  { %17 = vsyncpa [#allocation5], 0 }
   0x3   :  { %18 = vsyncpa [#allocation8], 0 }
   0x4   :  { %19 = vsyncpa [#allocation11], 0 }
   0x5   :  { %20 = vsyncpa [#allocation14], 0  ;;  %s6336_s30 = smov 0   ;;  %s6338_s10 = smov 0  }
   0x6   :  { %s6340_s11 = smov 0   ;;  %s6342_s12 = smov 0  }
   0x7 LB: > { %s6272_s13 = smov [#allocation4]   ;;  %s7457_s15 = sadd.s32 4294967295, %s6270_s12   ;;  %s6270_s12 = sphi %s6342_s12, %s7480_s12   ;;  %s6266_s11 = sphi %s6340_s11, %s7479_s11   ;;  %s6262_s10 = sphi %s6338_s10, %s7478_s10   ;;  %s6258_s30 = sphi %s6336_s30, %s7477_s30  }
   0x8   : > { %s263_s14 = sshll.u32 %s6272_s13, 4  ;;  %p4983_p0 = scmp.ge.s32.totalorder %s6270_s12, 1  ;;  %s264_s14 = int_to_ptr.vmem [resolvable:$true] %s263_s14 }
   0x9   : > { %p6360_p1 = scmp.eq.s32.totalorder %s7457_s15, 0  ;;  %p251_p2 = scmp.lt.s32.totalorder %s6270_s12, 5 }
   0xa   : > { %s6273_s18 = smov [#allocation7]   ;;  %s6274_s21 = smov [#allocation10]  }
   0xb   : > { %s7464_s16 = scalar_select %p6360_p1, 1, 0 }
   0xc   : > { %p6365_p3 = pnand %p4983_p0, %p251_p2  ;;  %s287_s19 = sshll.u32 %s6273_s18, 4  ;;  %s6377_s19 = int_to_ptr.vmem [resolvable:$true] %s287_s19 }
   0xd   : > { %s311_s22 = sshll.u32 %s6274_s21, 4  ;;  %s5995_s24 = scalar_lea.vmem %s264_s14, 1024  ;;  %s6379_s22 = int_to_ptr.vmem [resolvable:$true] %s311_s22 }
   0xe   : > { %s7465_s17 = scalar_select %p6365_p3, 1, 0 }
   0xf   : > { %p5457_p4 = pneg %p6365_p3  ;;  %p5996_p7 = scmp.ne.s32.totalorder %s264_s14, %s5995_s24 }
  0x10   : > { %p6003_p10 = scmp.lt.s32.totalorder %s264_s14, %s264_s14  ;;  %p6004_p11 = scmp.lt.s32.totalorder %s5995_s24, %s5995_s24 }
  0x11   : > { %p6373_p5 = pnand %p5457_p4, %p6360_p1 }
  0x12   : > { %p6005_p12 = por %p6004_p11, %p6003_p10 }
  0x13   : > { %p6383_p6 = pneg %p6373_p5 }
  0x15   : > { %p5998_p8 = pnand %p5996_p7, %p6383_p6 }
  0x17   : > { %p5999_p9 = pneg %p5998_p8 }
  0x19   : > { %p6006_p13 = pnand %p6005_p12, %p5999_p9 }
  0x1b   : > { %6009 = shalt.err (!%p6006_p13)
}
  0x1c   : > { %s7461_s25 = smov 64   ;;  %s7462_s26 = smov 4  }
  0x1d   : > { %5460 = dma.hbm_to_vmem [thread:$0]  (!%p6373_p5), %s7448_s1, 1024, %s264_s14, [#allocation5], %s7461_s25, %s7461_s25, %s7462_s26  }
  0x1e   : > { %s6021_s29 = scalar_lea.vmem %s6377_s19, 1024  ;;  %p6029_p7 = scmp.lt.s32.totalorder %s6377_s19, %s6377_s19 }
  0x1f   : > { %p6022_p0 = scmp.ne.s32.totalorder %s6377_s19, %s6021_s29  ;;  %p6030_p8 = scmp.lt.s32.totalorder %s6021_s29, %s6021_s29 }
  0x21   : > { %p6024_p2 = pnand %p6022_p0, %p6383_p6  ;;  %p6031_p9 = por %p6030_p8, %p6029_p7 }
  0x23   : > { %p6025_p4 = pneg %p6024_p2 }
  0x25   : > { %p6032_p10 = pnand %p6031_p9, %p6025_p4 }
  0x27   : > { %6035 = shalt.err (!%p6032_p10)
}
  0x28   : > { %5466 = dma.hbm_to_vmem [thread:$0]  (!%p6373_p5), %s7450_s3, 1024, %s6377_s19, [#allocation8], %s7461_s25, %s7461_s25, %s7462_s26  }
  0x29   : > { %s6047_s14 = scalar_lea.vmem %s6379_s22, 1024  ;;  %p6055_p0 = scmp.lt.s32.totalorder %s6379_s22, %s6379_s22 }
  0x2a   : > { %p6048_p11 = scmp.ne.s32.totalorder %s6379_s22, %s6047_s14  ;;  %p6056_p2 = scmp.lt.s32.totalorder %s6047_s14, %s6047_s14 }
  0x2c   : > { %p6050_p12 = pnand %p6048_p11, %p6383_p6  ;;  %p6057_p4 = por %p6056_p2, %p6055_p0 }
  0x2e   : > { %p6051_p13 = pneg %p6050_p12 }
  0x30   : > { %p6058_p7 = pnand %p6057_p4, %p6051_p13 }
  0x32   : > { %6061 = shalt.err (!%p6058_p7)
}
  0x33   : > { %5472 = dma.hbm_to_vmem [thread:$0]  (!%p6373_p5), %s7452_s5, 1024, %s6379_s22, [#allocation11], %s7461_s25, %s7461_s25, %s7462_s26  }
  0x34   : > { %s6277_s19 = smov [#allocation13]  }
  0x35   : > { %s335_s27 = sshll.u32 %s6277_s19, 4  ;;  %s336_s27 = int_to_ptr.vmem [resolvable:$true] %s335_s27 }
  0x36   : > { %s6073_s28 = scalar_lea.vmem %s336_s27, 34816  ;;  %p6081_p11 = scmp.lt.s32.totalorder %s336_s27, %s336_s27 }
  0x37   : > { %p6074_p8 = scmp.ne.s32.totalorder %s336_s27, %s6073_s28  ;;  %p6082_p12 = scmp.lt.s32.totalorder %s6073_s28, %s6073_s28 }
  0x39   : > { %p6076_p9 = pnand %p6074_p8, %p6383_p6  ;;  %p6083_p13 = por %p6082_p12, %p6081_p11 }
  0x3b   : > { %p6077_p10 = pneg %p6076_p9 }
  0x3d   : > { %p6084_p0 = pnand %p6083_p13, %p6077_p10 }
  0x3f   : > { %6087 = shalt.err (!%p6084_p0)
}
  0x40   : > { %s6278_s29 = smov 2176   ;;  %s6279_s13 = smov 136  }
  0x41   : > { %5478 = dma.hbm_to_vmem [thread:$0]  (!%p6373_p5), %s7454_s7, 34816, %s336_s27, [#allocation14], %s6278_s29, %s6278_s29, %s6279_s13  }
  0x42   : > { %s6280_s14 = smov [#allocation6]   ;;  %s6281_s24 = smov [#allocation9]  }
  0x43   : > { %s277_s21 = sshll.u32 %s6280_s14, 4  ;;  %s301_s19 = sshll.u32 %s6281_s24, 4  ;;  %s278_s21 = int_to_ptr.vmem [resolvable:$true] %s277_s21  ;;  %s302_s19 = int_to_ptr.vmem [resolvable:$true] %s301_s19 }
  0x44   : > { %s6099_s15 = scalar_lea.vmem %s278_s21, 16  ;;  %s6106_s28 = scalar_lea.vmem %s278_s21, 32 }
  0x45   : > { %p6100_p2 = scmp.ne.s32.totalorder %s278_s21, %s6099_s15  ;;  %p6107_p8 = scmp.lt.s32.totalorder %s278_s21, %s278_s21 }
  0x46   : > { %p6108_p9 = scmp.lt.s32.totalorder %s6106_s28, %s6099_s15 }
  0x47   : > { %p6102_p4 = pnand %p6100_p2, %p6383_p6 }
  0x48   : > { %p6109_p10 = por %p6108_p9, %p6107_p8 }
  0x49   : > { %p6103_p7 = pneg %p6102_p4 }
  0x4b   : > { %p6110_p11 = pnand %p6109_p10, %p6103_p7 }
  0x4d   : > { %6113 = shalt.err (!%p6110_p11)
}
  0x4e   : > { %5463 = dma.hbm_to_vmem [thread:$0]  (!%p6373_p5), %s7449_s2, 16, %s278_s21, [#allocation5]  }
  0x4f   : > { %s6125_s13 = scalar_lea.vmem %s302_s19, 16  ;;  %s6132_s18 = scalar_lea.vmem %s302_s19, 32 }
  0x50   : > { %p6126_p12 = scmp.ne.s32.totalorder %s302_s19, %s6125_s13  ;;  %p6133_p2 = scmp.lt.s32.totalorder %s302_s19, %s302_s19 }
  0x51   : > { %p6134_p4 = scmp.lt.s32.totalorder %s6132_s18, %s6125_s13 }
  0x52   : > { %p6128_p13 = pnand %p6126_p12, %p6383_p6 }
  0x53   : > { %p6135_p3 = por %p6134_p4, %p6133_p2 }
  0x54   : > { %p6129_p0 = pneg %p6128_p13 }
  0x56   : > { %p6136_p1 = pnand %p6135_p3, %p6129_p0 }
  0x58   : > { %6139 = shalt.err (!%p6136_p1)
}
  0x59   : > { %5469 = dma.hbm_to_vmem [thread:$0]  (!%p6373_p5), %s7451_s4, 16, %s302_s19, [#allocation8]  }
  0x5a   : > { %s6282_s14 = smov [#allocation12]   ;;  %s6283_s24 = smov [#allocation15]  }
  0x5b   : > { %s325_s21 = sshll.u32 %s6282_s14, 4  ;;  %s349_s28 = sshll.u32 %s6283_s24, 4  ;;  %s326_s21 = int_to_ptr.vmem [resolvable:$true] %s325_s21  ;;  %s350_s28 = int_to_ptr.vmem [resolvable:$true] %s349_s28 }
  0x5c   : > { %s6151_s27 = scalar_lea.vmem %s326_s21, 16  ;;  %s6158_s29 = scalar_lea.vmem %s326_s21, 32 }
  0x5d   : > { %p6152_p7 = scmp.ne.s32.totalorder %s326_s21, %s6151_s27  ;;  %p6159_p1 = scmp.lt.s32.totalorder %s326_s21, %s326_s21 }
  0x5e   : > { %p6160_p3 = scmp.lt.s32.totalorder %s6158_s29, %s6151_s27 }
  0x5f   : > { %p6154_p8 = pnand %p6152_p7, %p6383_p6 }
  0x60   : > { %p6161_p10 = por %p6160_p3, %p6159_p1 }
  0x61   : > { %p6155_p9 = pneg %p6154_p8 }
  0x63   : > { %p6162_p11 = pnand %p6161_p10, %p6155_p9 }
  0x65   : > { %6165 = shalt.err (!%p6162_p11)
}
  0x66   : > { %5475 = dma.hbm_to_vmem [thread:$0]  (!%p6373_p5), %s7453_s6, 16, %s326_s21, [#allocation11]  }
  0x67   : > { %s6177_s18 = scalar_lea.vmem %s350_s28, 544  ;;  %p6185_p2 = scmp.lt.s32.totalorder %s350_s28, %s350_s28 }
  0x68   : > { %p6178_p12 = scmp.ne.s32.totalorder %s350_s28, %s6177_s18  ;;  %p6186_p4 = scmp.lt.s32.totalorder %s6177_s18, %s6177_s18 }
  0x6a   : > { %p6180_p13 = pnand %p6178_p12, %p6383_p6  ;;  %p6187_p7 = por %p6186_p4, %p6185_p2 }
  0x6c   : > { %p6181_p0 = pneg %p6180_p13 }
  0x6e   : > { %p6188_p8 = pnand %p6187_p7, %p6181_p0 }
  0x70   : > { %6191 = shalt.err (!%p6188_p8)
}
  0x71   : > { %5481 = dma.hbm_to_vmem [thread:$0]  (!%p6373_p5), %s7455_s8, 544, %s350_s28, [#allocation14]  }
  0x72   : > { %s6463_s23 = sadd.s32 1, %s6270_s12   ;;  %s33_s20 = sadd.s32 1, %s6266_s11 }
  0x73   : > { %s30_s14 = ssub.s32 %s6270_s12, %s6463_s23  ;;  %p40_p6 = scmp.ne.s32.totalorder %s6266_s11, %s6262_s10 }
  0x74   : > { %p31_p9 = scmp.eq.s32.totalorder %s30_s14, 0  ;;  %p41_p1 = scmp.eq.s32.totalorder %s6270_s12, 0 }
  0x75   : > { %p46_p3 = scmp.ne.s32.totalorder %s6262_s10, %s6258_s30  ;;  %p5494_p10 = scmp.lt.s32.totalorder %s6270_s12, 4 }
  0x76   : > { %s6475_s21 = scalar_select %p31_p9, %s6266_s11, %s33_s20  }
  0x77   : > { %p42_p11 = por %p41_p1, %p40_p6  ;;  %p7468_p12 = scmp.ne.s32.totalorder %s7464_s16, 0 }
  0x78   : > { %s360_s27 = sand.u32 1, %s6266_s11   ;;  %s5313_s28 = sshll.u32 %s6270_s12, 9 }
  0x79   : > { %p6479_p13 = por %p7468_p12, %p46_p3  ;;  %s4993_s29 = sshll.u32 %s360_s27, 5 }
  0x7a   : > { %s6488_s18 = scalar_lea.hbm %s7447_s0, %s5313_s28  ;;  %s364_s30 = scalar_lea.vmem [#allocation2], %s4993_s29 }
  0x7b   : > { %s7469_s24 = scalar_select %p6479_p13, 1, 0 }
  0x7c   : > { %s371_s15 = sshll.u32 %s364_s30, 4  ;;  %p6490_p5 = pnand %p5494_p10, %p42_p11  ;;  %s6494_s15 = int_to_ptr.vmem [resolvable:$true] %s371_s15 }
  0x7d   : > { %s6496_s20 = scalar_lea.sflag [#allocation3], %s360_s27  ;;  %s6192_s14 = scalar_lea.hbm %s6488_s18, 512 }
  0x7e   : > { %p6193_p0 = scmp.ne.s32.totalorder %s6488_s18, %s6192_s14  ;;  %p6194_p2 = pneg %p6490_p5 }
  0x7f   : > { %s6197_s29 = scalar_lea.hbm %s7447_s0, 2048  ;;  %p6198_p8 = scmp.lt.s32.totalorder %s6488_s18, %s7447_s0 }
  0x80   : > { %p6195_p4 = pnand %p6194_p2, %p6193_p0  ;;  %p6199_p6 = scmp.lt.s32.totalorder %s6197_s29, %s6192_s14 }
  0x82   : > { %p6196_p7 = pneg %p6195_p4  ;;  %p6200_p9 = por %p6199_p6, %p6198_p8 }
  0x84   : > { %p6201_p1 = pnand %p6200_p9, %p6196_p7 }
  0x86   : > { %6204 = shalt.err (!%p6201_p1)
}
  0x87   : > { %s6205_s27 = scalar_lea.vmem %s6494_s15, 512  ;;  %s6284_s25 = smov [#allocation2]  }
  0x88   : > { %p6206_p3 = scmp.ne.s32.totalorder %s6494_s15, %s6205_s27  ;;  %s6210_s26 = sshll.u32 %s6284_s25, 4  ;;  %s6211_s26 = int_to_ptr.vmem [resolvable:$false] %s6210_s26 }
  0x89   : > { %s6212_s28 = scalar_lea.vmem %s6211_s26, 1024  ;;  %p6213_p12 = scmp.lt.s32.totalorder %s6494_s15, %s6211_s26 }
  0x8a   : > { %p6208_p10 = pnand %p6206_p3, %p6194_p2  ;;  %p6214_p0 = scmp.lt.s32.totalorder %s6212_s28, %s6205_s27 }
  0x8c   : > { %p6209_p11 = pneg %p6208_p10  ;;  %p6215_p4 = por %p6214_p0, %p6213_p12 }
  0x8e   : > { %p6216_p13 = pnand %p6215_p4, %p6209_p11 }
  0x90   : > { %6219 = shalt.err (!%p6216_p13)
}
  0x91   : > { %s7471_s14 = smov 4   ;;  %s7472_s19 = smov 64  }
  0x92   : > { %5485 = dma.hbm_to_vmem [thread:$0]  (!%p6490_p5), %s6488_s18, 512, %s6494_s15, %s6496_s20, %s7472_s19, %s7472_s19, %s7471_s14  }
  0x93   : > { %p7473_p2 = scmp.ne.s32.totalorder %s7465_s17, 0 }
  0x94   : > { %s385_s25 = sand.u32 (!%p7473_p2), 1, %s6262_s10   ;;  %p7474_p13 = scmp.ne.s32.totalorder (!%p7473_p2), %s7469_s24, 0 }
  0x95   : > { %383 = sbr.rel (%p7473_p2) target bundleno = 1308 (0x51c), region = 56  ;;  %s4997_s26 = sshll.u32 (!%p7473_p2), %s385_s25, 5 }
  0x96   : > { %s386_s29 = scalar_lea.sflag (!%p7473_p2), [#allocation3], %s385_s25  ;;  %s6523_s13 = scalar_lea.vmem (!%p7473_p2), [#allocation2], %s4997_s26 }
  0x9a   : > { %6237 = dma.done.wait (%p7474_p13), %s386_s29, 512  }
  0x9b   : > { %6239 = vsyncadd (%p7474_p13), %s386_s29, 4294966784  ;;  %p7475_p7 = scmp.ne.s32.totalorder %s7464_s16, 0 }
  0x9d   : > { %6241 = dma.done.wait (%p7475_p7), [#allocation5], 1040  }
  0x9e   : > { %6243 = vsyncadd (%p7475_p7), [#allocation5], 4294966256 }
  0x9f   : > { %6245 = dma.done.wait (%p7475_p7), [#allocation8], 1040  }
  0xa0   : > { %6247 = vsyncadd (%p7475_p7), [#allocation8], 4294966256 }
  0xa1   : > { %6249 = dma.done.wait (%p7475_p7), [#allocation11], 1040  }
  0xa2   : > { %6251 = vsyncadd (%p7475_p7), [#allocation11], 4294966256 }
  0xa3   : > { %6253 = dma.done.wait (%p7475_p7), [#allocation14], 35360  }
  0xa4   : > { %6255 = vsyncadd (%p7475_p7), [#allocation14], 4294931936  ;;  %v5548_v0 = vld [vmem:[#allocation4 + $0x38] sm:$0xff]   ;;  %v5549_v1 = vld [vmem:[#allocation4 + $0x30] sm:$0xff]   ;;  %s7476_s16 = sadd.s32 4294967295, %s6270_s12   ;;  %vm4596_vm0 = vcmask 883712  }
  0xa5   : > { %5350 = vmatprep.subr.bf16.mxu0 %v5548_v0  ;;  %v5550_v2 = vld [vmem:[#allocation4 + $0x28] sm:$0xff]   ;;  %v5551_v3 = vld [vmem:[#allocation4 + $0x20] sm:$0xff]   ;;  %v5552_v5 = vld [vmem:[#allocation4 + $0x18] sm:$0xff]   ;;  %s5006_s17 = sshll.u32 %s7476_s16, 3 }
  0xa6   : > { %5351 = vmatpush3.bf16.msra.mxu0 %v5548_v0  ;;  %v5556_v4 = vld [vmem:[%s6523_s13] sm:$0xff]   ;;  %v5561_v7 = vld [vmem:[#allocation7 + $0x30] sm:$0xff]   ;;  %v5562_v9 = vld [vmem:[#allocation7 + $0x28] sm:$0xff]   ;;  %p459_p5 = scmp.lt.s32.totalorder %s5006_s17, 31 }
  0xa7   : > { %5352 = vmatprep.subr.bf16.mxu0 %v5549_v1  ;;  %5366 = vmatprep.mubr.bf16.mxu0 %v5556_v4  ;;  %v5560_v6 = vld [vmem:[#allocation7 + $0x38] sm:$0xff]   ;;  %v5553_v8 = vld [vmem:[#allocation4 + $0x10] sm:$0xff]   ;;  %v5554_v10 = vld [vmem:[#allocation4 + $0x8] sm:$0xff]  }
  0xa8   : > { %5374 = vmatprep.subr.bf16.mxu1 %v5560_v6  ;;  %v5563_v11 = vld [vmem:[#allocation7 + $0x20] sm:$0xff]   ;;  %v5558_v14 = vld [vmem:[%s6523_s13 + $0x10] sm:$0xff]   ;;  %v5559_v15 = vld [vmem:[%s6523_s13 + $0x18] sm:$0xff]   ;;  %s7482_s17 = smov (!%p459_p5, %s5006_s17), 31 }
  0xa9   : > { %5375 = vmatpush3.bf16.msra.mxu1 %v5560_v6  ;;  %v5555_v12 = vld [vmem:[#allocation4] sm:$0xff]   ;;  %v5557_v13 = vld [vmem:[%s6523_s13 + $0x8] sm:$0xff]   ;;  %v5565_v17 = vld [vmem:[#allocation7 + $0x10] sm:$0xff]   ;;  %s5422_s12 = smul.u32 272, %s7482_s17 }
  0xaa   : > { %5353 = vmatpush3.bf16.msra.mxu0 %v5549_v1  ;;  %5376 = vmatprep.subr.bf16.mxu1 %v5561_v7  ;;  %v5564_v16 = vld [vmem:[#allocation7 + $0x18] sm:$0xff]   ;;  %v5566_v18 = vld [vmem:[#allocation7 + $0x8] sm:$0xff]   ;;  %v5567_v19 = vld [vmem:[#allocation7] sm:$0xff]  }
  0xab   : > { %5354 = vmatprep.subr.bf16.mxu0 %v5550_v2  ;;  %v5568_v20 = vld [vmem:[#allocation10 + $0x38] sm:$0xff]   ;;  %v5569_v21 = vld [vmem:[#allocation10 + $0x30] sm:$0xff]   ;;  %v5570_v22 = vld [vmem:[#allocation10 + $0x28] sm:$0xff]   ;;  %s6714_s15 = scalar_lea.vmem %s7456_s9, %s5422_s12 }
  0xac   : > { %v5571_v23 = vld [vmem:[#allocation10 + $0x20] sm:$0xff]   ;;  %v5008_v25 = vld [vmem:[#allocation6] ss:$0 sm:$0xff]  ;;  %v5573_v62 = vld [vmem:[#allocation10 + $0x10] sm:$0xff]  }
  0xad   : > { %5377 = vmatpush3.bf16.msra.mxu1 %v5561_v7  ;;  %v5572_v61 = vld [vmem:[#allocation10 + $0x18] sm:$0xff]   ;;  %v5574_v63 = vld [vmem:[#allocation10 + $0x8] sm:$0xff]   ;;  %v5575_v0 = vld [vmem:[#allocation10] sm:$0xff]  }
  0xae   : > { %5355 = vmatpush3.bf16.msra.mxu0 %v5550_v2  ;;  %5378 = vmatprep.subr.bf16.mxu1 %v5562_v9  ;;  %v5576_v1 = vld [vmem:[#allocation13 + $0x770] ss:$136 sps:$4 sm:$0xff]   ;;  %v5578_v2 = vld [vmem:[#allocation13 + $0x774] ss:$136 sps:$4 sm:$0xff]   ;;  %v5584_v4 = vld [vmem:[#allocation13 + $0x664] ss:$136 sps:$4 sm:$0xff]  }
  0xaf   : > { %5356 = vmatprep.subr.bf16.mxu0 %v5551_v3  ;;  %v5590_v6 = vld [vmem:[#allocation13 + $0x554] ss:$136 sps:$4 sm:$0xff]   ;;  %v5588_v7 = vld [vmem:[#allocation13 + $0x550] ss:$136 sps:$4 sm:$0xff]  }
  0xb1   : > { %5379 = vmatpush3.bf16.msra.mxu1 %v5562_v9  ;;  %v5594_v9 = vld [vmem:[#allocation13 + $0x440] ss:$136 sps:$4 sm:$0xff]  }
  0xb2   : > { %5357 = vmatpush3.bf16.msra.mxu0 %v5551_v3  ;;  %5380 = vmatprep.subr.bf16.mxu1 %v5563_v11  ;;  %v5581_v3 = vld [vmem:[#allocation13 + $0x77c] ss:$136 sps:$4 sm:$0xff]  }
  0xb3   : > { %5358 = vmatprep.subr.bf16.mxu0 %v5552_v5 }
  0xb5   : > { %5381 = vmatpush3.bf16.msra.mxu1 %v5563_v11  ;;  %v5600_v11 = vld [vmem:[#allocation13 + $0x330] ss:$136 sps:$4 sm:$0xff]  }
  0xb6   : > { %5359 = vmatpush3.bf16.msra.mxu0 %v5552_v5  ;;  %5382 = vmatprep.subr.bf16.mxu1 %v5564_v16  ;;  %v5582_v5 = vld [vmem:[#allocation13 + $0x660] ss:$136 sps:$4 sm:$0xff]  }
  0xb7   : > { %5360 = vmatprep.subr.bf16.mxu0 %v5553_v8 }
  0xb9   : > { %5383 = vmatpush3.bf16.msra.mxu1 %v5564_v16 }
  0xba   : > { %5361 = vmatpush3.bf16.msra.mxu0 %v5553_v8  ;;  %5384 = vmatprep.subr.bf16.mxu1 %v5565_v17  ;;  %v5596_v8 = vld [vmem:[#allocation13 + $0x444] ss:$136 sps:$4 sm:$0xff]  }
  0xbb   : > { %5362 = vmatprep.subr.bf16.mxu0 %v5554_v10 }
  0xbd   : > { %5385 = vmatpush3.bf16.msra.mxu1 %v5565_v17 }
  0xbe   : > { %5363 = vmatpush3.bf16.msra.mxu0 %v5554_v10  ;;  %5386 = vmatprep.subr.bf16.mxu1 %v5566_v18  ;;  %v5602_v10 = vld [vmem:[#allocation13 + $0x334] ss:$136 sps:$4 sm:$0xff]  }
  0xbf   : > { %5364 = vmatprep.subr.bf16.mxu0 %v5555_v12 }
  0xc1   : > { %5387 = vmatpush3.bf16.msra.mxu1 %v5566_v18 }
  0xc2   : > { %5365 = vmatpush3.bf16.msra.mxu0 %v5555_v12  ;;  %5388 = vmatprep.subr.bf16.mxu1 %v5567_v19 }
  0xc3   : > { %5398 = vmatprep.subr.bf16.mxu0 %v5568_v20 }
  0xc5   : > { %5367 = vmatmul.mubr.bf16.vlgmr.msra.gmra.mxu0 %v5557_v13  ;;  %5389 = vmatpush3.bf16.msra.mxu1 %v5567_v19  ;;  %v5021_v13 = vld [vmem:[#allocation9] ss:$0 sm:$0xff] }
  0xc6   : > { %5370 = vmatprep.mubr.bf16.mxu0 %v5558_v14  ;;  %5399 = vmatpush3.bf16.msra.mxu0 %v5568_v20 }
  0xc7   : > { %5400 = vmatprep.subr.bf16.mxu0 %v5569_v21  ;;  %2778 = vmatprep.subr.bf16.mxu1 %v5578_v2  ;;  %v5620_v2 = vld [vmem:[#allocation13 + $0x4] ss:$136 sps:$4 sm:$0xff]  }
  0xca   : > { %5401 = vmatpush3.bf16.msra.mxu0 %v5569_v21 }
  0xcb   : > { %5402 = vmatprep.subr.bf16.mxu0 %v5570_v22 }
  0xcd   : > { %5371 = vmatmul.mubr.bf16.gmra.mxu0 %v5559_v15 }
  0xce   : > { %5403 = vmatpush3.bf16.msra.mxu0 %v5570_v22 }
  0xcf   : > { %5404 = vmatprep.subr.bf16.mxu0 %v5571_v23 }
  0xd2   : > { %5405 = vmatpush3.bf16.msra.mxu0 %v5571_v23 }
  0xd3   : > { %5406 = vmatprep.subr.bf16.mxu0 %v5572_v61 }
  0xd6   : > { %5407 = vmatpush3.bf16.msra.mxu0 %v5572_v61  ;;  %v5609_v61 = vld [vmem:[#allocation13 + $0x228] ss:$136 sps:$4 sm:$0xff]  }
  0xd7   : > { %5408 = vmatprep.subr.bf16.mxu0 %v5573_v62 }
  0xda   : > { %5409 = vmatpush3.bf16.msra.mxu0 %v5573_v62  ;;  %v5614_v62 = vld [vmem:[#allocation13 + $0x114] ss:$136 sps:$4 sm:$0xff]  }
  0xdb   : > { %5410 = vmatprep.subr.bf16.mxu0 %v5574_v63 }
  0xde   : > { %5411 = vmatpush3.bf16.msra.mxu0 %v5574_v63  ;;  %v5617_v63 = vld [vmem:[#allocation13 + $0x11c] ss:$136 sps:$4 sm:$0xff]  }
  0xdf   : > { %5412 = vmatprep.subr.bf16.mxu0 %v5575_v0 }
  0xe2   : > { %5413 = vmatpush3.bf16.msra.mxu0 %v5575_v0  ;;  %v5612_v0 = vld [vmem:[#allocation13 + $0x110] ss:$136 sps:$4 sm:$0xff]  }
  0xe3   : > { %2851 = vmatprep.subr.bf16.mxu0 %v5581_v3  ;;  %v5623_v3 = vld [vmem:[#allocation13 + $0xc] ss:$136 sps:$4 sm:$0xff]  }
 0x185   : > { %v5368_v24 = vpop.f32.mrf.mxu0 }
 0x186   : > { %v612_v28 = vadd.f32 %v5368_v24, %v5008_v25 }
 0x187   : > { %v603_v26 = vpop.f32.mrf.mxu0 }
 0x188   : > { %v604_v27 = vadd.f32 %v5008_v25, %v603_v26  ;;  %v636_v35 = vmul.f32 0.01, %v612_v28 }
 0x189   : > { %v5369_v29 = vpop.f32.mrf.mxu0 }
 0x18a   : > { %v615_v30 = vadd.f32 %v5369_v29, %v5008_v25  ;;  %v634_v32 = vmul.f32 0.01, %v604_v27  ;;  %v644_v44 = vmax.f32 %v612_v28, %v636_v35 }
 0x18b   : > { %v606_v31 = vpop.f32.mrf.mxu0 }
 0x18c   : > { %v637_v33 = vmul.f32 0.01, %v615_v30  ;;  %v607_v34 = vadd.f32 %v5008_v25, %v606_v31  ;;  %v642_v42 = vmax.f32 %v604_v27, %v634_v32 }
 0x18d   : > { %v5372_v36 = vpop.f32.mrf.mxu0 }
 0x18e   : > { %v635_v37 = vmul.f32 0.01, %v607_v34  ;;  %v628_v38 = vadd.f32 %v5372_v36, %v5008_v25  ;;  %v645_v39 = vmax.f32 %v615_v30, %v637_v33  ;;  %v5579_v36 = vld [vmem:[#allocation13 + $0x778] ss:$136 sps:$4 sm:$0xff]  }
 0x18f   : > { %v619_v40 = vpop.f32.mrf.mxu0 }
 0x190   : > { %v620_v41 = vadd.f32 %v5008_v25, %v619_v40  ;;  %v643_v43 = vmax.f32 %v607_v34, %v635_v37  ;;  %v640_v45 = vmul.f32 0.01, %v628_v38  ;;  %v651_v51 = vpack.c.bf16 %v645_v39, %v644_v44  ;;  %v5587_v39 = vld [vmem:[#allocation13 + $0x66c] ss:$136 sps:$4 sm:$0xff]  }
 0x191   : > { %v5373_v46 = vpop.f32.mrf.mxu0 }
 0x192   : > { %v638_v47 = vmul.f32 0.01, %v620_v41  ;;  %v631_v48 = vadd.f32 %v5373_v46, %v5008_v25  ;;  %v650_v49 = vpack.c.bf16 %v643_v43, %v642_v42  ;;  %v648_v54 = vmax.f32 %v628_v38, %v640_v45  ;;  %v5585_v45 = vld [vmem:[#allocation13 + $0x668] ss:$136 sps:$4 sm:$0xff]  }
 0x193   : > { %v622_v50 = vpop.f32.mrf.mxu0 }
 0x194   : > { %v641_v52 = vmul.f32 0.01, %v631_v48  ;;  %v623_v53 = vadd.f32 %v5008_v25, %v622_v50  ;;  %5390 = vmatprep.mubr.bf16.mxu1 %v650_v49  ;;  %v646_v55 = vmax.f32 %v620_v41, %v638_v47  ;;  %v5593_v47 = vld [vmem:[#allocation13 + $0x55c] ss:$136 sps:$4 sm:$0xff]  }
 0x195   : > { %5391 = vmatmul.mubr.bf16.vlgmr.msra.gmra.mxu1 %v651_v51 }
 0x196   : > { %v649_v56 = vmax.f32 %v631_v48, %v641_v52  ;;  %v639_v57 = vmul.f32 0.01, %v623_v53  ;;  %2779 = vmatpush1.bf16.msra.mxu1 %v5576_v1  ;;  %v5591_v52 = vld [vmem:[#allocation13 + $0x558] ss:$136 sps:$4 sm:$0xff]  }
 0x197   : > { %2780 = vmatprep.subr.bf16.mxu1 %v5584_v4  ;;  %v5615_v1 = vld [vmem:[#allocation13 + $0x118] ss:$136 sps:$4 sm:$0xff]  }
 0x198   : > { %v647_v58 = vmax.f32 %v623_v53, %v639_v57  ;;  %v653_v59 = vpack.c.bf16 %v649_v56, %v648_v54  ;;  %v5599_v54 = vld [vmem:[#allocation13 + $0x44c] ss:$136 sps:$4 sm:$0xff]   ;;  %v5605_v56 = vld [vmem:[#allocation13 + $0x33c] ss:$136 sps:$4 sm:$0xff]   ;;  %v5603_v57 = vld [vmem:[#allocation13 + $0x338] ss:$136 sps:$4 sm:$0xff]  }
 0x199   : > { %v5618_v4 = vld [vmem:[#allocation13] ss:$136 sps:$4 sm:$0xff]  }
 0x19a   : > { %v652_v60 = vpack.c.bf16 %v647_v58, %v646_v55  ;;  %2781 = vmatpush1.bf16.msra.mxu1 %v5582_v5  ;;  %v5597_v55 = vld [vmem:[#allocation13 + $0x448] ss:$136 sps:$4 sm:$0xff]   ;;  %v5608_v58 = vld [vmem:[#allocation13 + $0x224] ss:$136 sps:$4 sm:$0xff]  }
 0x19b   : > { %2782 = vmatprep.subr.bf16.mxu1 %v5590_v6  ;;  %v5621_v5 = vld [vmem:[#allocation13 + $0x8] ss:$136 sps:$4 sm:$0xff]   ;;  %v5626_v6 = vld [vmem:[#allocation13 + $0x784] ss:$136 sps:$4 sm:$0xff]  }
 0x19c   : > { %5394 = vmatprep.mubr.bf16.mxu1 %v652_v60  ;;  %v5606_v60 = vld [vmem:[#allocation13 + $0x220] ss:$136 sps:$4 sm:$0xff]  }
 0x19d   : > { %5395 = vmatmul.mubr.bf16.gmra.mxu1 %v653_v59  ;;  %v5611_v59 = vld [vmem:[#allocation13 + $0x22c] ss:$136 sps:$4 sm:$0xff]  }
 0x19e   : > { %2783 = vmatpush1.bf16.msra.mxu1 %v5588_v7  ;;  %v5629_v7 = vld [vmem:[#allocation13 + $0x78c] ss:$136 sps:$4 sm:$0xff]  }
 0x19f   : > { %2784 = vmatprep.subr.bf16.mxu1 %v5596_v8  ;;  %v6285_v8 = vmov 0  }
 0x1a0   : > { %2810 = vmatprep.mubr.bf16.mxu1 %v6285_v8 }
 0x1a2   : > { %2785 = vmatpush1.bf16.msra.mxu1 %v5594_v9 }
 0x1a3   : > { %2786 = vmatprep.subr.bf16.mxu1 %v5602_v10  ;;  %v6551_v10 = vld [vmem:[#allocation12] ss:$0 sm:$0xff] }
 0x1a6   : > { %2787 = vmatpush1.bf16.msra.mxu1 %v5600_v11 }
 0x1a7   : > { %2788 = vmatprep.subr.bf16.mxu1 %v5608_v58 }
 0x1aa   : > { %2789 = vmatpush1.bf16.msra.mxu1 %v5606_v60  ;;  %v5656_v60 = vld [vmem:[#allocation13 + $0x234] ss:$136 sps:$4 sm:$0xff]  }
 0x1ab   : > { %2790 = vmatprep.subr.bf16.mxu1 %v5614_v62 }
 0x1ae   : > { %2791 = vmatpush1.bf16.msra.mxu1 %v5612_v0  ;;  %v5657_v0 = vld [vmem:[#allocation13 + $0x238] ss:$136 sps:$4 sm:$0xff]  }
 0x1af   : > { %2792 = vmatprep.subr.bf16.mxu1 %v5620_v2  ;;  %v5662_v2 = vld [vmem:[#allocation13 + $0x124] ss:$136 sps:$4 sm:$0xff]  }
 0x1b2   : > { %2793 = vmatpush1.bf16.msra.mxu1 %v5618_v4 }
 0x1b3   : > { %2924 = vmatprep.subr.bf16.mxu1 %v5626_v6  ;;  %v5663_v6 = vld [vmem:[#allocation13 + $0x128] ss:$136 sps:$4 sm:$0xff]  }
 0x255   : > { %v5392_v12 = vpop.f32.mrf.mxu1 }
 0x256   : > { %v768_v16 = vadd.f32 %v5392_v12, %v5021_v13 }
 0x257   : > { %v759_v14 = vpop.f32.mrf.mxu1 }
 0x258   : > { %v760_v15 = vadd.f32 %v5021_v13, %v759_v14  ;;  %v792_v23 = vmul.f32 0.01, %v768_v16 }
 0x259   : > { %v5393_v17 = vpop.f32.mrf.mxu1 }
 0x25a   : > { %v771_v18 = vadd.f32 %v5393_v17, %v5021_v13  ;;  %v790_v20 = vmul.f32 0.01, %v760_v15  ;;  %v800_v31 = vmax.f32 %v768_v16, %v792_v23 }
 0x25b   : > { %v762_v19 = vpop.f32.mrf.mxu1 }
 0x25c   : > { %v793_v21 = vmul.f32 0.01, %v771_v18  ;;  %v763_v22 = vadd.f32 %v5021_v13, %v762_v19  ;;  %v798_v28 = vmax.f32 %v760_v15, %v790_v20 }
 0x25d   : > { %v5396_v24 = vpop.f32.mrf.mxu1 }
 0x25e   : > { %v791_v25 = vmul.f32 0.01, %v763_v22  ;;  %v801_v26 = vmax.f32 %v771_v18, %v793_v21  ;;  %v784_v32 = vadd.f32 %v5396_v24, %v5021_v13 }
 0x25f   : > { %v775_v27 = vpop.f32.mrf.mxu1 }
 0x260   : > { %v799_v29 = vmax.f32 %v763_v22, %v791_v25  ;;  %v776_v30 = vadd.f32 %v5021_v13, %v775_v27  ;;  %v807_v37 = vpack.c.bf16 %v801_v26, %v800_v31  ;;  %v796_v43 = vmul.f32 0.01, %v784_v32  ;;  %v5624_v25 = vld [vmem:[#allocation13 + $0x780] ss:$136 sps:$4 sm:$0xff]  }
 0x261   : > { %v5397_v33 = vpop.f32.mrf.mxu1  ;;  %v5627_v26 = vld [vmem:[#allocation13 + $0x788] ss:$136 sps:$4 sm:$0xff]  }
 0x262   : > { %v787_v34 = vadd.f32 %v5397_v33, %v5021_v13  ;;  %v806_v35 = vpack.c.bf16 %v799_v29, %v798_v28  ;;  %v794_v40 = vmul.f32 0.01, %v776_v30  ;;  %v804_v50 = vmax.f32 %v784_v32, %v796_v43  ;;  %v5632_v29 = vld [vmem:[#allocation13 + $0x674] ss:$136 sps:$4 sm:$0xff]   ;;  %v5630_v33 = vld [vmem:[#allocation13 + $0x670] ss:$136 sps:$4 sm:$0xff]  }
 0x263   : > { %v778_v38 = vpop.f32.mrf.mxu1 }
 0x264   : > { %v797_v41 = vmul.f32 0.01, %v787_v34  ;;  %v779_v42 = vadd.f32 %v5021_v13, %v778_v38  ;;  %5414 = vmatprep.mubr.bf16.mxu0 %v806_v35  ;;  %v802_v48 = vmax.f32 %v776_v30, %v794_v40  ;;  %v5635_v30 = vld [vmem:[#allocation13 + $0x67c] ss:$136 sps:$4 sm:$0xff]   ;;  %v5641_v38 = vld [vmem:[#allocation13 + $0x56c] ss:$136 sps:$4 sm:$0xff]  }
 0x265   : > { %5415 = vmatmul.mubr.bf16.vlgmr.msra.gmra.mxu0 %v807_v37  ;;  %v5638_v37 = vld [vmem:[#allocation13 + $0x564] ss:$136 sps:$4 sm:$0xff]  }
 0x266   : > { %v795_v44 = vmul.f32 0.01, %v779_v42  ;;  %2852 = vmatpush1.bf16.msra.mxu0 %v5579_v36  ;;  %v805_v46 = vmax.f32 %v787_v34, %v797_v41  ;;  %v5633_v34 = vld [vmem:[#allocation13 + $0x678] ss:$136 sps:$4 sm:$0xff]  }
 0x267   : > { %2853 = vmatprep.subr.bf16.mxu0 %v5587_v39  ;;  %v5636_v41 = vld [vmem:[#allocation13 + $0x560] ss:$136 sps:$4 sm:$0xff]  }
 0x268   : > { %v803_v49 = vmax.f32 %v779_v42, %v795_v44  ;;  %v809_v53 = vpack.c.bf16 %v805_v46, %v804_v50  ;;  %v5639_v42 = vld [vmem:[#allocation13 + $0x568] ss:$136 sps:$4 sm:$0xff]   ;;  %v5647_v46 = vld [vmem:[#allocation13 + $0x45c] ss:$136 sps:$4 sm:$0xff]  }
 0x26a   : > { %v808_v51 = vpack.c.bf16 %v803_v49, %v802_v48  ;;  %2854 = vmatpush1.bf16.msra.mxu0 %v5585_v45  ;;  %v5644_v45 = vld [vmem:[#allocation13 + $0x454] ss:$136 sps:$4 sm:$0xff]   ;;  %v5642_v48 = vld [vmem:[#allocation13 + $0x450] ss:$136 sps:$4 sm:$0xff]  }
 0x26b   : > { %2855 = vmatprep.subr.bf16.mxu0 %v5593_v47  ;;  %v5645_v49 = vld [vmem:[#allocation13 + $0x458] ss:$136 sps:$4 sm:$0xff]  }
 0x26c   : > { %5418 = vmatprep.mubr.bf16.mxu0 %v808_v51 }
 0x26d   : > { %5419 = vmatmul.mubr.bf16.gmra.mxu0 %v809_v53  ;;  %v5653_v53 = vld [vmem:[#allocation13 + $0x34c] ss:$136 sps:$4 sm:$0xff]  }
 0x26e   : > { %2856 = vmatpush1.bf16.msra.mxu0 %v5591_v52  ;;  %2883 = vmatprep.mubr.bf16.mxu0 %v6285_v8  ;;  %v5650_v52 = vld [vmem:[#allocation13 + $0x344] ss:$136 sps:$4 sm:$0xff]  }
 0x26f   : > { %2857 = vmatprep.subr.bf16.mxu0 %v5599_v54 }
 0x272   : > { %2858 = vmatpush1.bf16.msra.mxu0 %v5597_v55 }
 0x273   : > { %2859 = vmatprep.subr.bf16.mxu0 %v5605_v56  ;;  %v5648_v56 = vld [vmem:[#allocation13 + $0x340] ss:$136 sps:$4 sm:$0xff]  }
 0x276   : > { %2860 = vmatpush1.bf16.msra.mxu0 %v5603_v57  ;;  %v5651_v57 = vld [vmem:[#allocation13 + $0x348] ss:$136 sps:$4 sm:$0xff]  }
 0x277   : > { %2861 = vmatprep.subr.bf16.mxu0 %v5611_v59 }
 0x27a   : > { %2862 = vmatpush1.bf16.msra.mxu0 %v5609_v61  ;;  %v5659_v61 = vld [vmem:[#allocation13 + $0x23c] ss:$136 sps:$4 sm:$0xff]  }
 0x27b   : > { %2863 = vmatprep.subr.bf16.mxu0 %v5617_v63  ;;  %v5654_v63 = vld [vmem:[#allocation13 + $0x230] ss:$136 sps:$4 sm:$0xff]  }
 0x27e   : > { %2864 = vmatpush1.bf16.msra.mxu0 %v5615_v1 }
 0x27f   : > { %2865 = vmatprep.subr.bf16.mxu0 %v5623_v3  ;;  %v5665_v3 = vld [vmem:[#allocation13 + $0x12c] ss:$136 sps:$4 sm:$0xff]  }
 0x282   : > { %2866 = vmatpush1.bf16.msra.mxu0 %v5621_v5  ;;  %v5660_v5 = vld [vmem:[#allocation13 + $0x120] ss:$136 sps:$4 sm:$0xff]  }
 0x283   : > { %2997 = vmatprep.subr.bf16.mxu0 %v5629_v7 }
 0x325   : > { %v5416_v9 = vpop.f32.mrf.mxu0 }
 0x326   : > { %v924_v21 = vadd.f32 %v5416_v9, %v6551_v10  ;;  %v5668_v9 = vld [vmem:[#allocation13 + $0x14] ss:$136 sps:$4 sm:$0xff]  }
 0x327   : > { %v915_v11 = vpop.f32.mrf.mxu0 }
 0x328   : > { %v916_v12 = vadd.f32 %v6551_v10, %v915_v11  ;;  %v948_v32 = vmul.f32 0.01, %v924_v21  ;;  %v5666_v11 = vld [vmem:[#allocation13 + $0x10] ss:$136 sps:$4 sm:$0xff]  }
 0x329   : > { %v5417_v13 = vpop.f32.mrf.mxu0 }
 0x32a   : > { %v946_v15 = vmul.f32 0.01, %v916_v12  ;;  %v927_v18 = vadd.f32 %v5417_v13, %v6551_v10  ;;  %v956_v39 = vmax.f32 %v924_v21, %v948_v32  ;;  %v5674_v13 = vld [vmem:[#allocation13 + $0x794] ss:$136 sps:$4 sm:$0xff]   ;;  %v5696_v32 = vld [vmem:[#allocation13 + $0x350] ss:$136 sps:$4 sm:$0xff]  }
 0x32b   : > { %v918_v14 = vpop.f32.mrf.mxu0  ;;  %v5686_v21 = vld [vmem:[#allocation13 + $0x574] ss:$136 sps:$4 sm:$0xff]  }
 0x32c   : > { %v919_v16 = vadd.f32 %v6551_v10, %v918_v14  ;;  %v954_v22 = vmax.f32 %v916_v12, %v946_v15  ;;  %v949_v27 = vmul.f32 0.01, %v927_v18  ;;  %v5669_v12 = vld [vmem:[#allocation13 + $0x18] ss:$136 sps:$4 sm:$0xff]   ;;  %v5677_v14 = vld [vmem:[#allocation13 + $0x79c] ss:$136 sps:$4 sm:$0xff]  }
 0x32d   : > { %v5420_v17 = vpop.f32.mrf.mxu0  ;;  %v5672_v15 = vld [vmem:[#allocation13 + $0x790] ss:$136 sps:$4 sm:$0xff]  }
 0x32e   : > { %v947_v19 = vmul.f32 0.01, %v919_v16  ;;  %v957_v35 = vmax.f32 %v927_v18, %v949_v27  ;;  %v940_v54 = vadd.f32 %v5420_v17, %v6551_v10  ;;  %v5680_v17 = vld [vmem:[#allocation13 + $0x684] ss:$136 sps:$4 sm:$0xff]   ;;  %v5690_v27 = vld [vmem:[#allocation13 + $0x460] ss:$136 sps:$4 sm:$0xff]  }
 0x32f   : > { %v931_v20 = vpop.f32.mrf.mxu0  ;;  %v5683_v18 = vld [vmem:[#allocation13 + $0x68c] ss:$136 sps:$4 sm:$0xff]  }
 0x330   : > { %v955_v23 = vmax.f32 %v919_v16, %v947_v19  ;;  %v932_v40 = vadd.f32 %v6551_v10, %v931_v20  ;;  %v6565_v43 = vpack.c.bf16 %v957_v35, %v956_v39  ;;  %v952_v62 = vmul.f32 0.01, %v940_v54  ;;  %v5675_v16 = vld [vmem:[#allocation13 + $0x798] ss:$136 sps:$4 sm:$0xff]   ;;  %v5681_v20 = vld [vmem:[#allocation13 + $0x688] ss:$136 sps:$4 sm:$0xff]  }
 0x331   : > { %v5421_v24 = vpop.f32.mrf.mxu0  ;;  %v5678_v19 = vld [vmem:[#allocation13 + $0x680] ss:$136 sps:$4 sm:$0xff]   ;;  %v5707_v35 = vld [vmem:[#allocation13 + $0x24c] ss:$136 sps:$4 sm:$0xff]   ;;  %v5713_v39 = vld [vmem:[#allocation13 + $0x13c] ss:$136 sps:$4 sm:$0xff]  }
 0x332   : > { %v6557_v28 = vpack.c.bf16 %v955_v23, %v954_v22  ;;  %v950_v47 = vmul.f32 0.01, %v932_v40  ;;  %v943_v50 = vadd.f32 %v5421_v24, %v6551_v10  ;;  %v960_v4 = vmax.f32 %v940_v54, %v952_v62  ;;  %v5689_v22 = vld [vmem:[#allocation13 + $0x57c] ss:$136 sps:$4 sm:$0xff]   ;;  %v5684_v23 = vld [vmem:[#allocation13 + $0x570] ss:$136 sps:$4 sm:$0xff]  }
 0x333   : > { %v934_v31 = vpop.f32.mrf.mxu0  ;;  %v5687_v24 = vld [vmem:[#allocation13 + $0x578] ss:$136 sps:$4 sm:$0xff]  }
 0x334   : > { %2811 = vmatmul.mubr.bf16.vlgmr.msra.gmra.mxu1 %v6557_v28  ;;  %2884 = vmatmul.mubr.bf16.vlgmr.msra.gmra.mxu0 %v6557_v28  ;;  %v935_v36 = vadd.f32 %v6551_v10, %v934_v31  ;;  %v958_v55 = vmax.f32 %v932_v40, %v950_v47  ;;  %v953_v58 = vmul.f32 0.01, %v943_v50  ;;  %v5671_v10 = vld [vmem:[#allocation13 + $0x1c] ss:$136 sps:$4 sm:$0xff]   ;;  %v5708_v40 = vld [vmem:[#allocation13 + $0x130] ss:$136 sps:$4 sm:$0xff]  }
 0x335   : > { %2925 = vmatpush1.bf16.msra.mxu1 %v5624_v25  ;;  %2998 = vmatpush1.bf16.msra.mxu0 %v5627_v26  ;;  %v5692_v25 = vld [vmem:[#allocation13 + $0x464] ss:$136 sps:$4 sm:$0xff]   ;;  %v5729_v54 = vld [vmem:[#allocation13 + $0x698] ss:$136 sps:$4 sm:$0xff]  }
 0x336   : > { %2926 = vmatprep.subr.bf16.mxu1 %v5632_v29  ;;  %2999 = vmatprep.subr.bf16.mxu0 %v5635_v30  ;;  %v951_v44 = vmul.f32 0.01, %v935_v36  ;;  %v961_v1 = vmax.f32 %v943_v50, %v953_v58  ;;  %v5695_v26 = vld [vmem:[#allocation13 + $0x46c] ss:$136 sps:$4 sm:$0xff]   ;;  %v5693_v29 = vld [vmem:[#allocation13 + $0x468] ss:$136 sps:$4 sm:$0xff]  }
 0x337   : > { %2820 = vmatprep.mubr.bf16.mxu1 %v6285_v8  ;;  %2893 = vmatprep.mubr.bf16.mxu0 %v6285_v8  ;;  %v5698_v30 = vld [vmem:[#allocation13 + $0x354] ss:$136 sps:$4 sm:$0xff]   ;;  %v5722_v47 = vld [vmem:[#allocation13 + $0x7a4] ss:$136 sps:$4 sm:$0xff]   ;;  %v5723_v50 = vld [vmem:[#allocation13 + $0x7a8] ss:$136 sps:$4 sm:$0xff]  }
 0x338   : > { %v959_v51 = vmax.f32 %v935_v36, %v951_v44  ;;  %v6579_v7 = vpack.c.bf16 %v961_v1, %v960_v4  ;;  %v5701_v31 = vld [vmem:[#allocation13 + $0x35c] ss:$136 sps:$4 sm:$0xff]   ;;  %v5702_v36 = vld [vmem:[#allocation13 + $0x240] ss:$136 sps:$4 sm:$0xff]   ;;  %v5719_v44 = vld [vmem:[#allocation13 + $0x2c] ss:$136 sps:$4 sm:$0xff]  }
 0x339   : > { %2927 = vmatpush1.bf16.msra.mxu1 %v5630_v33  ;;  %3000 = vmatpush1.bf16.msra.mxu0 %v5633_v34  ;;  %v5699_v33 = vld [vmem:[#allocation13 + $0x358] ss:$136 sps:$4 sm:$0xff]   ;;  %v5704_v34 = vld [vmem:[#allocation13 + $0x244] ss:$136 sps:$4 sm:$0xff]   ;;  %v5735_v58 = vld [vmem:[#allocation13 + $0x588] ss:$136 sps:$4 sm:$0xff]  }
 0x33a   : > { %2928 = vmatprep.subr.bf16.mxu1 %v5638_v37  ;;  %3001 = vmatprep.subr.bf16.mxu0 %v5641_v38  ;;  %v6573_v59 = vpack.c.bf16 %v959_v51, %v958_v55  ;;  %v5705_v37 = vld [vmem:[#allocation13 + $0x248] ss:$136 sps:$4 sm:$0xff]   ;;  %v5710_v38 = vld [vmem:[#allocation13 + $0x134] ss:$136 sps:$4 sm:$0xff]   ;;  %v5734_v55 = vld [vmem:[#allocation13 + $0x584] ss:$136 sps:$4 sm:$0xff]  }
 0x33b   : > { %v5728_v51 = vld [vmem:[#allocation13 + $0x694] ss:$136 sps:$4 sm:$0xff]   ;;  %v5738_v62 = vld [vmem:[#allocation13 + $0x470] ss:$136 sps:$4 sm:$0xff]  }
 0x33c   : > { %2821 = vmatmul.mubr.bf16.gmra.mxu1 %v6565_v43  ;;  %2894 = vmatmul.mubr.bf16.gmra.mxu0 %v6565_v43  ;;  %v5749_v1 = vld [vmem:[#allocation13 + $0x36c] ss:$136 sps:$4 sm:$0xff]  }
 0x33d   : > { %2929 = vmatpush1.bf16.msra.mxu1 %v5636_v41  ;;  %3002 = vmatpush1.bf16.msra.mxu0 %v5639_v42  ;;  %v5711_v41 = vld [vmem:[#allocation13 + $0x138] ss:$136 sps:$4 sm:$0xff]   ;;  %v5716_v42 = vld [vmem:[#allocation13 + $0x24] ss:$136 sps:$4 sm:$0xff]   ;;  %v5752_v4 = vld [vmem:[#allocation13 + $0x254] ss:$136 sps:$4 sm:$0xff]  }
 0x33e   : > { %2930 = vmatprep.subr.bf16.mxu1 %v5644_v45  ;;  %3003 = vmatprep.subr.bf16.mxu0 %v5647_v46  ;;  %v5714_v45 = vld [vmem:[#allocation13 + $0x20] ss:$136 sps:$4 sm:$0xff]  }
 0x33f   : > { %2830 = vmatprep.mubr.bf16.mxu1 %v6285_v8  ;;  %2903 = vmatprep.mubr.bf16.mxu0 %v6285_v8  ;;  %v5717_v46 = vld [vmem:[#allocation13 + $0x28] ss:$136 sps:$4 sm:$0xff]  }
 0x341   : > { %2931 = vmatpush1.bf16.msra.mxu1 %v5642_v48  ;;  %3004 = vmatpush1.bf16.msra.mxu0 %v5645_v49  ;;  %v5725_v48 = vld [vmem:[#allocation13 + $0x7ac] ss:$136 sps:$4 sm:$0xff]   ;;  %v5720_v49 = vld [vmem:[#allocation13 + $0x7a0] ss:$136 sps:$4 sm:$0xff]  }
 0x342   : > { %2932 = vmatprep.subr.bf16.mxu1 %v5650_v52  ;;  %3005 = vmatprep.subr.bf16.mxu0 %v5653_v53  ;;  %v5731_v52 = vld [vmem:[#allocation13 + $0x69c] ss:$136 sps:$4 sm:$0xff]   ;;  %v5726_v53 = vld [vmem:[#allocation13 + $0x690] ss:$136 sps:$4 sm:$0xff]  }
 0x344   : > { %2831 = vmatmul.mubr.bf16.gmra.mxu1 %v6573_v59  ;;  %2904 = vmatmul.mubr.bf16.gmra.mxu0 %v6573_v59 }
 0x345   : > { %2933 = vmatpush1.bf16.msra.mxu1 %v5648_v56  ;;  %3006 = vmatpush1.bf16.msra.mxu0 %v5651_v57  ;;  %v5737_v56 = vld [vmem:[#allocation13 + $0x58c] ss:$136 sps:$4 sm:$0xff]   ;;  %v5732_v57 = vld [vmem:[#allocation13 + $0x580] ss:$136 sps:$4 sm:$0xff]  }
 0x346   : > { %2934 = vmatprep.subr.bf16.mxu1 %v5656_v60  ;;  %3007 = vmatprep.subr.bf16.mxu0 %v5659_v61  ;;  %v5740_v60 = vld [vmem:[#allocation13 + $0x474] ss:$136 sps:$4 sm:$0xff]  }
 0x347   : > { %2840 = vmatprep.mubr.bf16.mxu1 %v6285_v8  ;;  %2913 = vmatprep.mubr.bf16.mxu0 %v6285_v8  ;;  %v5743_v61 = vld [vmem:[#allocation13 + $0x47c] ss:$136 sps:$4 sm:$0xff]  }
 0x349   : > { %2935 = vmatpush1.bf16.msra.mxu1 %v5654_v63  ;;  %3008 = vmatpush1.bf16.msra.mxu0 %v5657_v0  ;;  %v5741_v63 = vld [vmem:[#allocation13 + $0x478] ss:$136 sps:$4 sm:$0xff]   ;;  %v5746_v0 = vld [vmem:[#allocation13 + $0x364] ss:$136 sps:$4 sm:$0xff]  }
 0x34a   : > { %2936 = vmatprep.subr.bf16.mxu1 %v5662_v2  ;;  %3009 = vmatprep.subr.bf16.mxu0 %v5665_v3  ;;  %v5744_v2 = vld [vmem:[#allocation13 + $0x360] ss:$136 sps:$4 sm:$0xff]  }
 0x34b   : > { %v5747_v3 = vld [vmem:[#allocation13 + $0x368] ss:$136 sps:$4 sm:$0xff]  }
 0x34c   : > { %2841 = vmatmul.mubr.bf16.gmra.mxu1 %v6579_v7  ;;  %2914 = vmatmul.mubr.bf16.gmra.mxu0 %v6579_v7 }
 0x34d   : > { %2937 = vmatpush1.bf16.msra.mxu1 %v5660_v5  ;;  %3010 = vmatpush1.bf16.msra.mxu0 %v5663_v6  ;;  %v5755_v5 = vld [vmem:[#allocation13 + $0x25c] ss:$136 sps:$4 sm:$0xff]   ;;  %v5750_v6 = vld [vmem:[#allocation13 + $0x250] ss:$136 sps:$4 sm:$0xff]  }
 0x34e   : > { %2938 = vmatprep.subr.bf16.mxu1 %v5668_v9  ;;  %3011 = vmatprep.subr.bf16.mxu0 %v5671_v10  ;;  %v5753_v9 = vld [vmem:[#allocation13 + $0x258] ss:$136 sps:$4 sm:$0xff]   ;;  %v5758_v10 = vld [vmem:[#allocation13 + $0x144] ss:$136 sps:$4 sm:$0xff]  }
 0x34f   : > { %2956 = vmatprep.mubr.bf16.mxu1 %v6285_v8  ;;  %3029 = vmatprep.mubr.bf16.mxu0 %v6285_v8 }
 0x351   : > { %2939 = vmatpush1.bf16.msra.mxu1 %v5666_v11  ;;  %3012 = vmatpush1.bf16.msra.mxu0 %v5669_v12  ;;  %v5761_v11 = vld [vmem:[#allocation13 + $0x14c] ss:$136 sps:$4 sm:$0xff]   ;;  %v5756_v12 = vld [vmem:[#allocation13 + $0x140] ss:$136 sps:$4 sm:$0xff]  }
 0x352   : > { %3070 = vmatprep.subr.bf16.mxu1 %v5674_v13  ;;  %3143 = vmatprep.subr.bf16.mxu0 %v5677_v14  ;;  %v5759_v13 = vld [vmem:[#allocation13 + $0x148] ss:$136 sps:$4 sm:$0xff]   ;;  %v5764_v14 = vld [vmem:[#allocation13 + $0x34] ss:$136 sps:$4 sm:$0xff]  }
 0x354   : > { %2957 = vmatmul.mubr.bf16.vlgmr.msra.gmra.mxu1 %v6557_v28  ;;  %3030 = vmatmul.mubr.bf16.vlgmr.msra.gmra.mxu0 %v6557_v28 }
 0x355   : > { %3071 = vmatpush1.bf16.msra.mxu1 %v5672_v15  ;;  %3144 = vmatpush1.bf16.msra.mxu0 %v5675_v16  ;;  %v5767_v15 = vld [vmem:[#allocation13 + $0x3c] ss:$136 sps:$4 sm:$0xff]   ;;  %v5762_v16 = vld [vmem:[#allocation13 + $0x30] ss:$136 sps:$4 sm:$0xff]  }
 0x356   : > { %3072 = vmatprep.subr.bf16.mxu1 %v5680_v17  ;;  %3145 = vmatprep.subr.bf16.mxu0 %v5683_v18  ;;  %v5765_v17 = vld [vmem:[#allocation13 + $0x38] ss:$136 sps:$4 sm:$0xff]   ;;  %v5770_v18 = vld [vmem:[#allocation13 + $0x7b4] ss:$136 sps:$4 sm:$0xff]  }
 0x357   : > { %2966 = vmatprep.mubr.bf16.mxu1 %v6285_v8  ;;  %3039 = vmatprep.mubr.bf16.mxu0 %v6285_v8 }
 0x359   : > { %3073 = vmatpush1.bf16.msra.mxu1 %v5678_v19  ;;  %3146 = vmatpush1.bf16.msra.mxu0 %v5681_v20  ;;  %v5773_v19 = vld [vmem:[#allocation13 + $0x7bc] ss:$136 sps:$4 sm:$0xff]   ;;  %v5768_v20 = vld [vmem:[#allocation13 + $0x7b0] ss:$136 sps:$4 sm:$0xff]  }
 0x35a   : > { %3074 = vmatprep.subr.bf16.mxu1 %v5686_v21  ;;  %3147 = vmatprep.subr.bf16.mxu0 %v5689_v22  ;;  %v5771_v21 = vld [vmem:[#allocation13 + $0x7b8] ss:$136 sps:$4 sm:$0xff]   ;;  %v5776_v22 = vld [vmem:[#allocation13 + $0x6a4] ss:$136 sps:$4 sm:$0xff]  }
 0x35c   : > { %2967 = vmatmul.mubr.bf16.gmra.mxu1 %v6565_v43  ;;  %3040 = vmatmul.mubr.bf16.gmra.mxu0 %v6565_v43 }
 0x35d   : > { %3075 = vmatpush1.bf16.msra.mxu1 %v5684_v23  ;;  %3148 = vmatpush1.bf16.msra.mxu0 %v5687_v24  ;;  %v5779_v23 = vld [vmem:[#allocation13 + $0x6ac] ss:$136 sps:$4 sm:$0xff]   ;;  %v5774_v24 = vld [vmem:[#allocation13 + $0x6a0] ss:$136 sps:$4 sm:$0xff]  }
 0x35e   : > { %3076 = vmatprep.subr.bf16.mxu1 %v5692_v25  ;;  %3149 = vmatprep.subr.bf16.mxu0 %v5695_v26  ;;  %v5777_v25 = vld [vmem:[#allocation13 + $0x6a8] ss:$136 sps:$4 sm:$0xff]   ;;  %v5782_v26 = vld [vmem:[#allocation13 + $0x594] ss:$136 sps:$4 sm:$0xff]  }
 0x35f   : > { %2976 = vmatprep.mubr.bf16.mxu1 %v6285_v8  ;;  %3049 = vmatprep.mubr.bf16.mxu0 %v6285_v8 }
 0x361   : > { %3077 = vmatpush1.bf16.msra.mxu1 %v5690_v27  ;;  %3150 = vmatpush1.bf16.msra.mxu0 %v5693_v29  ;;  %v5785_v27 = vld [vmem:[#allocation13 + $0x59c] ss:$136 sps:$4 sm:$0xff]   ;;  %v5780_v29 = vld [vmem:[#allocation13 + $0x590] ss:$136 sps:$4 sm:$0xff]  }
 0x362   : > { %3078 = vmatprep.subr.bf16.mxu1 %v5698_v30  ;;  %3151 = vmatprep.subr.bf16.mxu0 %v5701_v31  ;;  %v5783_v30 = vld [vmem:[#allocation13 + $0x598] ss:$136 sps:$4 sm:$0xff]   ;;  %v5788_v31 = vld [vmem:[#allocation13 + $0x484] ss:$136 sps:$4 sm:$0xff]  }
 0x364   : > { %2977 = vmatmul.mubr.bf16.gmra.mxu1 %v6573_v59  ;;  %3050 = vmatmul.mubr.bf16.gmra.mxu0 %v6573_v59 }
 0x365   : > { %3079 = vmatpush1.bf16.msra.mxu1 %v5696_v32  ;;  %3152 = vmatpush1.bf16.msra.mxu0 %v5699_v33  ;;  %v5791_v32 = vld [vmem:[#allocation13 + $0x48c] ss:$136 sps:$4 sm:$0xff]   ;;  %v5786_v33 = vld [vmem:[#allocation13 + $0x480] ss:$136 sps:$4 sm:$0xff]  }
 0x366   : > { %3080 = vmatprep.subr.bf16.mxu1 %v5704_v34  ;;  %3153 = vmatprep.subr.bf16.mxu0 %v5707_v35  ;;  %v5789_v34 = vld [vmem:[#allocation13 + $0x488] ss:$136 sps:$4 sm:$0xff]   ;;  %v5794_v35 = vld [vmem:[#allocation13 + $0x374] ss:$136 sps:$4 sm:$0xff]  }
 0x367   : > { %2986 = vmatprep.mubr.bf16.mxu1 %v6285_v8  ;;  %3059 = vmatprep.mubr.bf16.mxu0 %v6285_v8 }
 0x369   : > { %3081 = vmatpush1.bf16.msra.mxu1 %v5702_v36  ;;  %3154 = vmatpush1.bf16.msra.mxu0 %v5705_v37  ;;  %v5797_v36 = vld [vmem:[#allocation13 + $0x37c] ss:$136 sps:$4 sm:$0xff]   ;;  %v5792_v37 = vld [vmem:[#allocation13 + $0x370] ss:$136 sps:$4 sm:$0xff]  }
 0x36a   : > { %3082 = vmatprep.subr.bf16.mxu1 %v5710_v38  ;;  %3155 = vmatprep.subr.bf16.mxu0 %v5713_v39  ;;  %v5795_v38 = vld [vmem:[#allocation13 + $0x378] ss:$136 sps:$4 sm:$0xff]   ;;  %v5800_v39 = vld [vmem:[#allocation13 + $0x264] ss:$136 sps:$4 sm:$0xff]  }
 0x36c   : > { %2987 = vmatmul.mubr.bf16.gmra.mxu1 %v6579_v7  ;;  %3060 = vmatmul.mubr.bf16.gmra.mxu0 %v6579_v7 }
 0x36d   : > { %3083 = vmatpush1.bf16.msra.mxu1 %v5708_v40  ;;  %3156 = vmatpush1.bf16.msra.mxu0 %v5711_v41  ;;  %v5803_v40 = vld [vmem:[#allocation13 + $0x26c] ss:$136 sps:$4 sm:$0xff]   ;;  %v5798_v41 = vld [vmem:[#allocation13 + $0x260] ss:$136 sps:$4 sm:$0xff]  }
 0x36e   : > { %3084 = vmatprep.subr.bf16.mxu1 %v5716_v42  ;;  %3157 = vmatprep.subr.bf16.mxu0 %v5719_v44  ;;  %v5801_v42 = vld [vmem:[#allocation13 + $0x268] ss:$136 sps:$4 sm:$0xff]   ;;  %v5806_v44 = vld [vmem:[#allocation13 + $0x154] ss:$136 sps:$4 sm:$0xff]  }
 0x36f   : > { %3102 = vmatprep.mubr.bf16.mxu1 %v6285_v8  ;;  %3175 = vmatprep.mubr.bf16.mxu0 %v6285_v8 }
 0x371   : > { %3085 = vmatpush1.bf16.msra.mxu1 %v5714_v45  ;;  %3158 = vmatpush1.bf16.msra.mxu0 %v5717_v46  ;;  %v5809_v45 = vld [vmem:[#allocation13 + $0x15c] ss:$136 sps:$4 sm:$0xff]   ;;  %v5804_v46 = vld [vmem:[#allocation13 + $0x150] ss:$136 sps:$4 sm:$0xff]  }
 0x372   : > { %3216 = vmatprep.subr.bf16.mxu1 %v5722_v47  ;;  %3289 = vmatprep.subr.bf16.mxu0 %v5725_v48  ;;  %v5807_v47 = vld [vmem:[#allocation13 + $0x158] ss:$136 sps:$4 sm:$0xff]   ;;  %v5812_v48 = vld [vmem:[#allocation13 + $0x44] ss:$136 sps:$4 sm:$0xff]  }
 0x374   : > { %3103 = vmatmul.mubr.bf16.vlgmr.msra.gmra.mxu1 %v6557_v28  ;;  %3176 = vmatmul.mubr.bf16.vlgmr.msra.gmra.mxu0 %v6557_v28 }
 0x375   : > { %3217 = vmatpush1.bf16.msra.mxu1 %v5720_v49  ;;  %3290 = vmatpush1.bf16.msra.mxu0 %v5723_v50  ;;  %v5815_v49 = vld [vmem:[#allocation13 + $0x4c] ss:$136 sps:$4 sm:$0xff]   ;;  %v5810_v50 = vld [vmem:[#allocation13 + $0x40] ss:$136 sps:$4 sm:$0xff]  }
 0x376   : > { %3218 = vmatprep.subr.bf16.mxu1 %v5728_v51  ;;  %3291 = vmatprep.subr.bf16.mxu0 %v5731_v52  ;;  %v5813_v51 = vld [vmem:[#allocation13 + $0x48] ss:$136 sps:$4 sm:$0xff]   ;;  %v5818_v52 = vld [vmem:[#allocation13 + $0x7c4] ss:$136 sps:$4 sm:$0xff]  }
 0x377   : > { %3112 = vmatprep.mubr.bf16.mxu1 %v6285_v8  ;;  %3185 = vmatprep.mubr.bf16.mxu0 %v6285_v8 }
 0x379   : > { %3219 = vmatpush1.bf16.msra.mxu1 %v5726_v53  ;;  %3292 = vmatpush1.bf16.msra.mxu0 %v5729_v54  ;;  %v5821_v53 = vld [vmem:[#allocation13 + $0x7cc] ss:$136 sps:$4 sm:$0xff]   ;;  %v5816_v54 = vld [vmem:[#allocation13 + $0x7c0] ss:$136 sps:$4 sm:$0xff]  }
 0x37a   : > { %3220 = vmatprep.subr.bf16.mxu1 %v5734_v55  ;;  %3293 = vmatprep.subr.bf16.mxu0 %v5737_v56  ;;  %v5819_v55 = vld [vmem:[#allocation13 + $0x7c8] ss:$136 sps:$4 sm:$0xff]   ;;  %v5824_v56 = vld [vmem:[#allocation13 + $0x6b4] ss:$136 sps:$4 sm:$0xff]  }
 0x37c   : > { %3113 = vmatmul.mubr.bf16.gmra.mxu1 %v6565_v43  ;;  %3186 = vmatmul.mubr.bf16.gmra.mxu0 %v6565_v43 }
 0x37d   : > { %3221 = vmatpush1.bf16.msra.mxu1 %v5732_v57  ;;  %3294 = vmatpush1.bf16.msra.mxu0 %v5735_v58  ;;  %v5827_v57 = vld [vmem:[#allocation13 + $0x6bc] ss:$136 sps:$4 sm:$0xff]   ;;  %v5822_v58 = vld [vmem:[#allocation13 + $0x6b0] ss:$136 sps:$4 sm:$0xff]  }
 0x37e   : > { %3222 = vmatprep.subr.bf16.mxu1 %v5740_v60  ;;  %3295 = vmatprep.subr.bf16.mxu0 %v5743_v61  ;;  %v5825_v60 = vld [vmem:[#allocation13 + $0x6b8] ss:$136 sps:$4 sm:$0xff]   ;;  %v5830_v61 = vld [vmem:[#allocation13 + $0x5a4] ss:$136 sps:$4 sm:$0xff]  }
 0x37f   : > { %3122 = vmatprep.mubr.bf16.mxu1 %v6285_v8  ;;  %3195 = vmatprep.mubr.bf16.mxu0 %v6285_v8 }
 0x381   : > { %3223 = vmatpush1.bf16.msra.mxu1 %v5738_v62  ;;  %3296 = vmatpush1.bf16.msra.mxu0 %v5741_v63  ;;  %v5833_v62 = vld [vmem:[#allocation13 + $0x5ac] ss:$136 sps:$4 sm:$0xff]   ;;  %v5828_v63 = vld [vmem:[#allocation13 + $0x5a0] ss:$136 sps:$4 sm:$0xff]  }
 0x382   : > { %3224 = vmatprep.subr.bf16.mxu1 %v5746_v0  ;;  %3297 = vmatprep.subr.bf16.mxu0 %v5749_v1  ;;  %v5831_v0 = vld [vmem:[#allocation13 + $0x5a8] ss:$136 sps:$4 sm:$0xff]   ;;  %v5836_v1 = vld [vmem:[#allocation13 + $0x494] ss:$136 sps:$4 sm:$0xff]  }
 0x384   : > { %3123 = vmatmul.mubr.bf16.gmra.mxu1 %v6573_v59  ;;  %3196 = vmatmul.mubr.bf16.gmra.mxu0 %v6573_v59 }
 0x385   : > { %3225 = vmatpush1.bf16.msra.mxu1 %v5744_v2  ;;  %3298 = vmatpush1.bf16.msra.mxu0 %v5747_v3  ;;  %v5839_v2 = vld [vmem:[#allocation13 + $0x49c] ss:$136 sps:$4 sm:$0xff]   ;;  %v5834_v3 = vld [vmem:[#allocation13 + $0x490] ss:$136 sps:$4 sm:$0xff]  }
 0x386   : > { %3226 = vmatprep.subr.bf16.mxu1 %v5752_v4  ;;  %3299 = vmatprep.subr.bf16.mxu0 %v5755_v5  ;;  %v5837_v4 = vld [vmem:[#allocation13 + $0x498] ss:$136 sps:$4 sm:$0xff]   ;;  %v5842_v5 = vld [vmem:[#allocation13 + $0x384] ss:$136 sps:$4 sm:$0xff]  }
 0x387   : > { %3132 = vmatprep.mubr.bf16.mxu1 %v6285_v8  ;;  %3205 = vmatprep.mubr.bf16.mxu0 %v6285_v8 }
 0x389   : > { %3227 = vmatpush1.bf16.msra.mxu1 %v5750_v6  ;;  %3300 = vmatpush1.bf16.msra.mxu0 %v5753_v9  ;;  %v5845_v6 = vld [vmem:[#allocation13 + $0x38c] ss:$136 sps:$4 sm:$0xff]   ;;  %v5840_v9 = vld [vmem:[#allocation13 + $0x380] ss:$136 sps:$4 sm:$0xff]  }
 0x38a   : > { %3228 = vmatprep.subr.bf16.mxu1 %v5758_v10  ;;  %3301 = vmatprep.subr.bf16.mxu0 %v5761_v11  ;;  %v5843_v10 = vld [vmem:[#allocation13 + $0x388] ss:$136 sps:$4 sm:$0xff]   ;;  %v5848_v11 = vld [vmem:[#allocation13 + $0x274] ss:$136 sps:$4 sm:$0xff]  }
 0x38c   : > { %3133 = vmatmul.mubr.bf16.gmra.mxu1 %v6579_v7  ;;  %3206 = vmatmul.mubr.bf16.gmra.mxu0 %v6579_v7 }
 0x38d   : > { %3229 = vmatpush1.bf16.msra.mxu1 %v5756_v12  ;;  %3302 = vmatpush1.bf16.msra.mxu0 %v5759_v13  ;;  %v5851_v12 = vld [vmem:[#allocation13 + $0x27c] ss:$136 sps:$4 sm:$0xff]   ;;  %v5846_v13 = vld [vmem:[#allocation13 + $0x270] ss:$136 sps:$4 sm:$0xff]  }
 0x38e   : > { %3230 = vmatprep.subr.bf16.mxu1 %v5764_v14  ;;  %3303 = vmatprep.subr.bf16.mxu0 %v5767_v15  ;;  %v5849_v14 = vld [vmem:[#allocation13 + $0x278] ss:$136 sps:$4 sm:$0xff]   ;;  %v5854_v15 = vld [vmem:[#allocation13 + $0x164] ss:$136 sps:$4 sm:$0xff]  }
 0x38f   : > { %3248 = vmatprep.mubr.bf16.mxu1 %v6285_v8  ;;  %3321 = vmatprep.mubr.bf16.mxu0 %v6285_v8 }
 0x391   : > { %3231 = vmatpush1.bf16.msra.mxu1 %v5762_v16  ;;  %3304 = vmatpush1.bf16.msra.mxu0 %v5765_v17  ;;  %v5857_v16 = vld [vmem:[#allocation13 + $0x16c] ss:$136 sps:$4 sm:$0xff]   ;;  %v5852_v17 = vld [vmem:[#allocation13 + $0x160] ss:$136 sps:$4 sm:$0xff]  }
 0x392   : > { %3362 = vmatprep.subr.bf16.mxu1 %v5770_v18  ;;  %3435 = vmatprep.subr.bf16.mxu0 %v5773_v19  ;;  %v5855_v18 = vld [vmem:[#allocation13 + $0x168] ss:$136 sps:$4 sm:$0xff]   ;;  %v5860_v19 = vld [vmem:[#allocation13 + $0x54] ss:$136 sps:$4 sm:$0xff]  }
 0x394   : > { %3249 = vmatmul.mubr.bf16.vlgmr.msra.gmra.mxu1 %v6557_v28  ;;  %3322 = vmatmul.mubr.bf16.vlgmr.msra.gmra.mxu0 %v6557_v28 }
 0x395   : > { %3363 = vmatpush1.bf16.msra.mxu1 %v5768_v20  ;;  %3436 = vmatpush1.bf16.msra.mxu0 %v5771_v21  ;;  %v5863_v20 = vld [vmem:[#allocation13 + $0x5c] ss:$136 sps:$4 sm:$0xff]   ;;  %v5858_v21 = vld [vmem:[#allocation13 + $0x50] ss:$136 sps:$4 sm:$0xff]  }
 0x396   : > { %3364 = vmatprep.subr.bf16.mxu1 %v5776_v22  ;;  %3437 = vmatprep.subr.bf16.mxu0 %v5779_v23  ;;  %v5861_v22 = vld [vmem:[#allocation13 + $0x58] ss:$136 sps:$4 sm:$0xff]   ;;  %v5866_v23 = vld [vmem:[#allocation13 + $0x7d4] ss:$136 sps:$4 sm:$0xff]  }
 0x397   : > { %3258 = vmatprep.mubr.bf16.mxu1 %v6285_v8  ;;  %3331 = vmatprep.mubr.bf16.mxu0 %v6285_v8 }
 0x399   : > { %3365 = vmatpush1.bf16.msra.mxu1 %v5774_v24  ;;  %3438 = vmatpush1.bf16.msra.mxu0 %v5777_v25  ;;  %v5869_v24 = vld [vmem:[#allocation13 + $0x7dc] ss:$136 sps:$4 sm:$0xff]   ;;  %v5864_v25 = vld [vmem:[#allocation13 + $0x7d0] ss:$136 sps:$4 sm:$0xff]  }
 0x39a   : > { %3366 = vmatprep.subr.bf16.mxu1 %v5782_v26  ;;  %3439 = vmatprep.subr.bf16.mxu0 %v5785_v27  ;;  %v5867_v26 = vld [vmem:[#allocation13 + $0x7d8] ss:$136 sps:$4 sm:$0xff]   ;;  %v5872_v27 = vld [vmem:[#allocation13 + $0x6c4] ss:$136 sps:$4 sm:$0xff]  }
 0x39c   : > { %3259 = vmatmul.mubr.bf16.gmra.mxu1 %v6565_v43  ;;  %3332 = vmatmul.mubr.bf16.gmra.mxu0 %v6565_v43 }
 0x39d   : > { %3367 = vmatpush1.bf16.msra.mxu1 %v5780_v29  ;;  %3440 = vmatpush1.bf16.msra.mxu0 %v5783_v30  ;;  %v5875_v29 = vld [vmem:[#allocation13 + $0x6cc] ss:$136 sps:$4 sm:$0xff]   ;;  %v5870_v30 = vld [vmem:[#allocation13 + $0x6c0] ss:$136 sps:$4 sm:$0xff]  }
 0x39e   : > { %3368 = vmatprep.subr.bf16.mxu1 %v5788_v31  ;;  %3441 = vmatprep.subr.bf16.mxu0 %v5791_v32  ;;  %v5873_v31 = vld [vmem:[#allocation13 + $0x6c8] ss:$136 sps:$4 sm:$0xff]   ;;  %v5878_v32 = vld [vmem:[#allocation13 + $0x5b4] ss:$136 sps:$4 sm:$0xff]  }
 0x39f   : > { %3268 = vmatprep.mubr.bf16.mxu1 %v6285_v8  ;;  %3341 = vmatprep.mubr.bf16.mxu0 %v6285_v8 }
 0x3a1   : > { %3369 = vmatpush1.bf16.msra.mxu1 %v5786_v33  ;;  %3442 = vmatpush1.bf16.msra.mxu0 %v5789_v34  ;;  %v5881_v33 = vld [vmem:[#allocation13 + $0x5bc] ss:$136 sps:$4 sm:$0xff]   ;;  %v5876_v34 = vld [vmem:[#allocation13 + $0x5b0] ss:$136 sps:$4 sm:$0xff]  }
 0x3a2   : > { %3370 = vmatprep.subr.bf16.mxu1 %v5794_v35  ;;  %3443 = vmatprep.subr.bf16.mxu0 %v5797_v36  ;;  %v5879_v35 = vld [vmem:[#allocation13 + $0x5b8] ss:$136 sps:$4 sm:$0xff]   ;;  %v5884_v36 = vld [vmem:[#allocation13 + $0x4a4] ss:$136 sps:$4 sm:$0xff]  }
 0x3a4   : > { %3269 = vmatmul.mubr.bf16.gmra.mxu1 %v6573_v59  ;;  %3342 = vmatmul.mubr.bf16.gmra.mxu0 %v6573_v59 }
 0x3a5   : > { %3371 = vmatpush1.bf16.msra.mxu1 %v5792_v37  ;;  %3444 = vmatpush1.bf16.msra.mxu0 %v5795_v38  ;;  %v5887_v37 = vld [vmem:[#allocation13 + $0x4ac] ss:$136 sps:$4 sm:$0xff]   ;;  %v5882_v38 = vld [vmem:[#allocation13 + $0x4a0] ss:$136 sps:$4 sm:$0xff]  }
 0x3a6   : > { %3372 = vmatprep.subr.bf16.mxu1 %v5800_v39  ;;  %3445 = vmatprep.subr.bf16.mxu0 %v5803_v40  ;;  %v5885_v39 = vld [vmem:[#allocation13 + $0x4a8] ss:$136 sps:$4 sm:$0xff]   ;;  %v5890_v40 = vld [vmem:[#allocation13 + $0x394] ss:$136 sps:$4 sm:$0xff]  }
 0x3a7   : > { %3278 = vmatprep.mubr.bf16.mxu1 %v6285_v8  ;;  %3351 = vmatprep.mubr.bf16.mxu0 %v6285_v8 }
 0x3a9   : > { %3373 = vmatpush1.bf16.msra.mxu1 %v5798_v41  ;;  %3446 = vmatpush1.bf16.msra.mxu0 %v5801_v42  ;;  %v5893_v41 = vld [vmem:[#allocation13 + $0x39c] ss:$136 sps:$4 sm:$0xff]   ;;  %v5888_v42 = vld [vmem:[#allocation13 + $0x390] ss:$136 sps:$4 sm:$0xff]  }
 0x3aa   : > { %3374 = vmatprep.subr.bf16.mxu1 %v5806_v44  ;;  %3447 = vmatprep.subr.bf16.mxu0 %v5809_v45  ;;  %v5891_v44 = vld [vmem:[#allocation13 + $0x398] ss:$136 sps:$4 sm:$0xff]   ;;  %v5896_v45 = vld [vmem:[#allocation13 + $0x284] ss:$136 sps:$4 sm:$0xff]  }
 0x3ac   : > { %3279 = vmatmul.mubr.bf16.gmra.mxu1 %v6579_v7  ;;  %3352 = vmatmul.mubr.bf16.gmra.mxu0 %v6579_v7 }
 0x3ad   : > { %3375 = vmatpush1.bf16.msra.mxu1 %v5804_v46  ;;  %3448 = vmatpush1.bf16.msra.mxu0 %v5807_v47  ;;  %v5899_v46 = vld [vmem:[#allocation13 + $0x28c] ss:$136 sps:$4 sm:$0xff]   ;;  %v5894_v47 = vld [vmem:[#allocation13 + $0x280] ss:$136 sps:$4 sm:$0xff]  }
 0x3ae   : > { %3376 = vmatprep.subr.bf16.mxu1 %v5812_v48  ;;  %3449 = vmatprep.subr.bf16.mxu0 %v5815_v49  ;;  %v5897_v48 = vld [vmem:[#allocation13 + $0x288] ss:$136 sps:$4 sm:$0xff]   ;;  %v1248_v49 = vlaneseq }
 0x3af   : > { %3394 = vmatprep.mubr.bf16.mxu1 %v6285_v8  ;;  %3467 = vmatprep.mubr.bf16.mxu0 %v6285_v8 }
 0x3b1   : > { %3377 = vmatpush1.bf16.msra.mxu1 %v5810_v50  ;;  %3450 = vmatpush1.bf16.msra.mxu0 %v5813_v51  ;;  %v5902_v50 = vld [vmem:[#allocation13 + $0x174] ss:$136 sps:$4 sm:$0xff]  }
 0x3b2   : > { %3508 = vmatprep.subr.bf16.mxu1 %v5818_v52  ;;  %3581 = vmatprep.subr.bf16.mxu0 %v5821_v53  ;;  %v5905_v51 = vld [vmem:[#allocation13 + $0x17c] ss:$136 sps:$4 sm:$0xff]   ;;  %v5900_v52 = vld [vmem:[#allocation13 + $0x170] ss:$136 sps:$4 sm:$0xff]  }
 0x3b3   : > { %v5903_v53 = vld [vmem:[#allocation13 + $0x178] ss:$136 sps:$4 sm:$0xff]  }
 0x3b4   : > { %3395 = vmatmul.mubr.bf16.vlgmr.msra.gmra.mxu1 %v6557_v28  ;;  %3468 = vmatmul.mubr.bf16.vlgmr.msra.gmra.mxu0 %v6557_v28 }
 0x3b5   : > { %3509 = vmatpush1.bf16.msra.mxu1 %v5816_v54  ;;  %3582 = vmatpush1.bf16.msra.mxu0 %v5819_v55  ;;  %v6663_v54 = vshrl.u32 %v1248_v49, 7  ;;  %v5908_v55 = vld [vmem:[#allocation13 + $0x64] ss:$136 sps:$4 sm:$0xff]  }
 0x3b6   : > { %3510 = vmatprep.subr.bf16.mxu1 %v5824_v56  ;;  %3583 = vmatprep.subr.bf16.mxu0 %v5827_v57  ;;  %v5911_v56 = vld [vmem:[#allocation13 + $0x6c] ss:$136 sps:$4 sm:$0xff]   ;;  %v5906_v57 = vld [vmem:[#allocation13 + $0x60] ss:$136 sps:$4 sm:$0xff]  }
 0x3b7   : > { %3404 = vmatprep.mubr.bf16.mxu1 %v6285_v8  ;;  %3477 = vmatprep.mubr.bf16.mxu0 %v6285_v8 }
 0x3b9   : > { %3511 = vmatpush1.bf16.msra.mxu1 %v5822_v58  ;;  %3584 = vmatpush1.bf16.msra.mxu0 %v5825_v60  ;;  %v5909_v58 = vld [vmem:[#allocation13 + $0x68] ss:$136 sps:$4 sm:$0xff]   ;;  %v6668_v60 = vsub.s32 0, %v6663_v54 }
 0x3ba   : > { %3512 = vmatprep.subr.bf16.mxu1 %v5830_v61  ;;  %3585 = vmatprep.subr.bf16.mxu0 %v5833_v62  ;;  %v6671_v61 = vsub.s32 2, %v6663_v54  ;;  %v5914_v62 = vld [vmem:[#allocation13 + $0x7e4] ss:$136 sps:$4 sm:$0xff]  }
 0x3bc   : > { %3405 = vmatmul.mubr.bf16.gmra.mxu1 %v6565_v43  ;;  %3478 = vmatmul.mubr.bf16.gmra.mxu0 %v6565_v43 }
 0x3bd   : > { %3513 = vmatpush1.bf16.msra.mxu1 %v5828_v63  ;;  %3586 = vmatpush1.bf16.msra.mxu0 %v5831_v0  ;;  %v6673_v63 = vld [vmem:[#allocation15] sm:$0xff]  ;;  %v5917_v0 = vld [vmem:[#allocation13 + $0x7ec] ss:$136 sps:$4 sm:$0xff]  }
 0x3be   : > { %3514 = vmatprep.subr.bf16.mxu1 %v5836_v1  ;;  %3587 = vmatprep.subr.bf16.mxu0 %v5839_v2  ;;  %v6678_v1 = vsub.s32 1, %v6663_v54  ;;  %v6681_v2 = vsub.s32 3, %v6663_v54 }
 0x3bf   : > { %3414 = vmatprep.mubr.bf16.mxu1 %v6285_v8  ;;  %3487 = vmatprep.mubr.bf16.mxu0 %v6285_v8 }
 0x3c1   : > { %3515 = vmatpush1.bf16.msra.mxu1 %v5834_v3  ;;  %3588 = vmatpush1.bf16.msra.mxu0 %v5837_v4  ;;  %v5912_v3 = vld [vmem:[#allocation13 + $0x7e0] ss:$136 sps:$4 sm:$0xff]   ;;  %v6688_v4 = vrot.slane %v6673_v63, %v6668_v60 }
 0x3c2   : > { %3516 = vmatprep.subr.bf16.mxu1 %v5842_v5  ;;  %3589 = vmatprep.subr.bf16.mxu0 %v5845_v6  ;;  %v6692_v5 = vrot.slane %v6673_v63, %v6671_v61  ;;  %v5915_v6 = vld [vmem:[#allocation13 + $0x7e8] ss:$136 sps:$4 sm:$0xff]  }
 0x3c4   : > { %3415 = vmatmul.mubr.bf16.gmra.mxu1 %v6573_v59  ;;  %3488 = vmatmul.mubr.bf16.gmra.mxu0 %v6573_v59 }
 0x3c5   : > { %3517 = vmatpush1.bf16.msra.mxu1 %v5840_v9  ;;  %3590 = vmatpush1.bf16.msra.mxu0 %v5843_v10  ;;  %v5920_v9 = vld [vmem:[#allocation13 + $0x6d4] ss:$136 sps:$4 sm:$0xff]  }
 0x3c6   : > { %3518 = vmatprep.subr.bf16.mxu1 %v5848_v11  ;;  %3591 = vmatprep.subr.bf16.mxu0 %v5851_v12  ;;  %v5923_v10 = vld [vmem:[#allocation13 + $0x6dc] ss:$136 sps:$4 sm:$0xff]   ;;  %v6696_v11 = vrot.slane %v6673_v63, %v6678_v1  ;;  %v6700_v12 = vrot.slane %v6673_v63, %v6681_v2 }
 0x3c7   : > { %3424 = vmatprep.mubr.bf16.mxu1 %v6285_v8  ;;  %3497 = vmatprep.mubr.bf16.mxu0 %v6285_v8 }
 0x3c9   : > { %3519 = vmatpush1.bf16.msra.mxu1 %v5846_v13  ;;  %3592 = vmatpush1.bf16.msra.mxu0 %v5849_v14 }
 0x3ca   : > { %3520 = vmatprep.subr.bf16.mxu1 %v5854_v15  ;;  %3593 = vmatprep.subr.bf16.mxu0 %v5857_v16 }
 0x3cc   : > { %3425 = vmatmul.mubr.bf16.gmra.mxu1 %v6579_v7  ;;  %3498 = vmatmul.mubr.bf16.gmra.mxu0 %v6579_v7 }
 0x3cd   : > { %3521 = vmatpush1.bf16.msra.mxu1 %v5852_v17  ;;  %3594 = vmatpush1.bf16.msra.mxu0 %v5855_v18  ;;  %v5918_v17 = vld [vmem:[#allocation13 + $0x6d0] ss:$136 sps:$4 sm:$0xff]  }
 0x3ce   : > { %3522 = vmatprep.subr.bf16.mxu1 %v5860_v19  ;;  %3595 = vmatprep.subr.bf16.mxu0 %v5863_v20  ;;  %v5921_v18 = vld [vmem:[#allocation13 + $0x6d8] ss:$136 sps:$4 sm:$0xff]  }
 0x3cf   : > { %3540 = vmatprep.mubr.bf16.mxu1 %v6285_v8  ;;  %3613 = vmatprep.mubr.bf16.mxu0 %v6285_v8 }
 0x3d1   : > { %3523 = vmatpush1.bf16.msra.mxu1 %v5858_v21  ;;  %3596 = vmatpush1.bf16.msra.mxu0 %v5861_v22  ;;  %v5926_v21 = vld [vmem:[#allocation13 + $0x5c4] ss:$136 sps:$4 sm:$0xff]  }
 0x3d2   : > { %3654 = vmatprep.subr.bf16.mxu1 %v5866_v23  ;;  %3727 = vmatprep.subr.bf16.mxu0 %v5869_v24  ;;  %v5929_v22 = vld [vmem:[#allocation13 + $0x5cc] ss:$136 sps:$4 sm:$0xff]  }
 0x3d4   : > { %3541 = vmatmul.mubr.bf16.vlgmr.msra.gmra.mxu1 %v6557_v28  ;;  %3614 = vmatmul.mubr.bf16.vlgmr.msra.gmra.mxu0 %v6557_v28 }
 0x3d5   : > { %3655 = vmatpush1.bf16.msra.mxu1 %v5864_v25  ;;  %3728 = vmatpush1.bf16.msra.mxu0 %v5867_v26 }
 0x3d6   : > { %3656 = vmatprep.subr.bf16.mxu1 %v5872_v27  ;;  %3729 = vmatprep.subr.bf16.mxu0 %v5875_v29 }
 0x3d7   : > { %3550 = vmatprep.mubr.bf16.mxu1 %v6285_v8  ;;  %3623 = vmatprep.mubr.bf16.mxu0 %v6285_v8 }
 0x3d9   : > { %3657 = vmatpush1.bf16.msra.mxu1 %v5870_v30  ;;  %3730 = vmatpush1.bf16.msra.mxu0 %v5873_v31  ;;  %v5924_v30 = vld [vmem:[#allocation13 + $0x5c0] ss:$136 sps:$4 sm:$0xff]  }
 0x3da   : > { %3658 = vmatprep.subr.bf16.mxu1 %v5878_v32  ;;  %3731 = vmatprep.subr.bf16.mxu0 %v5881_v33 }
 0x3dc   : > { %3551 = vmatmul.mubr.bf16.gmra.mxu1 %v6565_v43  ;;  %3624 = vmatmul.mubr.bf16.gmra.mxu0 %v6565_v43 }
 0x3dd   : > { %3659 = vmatpush1.bf16.msra.mxu1 %v5876_v34  ;;  %3732 = vmatpush1.bf16.msra.mxu0 %v5879_v35  ;;  %v5927_v35 = vld [vmem:[#allocation13 + $0x5c8] ss:$136 sps:$4 sm:$0xff]  }
 0x3de   : > { %3660 = vmatprep.subr.bf16.mxu1 %v5884_v36  ;;  %3733 = vmatprep.subr.bf16.mxu0 %v5887_v37 }
 0x3df   : > { %3560 = vmatprep.mubr.bf16.mxu1 %v6285_v8  ;;  %3633 = vmatprep.mubr.bf16.mxu0 %v6285_v8 }
 0x3e1   : > { %3661 = vmatpush1.bf16.msra.mxu1 %v5882_v38  ;;  %3734 = vmatpush1.bf16.msra.mxu0 %v5885_v39 }
 0x3e2   : > { %3662 = vmatprep.subr.bf16.mxu1 %v5890_v40  ;;  %3735 = vmatprep.subr.bf16.mxu0 %v5893_v41  ;;  %v5932_v40 = vld [vmem:[#allocation13 + $0x4b4] ss:$136 sps:$4 sm:$0xff]  }
 0x3e3   : > { %v5935_v41 = vld [vmem:[#allocation13 + $0x4bc] ss:$136 sps:$4 sm:$0xff]  }
 0x3e4   : > { %3561 = vmatmul.mubr.bf16.gmra.mxu1 %v6573_v59  ;;  %3634 = vmatmul.mubr.bf16.gmra.mxu0 %v6573_v59 }
 0x3e5   : > { %3663 = vmatpush1.bf16.msra.mxu1 %v5888_v42  ;;  %3736 = vmatpush1.bf16.msra.mxu0 %v5891_v44 }
 0x3e6   : > { %3664 = vmatprep.subr.bf16.mxu1 %v5896_v45  ;;  %3737 = vmatprep.subr.bf16.mxu0 %v5899_v46 }
 0x3e7   : > { %3570 = vmatprep.mubr.bf16.mxu1 %v6285_v8  ;;  %3643 = vmatprep.mubr.bf16.mxu0 %v6285_v8 }
 0x3e9   : > { %3665 = vmatpush1.bf16.msra.mxu1 %v5894_v47  ;;  %3738 = vmatpush1.bf16.msra.mxu0 %v5897_v48 }
 0x3ea   : > { %3666 = vmatprep.subr.bf16.mxu1 %v5902_v50  ;;  %3739 = vmatprep.subr.bf16.mxu0 %v5905_v51 }
 0x3ec   : > { %3571 = vmatmul.mubr.bf16.gmra.mxu1 %v6579_v7  ;;  %3644 = vmatmul.mubr.bf16.gmra.mxu0 %v6579_v7 }
 0x3ed   : > { %3667 = vmatpush1.bf16.msra.mxu1 %v5900_v52  ;;  %3740 = vmatpush1.bf16.msra.mxu0 %v5903_v53 }
 0x3ee   : > { %3668 = vmatprep.subr.bf16.mxu1 %v5908_v55  ;;  %3741 = vmatprep.subr.bf16.mxu0 %v5911_v56  ;;  %v5930_v56 = vld [vmem:[#allocation13 + $0x4b0] ss:$136 sps:$4 sm:$0xff]  }
 0x3ef   : > { %3686 = vmatprep.mubr.bf16.mxu1 %v6285_v8  ;;  %3759 = vmatprep.mubr.bf16.mxu0 %v6285_v8 }
 0x3f1   : > { %3669 = vmatpush1.bf16.msra.mxu1 %v5906_v57  ;;  %3742 = vmatpush1.bf16.msra.mxu0 %v5909_v58 }
 0x3f2   : > { %3800 = vmatprep.subr.bf16.mxu1 %v5914_v62  ;;  %3873 = vmatprep.subr.bf16.mxu0 %v5917_v0 }
 0x3f4   : > { %v2812_v13 = vpop.f32.mrf.mxu1  ;;  %v2885_v14 = vpop.f32.mrf.mxu0  ;;  %3687 = vmatmul.mubr.bf16.vlgmr.msra.gmra.mxu1 %v6557_v28  ;;  %3760 = vmatmul.mubr.bf16.vlgmr.msra.gmra.mxu0 %v6557_v28 }
 0x3f5   : > { %v2813_v15 = vadd.f32 %v2812_v13, %v6688_v4  ;;  %v2886_v16 = vadd.f32 %v2885_v14, %v6692_v5  ;;  %3801 = vmatpush1.bf16.msra.mxu1 %v5912_v3  ;;  %3874 = vmatpush1.bf16.msra.mxu0 %v5915_v6  ;;  %v5933_v3 = vld [vmem:[#allocation13 + $0x4b8] ss:$136 sps:$4 sm:$0xff]   ;;  %v5938_v6 = vld [vmem:[#allocation13 + $0x3a4] ss:$136 sps:$4 sm:$0xff]  }
 0x3f6   : > { %v2814_v19 = vpop.f32.mrf.mxu1  ;;  %v2887_v20 = vpop.f32.mrf.mxu0  ;;  %3802 = vmatprep.subr.bf16.mxu1 %v5920_v9  ;;  %3875 = vmatprep.subr.bf16.mxu0 %v5923_v10 }
 0x3f7   : > { %v4019_v23 = vmul.f32 0.01, %v2813_v15  ;;  %v4021_v24 = vmul.f32 0.01, %v2886_v16  ;;  %v2815_v25 = vadd.f32 %v2814_v19, %v6696_v11  ;;  %v2888_v26 = vadd.f32 %v2887_v20, %v6700_v12  ;;  %3696 = vmatprep.mubr.bf16.mxu1 %v6285_v8  ;;  %3769 = vmatprep.mubr.bf16.mxu0 %v6285_v8 }
 0x3f8   : > { %v2816_v27 = vpop.f32.mrf.mxu1  ;;  %v2889_v29 = vpop.f32.mrf.mxu0 }
 0x3f9   : > { %v4291_v31 = vmax.f32 %v2813_v15, %v4019_v23  ;;  %v4293_v32 = vmax.f32 %v2886_v16, %v4021_v24  ;;  %v4020_v33 = vmul.f32 0.01, %v2815_v25  ;;  %v4022_v34 = vmul.f32 0.01, %v2888_v26  ;;  %3803 = vmatpush1.bf16.msra.mxu1 %v5918_v17  ;;  %3876 = vmatpush1.bf16.msra.mxu0 %v5921_v18  ;;  %v5941_v15 = vld [vmem:[#allocation13 + $0x3ac] ss:$136 sps:$4 sm:$0xff]  }
 0x3fa   : > { %v2817_v36 = vadd.f32 %v2816_v27, %v6688_v4  ;;  %v2890_v37 = vadd.f32 %v2889_v29, %v6692_v5  ;;  %v2818_v38 = vpop.f32.mrf.mxu1  ;;  %v2891_v39 = vpop.f32.mrf.mxu0  ;;  %3804 = vmatprep.subr.bf16.mxu1 %v5926_v21  ;;  %3877 = vmatprep.subr.bf16.mxu0 %v5929_v22  ;;  %v5936_v24 = vld [vmem:[#allocation13 + $0x3a0] ss:$136 sps:$4 sm:$0xff]  }
 0x3fb   : > { %4563 = vst [vmem:[%s6714_s15] sm:$0xff] %v4291_v31  ;;  %4565 = vst [vmem:[%s6714_s15 + $0x10] sm:$0xff] %v4293_v32  ;;  %v4292_v42 = vmax.f32 %v2815_v25, %v4020_v33  ;;  %v4294_v44 = vmax.f32 %v2888_v26, %v4022_v34  ;;  %v2819_v45 = vadd.f32 %v2818_v38, %v6696_v11  ;;  %v5939_v25 = vld [vmem:[#allocation13 + $0x3a8] ss:$136 sps:$4 sm:$0xff]   ;;  %v5944_v31 = vld [vmem:[#allocation13 + $0x294] ss:$136 sps:$4 sm:$0xff]  }
 0x3fc   : > { %v2892_v46 = vadd.f32 %v2891_v39, %v6700_v12  ;;  %v4053_v47 = vmul.f32 0.01, %v2817_v36  ;;  %v4055_v48 = vmul.f32 0.01, %v2890_v37  ;;  %v2822_v49 = vpop.f32.mrf.mxu1  ;;  %v2895_v50 = vpop.f32.mrf.mxu0  ;;  %3697 = vmatmul.mubr.bf16.gmra.mxu1 %v6565_v43  ;;  %3770 = vmatmul.mubr.bf16.gmra.mxu0 %v6565_v43 }
 0x3fd   : > { %4564 = vst [vmem:[%s6714_s15 + $0x8] sm:$0xff] %v4292_v42  ;;  %4566 = vst [vmem:[%s6714_s15 + $0x18] sm:$0xff] %v4294_v44  ;;  %v4054_v51 = vmul.f32 0.01, %v2819_v45  ;;  %v2823_v53 = vadd.f32 %v2822_v49, %v6688_v4  ;;  %v2896_v55 = vadd.f32 %v2895_v50, %v6692_v5  ;;  %3805 = vmatpush1.bf16.msra.mxu1 %v5924_v30  ;;  %3878 = vmatpush1.bf16.msra.mxu0 %v5927_v35 }
 0x3fe   : > { %v4056_v52 = vmul.f32 0.01, %v2892_v46  ;;  %v4325_v57 = vmax.f32 %v2817_v36, %v4053_v47  ;;  %v4327_v58 = vmax.f32 %v2890_v37, %v4055_v48  ;;  %v2824_v62 = vpop.f32.mrf.mxu1  ;;  %v2897_v0 = vpop.f32.mrf.mxu0  ;;  %3806 = vmatprep.subr.bf16.mxu1 %v5932_v40  ;;  %3879 = vmatprep.subr.bf16.mxu0 %v5935_v41  ;;  %v5947_v36 = vld [vmem:[#allocation13 + $0x29c] ss:$136 sps:$4 sm:$0xff]  }
 0x3ff   : > { %v4326_v9 = vmax.f32 %v2819_v45, %v4054_v51  ;;  %v4087_v13 = vmul.f32 0.01, %v2823_v53  ;;  %v4089_v14 = vmul.f32 0.01, %v2896_v55  ;;  %3706 = vmatprep.mubr.bf16.mxu1 %v6285_v8  ;;  %3779 = vmatprep.mubr.bf16.mxu0 %v6285_v8  ;;  %v2825_v16 = vadd.f32 %v2824_v62, %v6696_v11  ;;  %v5945_v51 = vld [vmem:[#allocation13 + $0x298] ss:$136 sps:$4 sm:$0xff]  }
 0x400   : > { %v4328_v10 = vmax.f32 %v2892_v46, %v4056_v52  ;;  %4598 = vst [vmem:[%s6714_s15 + $0x110] sm:$0xff] %v4325_v57  ;;  %4600 = vst [vmem:[%s6714_s15 + $0x120] sm:$0xff] %v4327_v58  ;;  %v2898_v17 = vadd.f32 %v2897_v0, %v6700_v12  ;;  %v2826_v18 = vpop.f32.mrf.mxu1  ;;  %v2899_v19 = vpop.f32.mrf.mxu0  ;;  %v5942_v46 = vld [vmem:[#allocation13 + $0x290] ss:$136 sps:$4 sm:$0xff]   ;;  %v5950_v52 = vld [vmem:[#allocation13 + $0x184] ss:$136 sps:$4 sm:$0xff]  }
 0x401   : > { %4599 = vst [vmem:[%s6714_s15 + $0x118] sm:$0xff] %v4326_v9  ;;  %v4359_v20 = vmax.f32 %v2823_v53, %v4087_v13  ;;  %v4361_v21 = vmax.f32 %v2896_v55, %v4089_v14  ;;  %v2827_v22 = vadd.f32 %v2826_v18, %v6688_v4  ;;  %v2900_v23 = vadd.f32 %v2899_v19, %v6692_v5  ;;  %v5953_v58 = vld [vmem:[#allocation13 + $0x18c] ss:$136 sps:$4 sm:$0xff]  }
 0x402   : > { %4601 = vst [vmem:[%s6714_s15 + $0x128] sm:$0xff] %v4328_v10  ;;  %3807 = vmatpush1.bf16.msra.mxu1 %v5930_v56  ;;  %v4088_v26 = vmul.f32 0.01, %v2825_v16  ;;  %v4090_v27 = vmul.f32 0.01, %v2898_v17  ;;  %3880 = vmatpush1.bf16.msra.mxu0 %v5933_v3  ;;  %v2828_v29 = vpop.f32.mrf.mxu1  ;;  %v2901_v30 = vpop.f32.mrf.mxu0 }
 0x403   : > { %3808 = vmatprep.subr.bf16.mxu1 %v5938_v6  ;;  %4632 = vst [vmem:[%s6714_s15 + $0x220] sm:$0xff] %v4359_v20  ;;  %4634 = vst [vmem:[%s6714_s15 + $0x230] sm:$0xff] %v4361_v21  ;;  %v4121_v32 = vmul.f32 0.01, %v2827_v22  ;;  %v4123_v33 = vmul.f32 0.01, %v2900_v23  ;;  %v2829_v34 = vadd.f32 %v2828_v29, %v6696_v11  ;;  %v2902_v35 = vadd.f32 %v2901_v30, %v6700_v12 }
 0x404   : > { %3881 = vmatprep.subr.bf16.mxu0 %v5941_v15  ;;  %v4360_v37 = vmax.f32 %v2825_v16, %v4088_v26  ;;  %v4362_v38 = vmax.f32 %v2898_v17, %v4090_v27  ;;  %v2832_v39 = vpop.f32.mrf.mxu1  ;;  %v2905_v40 = vpop.f32.mrf.mxu0  ;;  %3707 = vmatmul.mubr.bf16.gmra.mxu1 %v6573_v59  ;;  %v5948_v15 = vld [vmem:[#allocation13 + $0x180] ss:$136 sps:$4 sm:$0xff]   ;;  %v5956_v21 = vld [vmem:[#allocation13 + $0x74] ss:$136 sps:$4 sm:$0xff]  }
 0x405   : > { %3780 = vmatmul.mubr.bf16.gmra.mxu0 %v6573_v59  ;;  %v4393_v41 = vmax.f32 %v2827_v22, %v4121_v32  ;;  %v4395_v42 = vmax.f32 %v2900_v23, %v4123_v33  ;;  %v4122_v44 = vmul.f32 0.01, %v2829_v34  ;;  %v4124_v45 = vmul.f32 0.01, %v2902_v35  ;;  %3716 = vmatprep.mubr.bf16.mxu1 %v6285_v8  ;;  %v5951_v20 = vld [vmem:[#allocation13 + $0x188] ss:$136 sps:$4 sm:$0xff]  }
 0x406   : > { %3809 = vmatpush1.bf16.msra.mxu1 %v5936_v24  ;;  %4633 = vst [vmem:[%s6714_s15 + $0x228] sm:$0xff] %v4360_v37  ;;  %4635 = vst [vmem:[%s6714_s15 + $0x238] sm:$0xff] %v4362_v38  ;;  %v2833_v47 = vadd.f32 %v2832_v39, %v6688_v4  ;;  %v2906_v48 = vadd.f32 %v2905_v40, %v6692_v5  ;;  %3882 = vmatpush1.bf16.msra.mxu0 %v5939_v25  ;;  %v2834_v49 = vpop.f32.mrf.mxu1  ;;  %v2907_v50 = vpop.f32.mrf.mxu0  ;;  %v6759_v22 = vsub.s32 4, %v6663_v54  ;;  %v5959_v29 = vld [vmem:[#allocation13 + $0x7c] ss:$136 sps:$4 sm:$0xff]  }
 0x407   : > { %3810 = vmatprep.subr.bf16.mxu1 %v5944_v31  ;;  %4666 = vst [vmem:[%s6714_s15 + $0x330] sm:$0xff] %v4393_v41  ;;  %4668 = vst [vmem:[%s6714_s15 + $0x340] sm:$0xff] %v4395_v42  ;;  %v4394_v53 = vmax.f32 %v2829_v34, %v4122_v44  ;;  %v4396_v55 = vmax.f32 %v2902_v35, %v4124_v45  ;;  %v2835_v56 = vadd.f32 %v2834_v49, %v6696_v11  ;;  %v5954_v38 = vld [vmem:[#allocation13 + $0x70] ss:$136 sps:$4 sm:$0xff]   ;;  %v5962_v45 = vld [vmem:[#allocation13 + $0x7f4] ss:$136 sps:$4 sm:$0xff]  }
 0x408   : > { %v2908_v57 = vadd.f32 %v2907_v50, %v6700_v12  ;;  %3883 = vmatprep.subr.bf16.mxu0 %v5947_v36  ;;  %v4155_v62 = vmul.f32 0.01, %v2833_v47  ;;  %v4157_v0 = vmul.f32 0.01, %v2906_v48  ;;  %v2836_v3 = vpop.f32.mrf.mxu1  ;;  %v2909_v6 = vpop.f32.mrf.mxu0  ;;  %3789 = vmatprep.mubr.bf16.mxu0 %v6285_v8  ;;  %v6762_v23 = vsub.s32 6, %v6663_v54 }
 0x409   : > { %4667 = vst [vmem:[%s6714_s15 + $0x338] sm:$0xff] %v4394_v53  ;;  %4669 = vst [vmem:[%s6714_s15 + $0x348] sm:$0xff] %v4396_v55  ;;  %v4156_v9 = vmul.f32 0.01, %v2835_v56  ;;  %v2837_v13 = vadd.f32 %v2836_v3, %v6688_v4  ;;  %v2910_v14 = vadd.f32 %v2909_v6, %v6692_v5  ;;  %v5957_v39 = vld [vmem:[#allocation13 + $0x78] ss:$136 sps:$4 sm:$0xff]  }
 0x40a   : > { %v4158_v10 = vmul.f32 0.01, %v2908_v57  ;;  %3811 = vmatpush1.bf16.msra.mxu1 %v5942_v46  ;;  %v4427_v16 = vmax.f32 %v2833_v47, %v4155_v62  ;;  %v4429_v17 = vmax.f32 %v2906_v48, %v4157_v0  ;;  %3884 = vmatpush1.bf16.msra.mxu0 %v5945_v51  ;;  %v2838_v18 = vpop.f32.mrf.mxu1  ;;  %v2911_v19 = vpop.f32.mrf.mxu0  ;;  %v6776_v46 = vrot.slane %v6673_v63, %v6759_v22 }
 0x40b   : > { %3812 = vmatprep.subr.bf16.mxu1 %v5950_v52  ;;  %v4428_v24 = vmax.f32 %v2835_v56, %v4156_v9  ;;  %v4189_v26 = vmul.f32 0.01, %v2837_v13  ;;  %v4191_v27 = vmul.f32 0.01, %v2910_v14  ;;  %3885 = vmatprep.subr.bf16.mxu0 %v5953_v58  ;;  %v2839_v30 = vadd.f32 %v2838_v18, %v6696_v11  ;;  %v5960_v9 = vld [vmem:[#allocation13 + $0x7f0] ss:$136 sps:$4 sm:$0xff]  }
 0x40c   : > { %v4430_v25 = vmax.f32 %v2908_v57, %v4158_v10  ;;  %4700 = vst [vmem:[%s6714_s15 + $0x440] sm:$0xff] %v4427_v16  ;;  %4702 = vst [vmem:[%s6714_s15 + $0x450] sm:$0xff] %v4429_v17  ;;  %v2912_v31 = vadd.f32 %v2911_v19, %v6700_v12  ;;  %v2842_v32 = vpop.f32.mrf.mxu1  ;;  %v2915_v33 = vpop.f32.mrf.mxu0  ;;  %3717 = vmatmul.mubr.bf16.gmra.mxu1 %v6579_v7  ;;  %v6780_v47 = vrot.slane %v6673_v63, %v6762_v23 }
 0x40d   : > { %3790 = vmatmul.mubr.bf16.gmra.mxu0 %v6579_v7  ;;  %4701 = vst [vmem:[%s6714_s15 + $0x448] sm:$0xff] %v4428_v24  ;;  %v4461_v34 = vmax.f32 %v2837_v13, %v4189_v26  ;;  %v4463_v35 = vmax.f32 %v2910_v14, %v4191_v27  ;;  %v2843_v36 = vadd.f32 %v2842_v32, %v6688_v4  ;;  %v4190_v40 = vmul.f32 0.01, %v2839_v30 }
 0x40e   : > { %4703 = vst [vmem:[%s6714_s15 + $0x458] sm:$0xff] %v4430_v25  ;;  %v2916_v37 = vadd.f32 %v2915_v33, %v6692_v5  ;;  %3813 = vmatpush1.bf16.msra.mxu1 %v5948_v15  ;;  %v4192_v41 = vmul.f32 0.01, %v2912_v31  ;;  %3886 = vmatpush1.bf16.msra.mxu0 %v5951_v20  ;;  %v2844_v42 = vpop.f32.mrf.mxu1  ;;  %v2917_v44 = vpop.f32.mrf.mxu0  ;;  %v6789_v57 = vsub.s32 5, %v6663_v54  ;;  %v6792_v58 = vsub.s32 7, %v6663_v54 }
 0x40f   : > { %3814 = vmatprep.subr.bf16.mxu1 %v5956_v21  ;;  %4734 = vst [vmem:[%s6714_s15 + $0x550] sm:$0xff] %v4461_v34  ;;  %4736 = vst [vmem:[%s6714_s15 + $0x560] sm:$0xff] %v4463_v35  ;;  %v4223_v48 = vmul.f32 0.01, %v2843_v36  ;;  %v2845_v50 = vadd.f32 %v2844_v42, %v6696_v11  ;;  %v2918_v51 = vadd.f32 %v2917_v44, %v6700_v12  ;;  %3887 = vmatprep.subr.bf16.mxu0 %v5959_v29  ;;  %v5965_v54 = vld [vmem:[#allocation13 + $0x6e4] ss:$136 sps:$4 sm:$0xff]  }
 0x410   : > { %v4225_v49 = vmul.f32 0.01, %v2916_v37  ;;  %3832 = vmatprep.mubr.bf16.mxu1 %v6285_v8  ;;  %v4462_v52 = vmax.f32 %v2839_v30, %v4190_v40  ;;  %v4464_v53 = vmax.f32 %v2912_v31, %v4192_v41  ;;  %v2846_v55 = vpop.f32.mrf.mxu1  ;;  %v2919_v56 = vpop.f32.mrf.mxu0  ;;  %3905 = vmatprep.mubr.bf16.mxu0 %v6285_v8  ;;  %v6809_v25 = vrot.slane %v6673_v63, %v6792_v58  ;;  %v5963_v29 = vld [vmem:[#allocation13 + $0x6e0] ss:$136 sps:$4 sm:$0xff]   ;;  %v5968_v33 = vld [vmem:[#allocation13 + $0x5d4] ss:$136 sps:$4 sm:$0xff]  }
 0x411   : > { %v4495_v62 = vmax.f32 %v2843_v36, %v4223_v48  ;;  %v4224_v3 = vmul.f32 0.01, %v2845_v50  ;;  %v4226_v6 = vmul.f32 0.01, %v2918_v51  ;;  %v2847_v10 = vadd.f32 %v2846_v55, %v6688_v4  ;;  %v5971_v55 = vld [vmem:[#allocation13 + $0x4c4] ss:$136 sps:$4 sm:$0xff]  }
 0x412   : > { %v4497_v0 = vmax.f32 %v2916_v37, %v4225_v49  ;;  %3815 = vmatpush1.bf16.msra.mxu1 %v5954_v38  ;;  %4735 = vst [vmem:[%s6714_s15 + $0x558] sm:$0xff] %v4462_v52  ;;  %4737 = vst [vmem:[%s6714_s15 + $0x568] sm:$0xff] %v4464_v53  ;;  %v2920_v13 = vadd.f32 %v2919_v56, %v6692_v5  ;;  %3888 = vmatpush1.bf16.msra.mxu0 %v5957_v39  ;;  %v2848_v14 = vpop.f32.mrf.mxu1  ;;  %v2921_v15 = vpop.f32.mrf.mxu0  ;;  %v5966_v49 = vld [vmem:[#allocation13 + $0x5d0] ss:$136 sps:$4 sm:$0xff]  }
 0x413   : > { %3946 = vmatprep.subr.bf16.mxu1 %v5962_v45  ;;  %4768 = vst [vmem:[%s6714_s15 + $0x660] sm:$0xff] %v4495_v62  ;;  %v4496_v16 = vmax.f32 %v2845_v50, %v4224_v3  ;;  %v4498_v17 = vmax.f32 %v2918_v51, %v4226_v6  ;;  %v2849_v18 = vadd.f32 %v2848_v14, %v6696_v11  ;;  %v4257_v20 = vmul.f32 0.01, %v2847_v10 }
 0x414   : > { %4770 = vst [vmem:[%s6714_s15 + $0x670] sm:$0xff] %v4497_v0  ;;  %v2922_v19 = vadd.f32 %v2921_v15, %v6700_v12  ;;  %v4259_v21 = vmul.f32 0.01, %v2920_v13  ;;  %v2958_v4 = vpop.f32.mrf.mxu1  ;;  %v3031_v24 = vpop.f32.mrf.mxu0  ;;  %v6805_v5 = vrot.slane %v6673_v63, %v6789_v57 }
 0x415   : > { %3833 = vmatmul.mubr.bf16.vlgmr.msra.gmra.mxu1 %v6557_v28  ;;  %4769 = vst [vmem:[%s6714_s15 + $0x668] sm:$0xff] %v4496_v16  ;;  %4771 = vst [vmem:[%s6714_s15 + $0x678] sm:$0xff] %v4498_v17  ;;  %v4258_v26 = vmul.f32 0.01, %v2849_v18  ;;  %v2959_v12 = vadd.f32 %v2958_v4, %v6776_v46  ;;  %v3032_v27 = vadd.f32 %v3031_v24, %v6780_v47  ;;  %3906 = vmatmul.mubr.bf16.vlgmr.msra.gmra.mxu0 %v6557_v28  ;;  %v5969_v17 = vld [vmem:[#allocation13 + $0x4c0] ss:$136 sps:$4 sm:$0xff]  }
 0x416   : > { %v4260_v11 = vmul.f32 0.01, %v2922_v19  ;;  %3947 = vmatpush1.bf16.msra.mxu1 %v5960_v9  ;;  %v4529_v30 = vmax.f32 %v2847_v10, %v4257_v20  ;;  %v4531_v31 = vmax.f32 %v2920_v13, %v4259_v21  ;;  %v2960_v32 = vpop.f32.mrf.mxu1  ;;  %v3033_v63 = vpop.f32.mrf.mxu0  ;;  %3842 = vmatprep.mubr.bf16.mxu1 %v6285_v8  ;;  %v5974_v4 = vld [vmem:[#allocation13 + $0x3b4] ss:$136 sps:$4 sm:$0xff]  }
 0x417   : > { %3948 = vmatprep.subr.bf16.mxu1 %v5965_v54  ;;  %v4530_v34 = vmax.f32 %v2849_v18, %v4258_v26  ;;  %v4023_v36 = vmul.f32 0.01, %v2959_v12  ;;  %v4025_v37 = vmul.f32 0.01, %v3032_v27  ;;  %3915 = vmatprep.mubr.bf16.mxu0 %v6285_v8  ;;  %v2961_v38 = vadd.f32 %v2960_v32, %v6805_v5 }
 0x418   : > { %v4532_v35 = vmax.f32 %v2922_v19, %v4260_v11  ;;  %4802 = vst [vmem:[%s6714_s15 + $0x770] sm:$0xff] %v4529_v30  ;;  %4804 = vst [vmem:[%s6714_s15 + $0x780] sm:$0xff] %v4531_v31  ;;  %v3034_v39 = vadd.f32 %v3033_v63, %v6809_v25  ;;  %v2962_v40 = vpop.f32.mrf.mxu1  ;;  %v3035_v41 = vpop.f32.mrf.mxu0 }
 0x419   : > { %4803 = vst [vmem:[%s6714_s15 + $0x778] sm:$0xff] %v4530_v34  ;;  %v4295_v42 = vmax.f32 %v2959_v12, %v4023_v36  ;;  %v4297_v44 = vmax.f32 %v3032_v27, %v4025_v37  ;;  %v2963_v45 = vadd.f32 %v2962_v40, %v6776_v46  ;;  %v3036_v48 = vadd.f32 %v3035_v41, %v6780_v47 }
 0x41a   : > { %4805 = vst [vmem:[%s6714_s15 + $0x788] sm:$0xff] %v4532_v35  ;;  %3949 = vmatpush1.bf16.msra.mxu1 %v5963_v29  ;;  %v4024_v50 = vmul.f32 0.01, %v2961_v38  ;;  %v4026_v51 = vmul.f32 0.01, %v3034_v39  ;;  %v2964_v52 = vpop.f32.mrf.mxu1  ;;  %v3037_v53 = vpop.f32.mrf.mxu0 }
 0x41b   : > { %3950 = vmatprep.subr.bf16.mxu1 %v5968_v33  ;;  %4567 = vst [vmem:[%s6714_s15 + $0x20] sm:$0xff] %v4295_v42  ;;  %4569 = vst [vmem:[%s6714_s15 + $0x30] sm:$0xff] %v4297_v44  ;;  %v4057_v56 = vmul.f32 0.01, %v2963_v45  ;;  %v4059_v62 = vmul.f32 0.01, %v3036_v48  ;;  %v2965_v0 = vadd.f32 %v2964_v52, %v6805_v5  ;;  %v3038_v3 = vadd.f32 %v3037_v53, %v6809_v25 }
 0x41c   : > { %v4296_v6 = vmax.f32 %v2961_v38, %v4024_v50  ;;  %v4298_v9 = vmax.f32 %v3034_v39, %v4026_v51  ;;  %v2968_v10 = vpop.f32.mrf.mxu1  ;;  %v3041_v13 = vpop.f32.mrf.mxu0  ;;  %v5972_v39 = vld [vmem:[#allocation13 + $0x3b0] ss:$136 sps:$4 sm:$0xff]  }
 0x41d   : > { %3843 = vmatmul.mubr.bf16.gmra.mxu1 %v6565_v43  ;;  %v4329_v14 = vmax.f32 %v2963_v45, %v4057_v56  ;;  %v4331_v15 = vmax.f32 %v3036_v48, %v4059_v62  ;;  %v4058_v54 = vmul.f32 0.01, %v2965_v0  ;;  %v4060_v16 = vmul.f32 0.01, %v3038_v3  ;;  %3916 = vmatmul.mubr.bf16.gmra.mxu0 %v6565_v43  ;;  %v5977_v45 = vld [vmem:[#allocation13 + $0x2a4] ss:$136 sps:$4 sm:$0xff]  }
 0x41e   : > { %3951 = vmatpush1.bf16.msra.mxu1 %v5966_v49  ;;  %4568 = vst [vmem:[%s6714_s15 + $0x28] sm:$0xff] %v4296_v6  ;;  %4570 = vst [vmem:[%s6714_s15 + $0x38] sm:$0xff] %v4298_v9  ;;  %v2969_v18 = vadd.f32 %v2968_v10, %v6776_v46  ;;  %v3042_v19 = vadd.f32 %v3041_v13, %v6780_v47  ;;  %v2970_v20 = vpop.f32.mrf.mxu1  ;;  %v3043_v21 = vpop.f32.mrf.mxu0  ;;  %3852 = vmatprep.mubr.bf16.mxu1 %v6285_v8  ;;  %v5975_v9 = vld [vmem:[#allocation13 + $0x2a0] ss:$136 sps:$4 sm:$0xff]  }
 0x41f   : > { %3952 = vmatprep.subr.bf16.mxu1 %v5971_v55  ;;  %4602 = vst [vmem:[%s6714_s15 + $0x130] sm:$0xff] %v4329_v14  ;;  %4604 = vst [vmem:[%s6714_s15 + $0x140] sm:$0xff] %v4331_v15  ;;  %v4330_v24 = vmax.f32 %v2965_v0, %v4058_v54  ;;  %v4332_v26 = vmax.f32 %v3038_v3, %v4060_v16  ;;  %v2971_v11 = vadd.f32 %v2970_v20, %v6805_v5  ;;  %v5980_v54 = vld [vmem:[#allocation13 + $0x194] ss:$136 sps:$4 sm:$0xff]  }
 0x420   : > { %v3044_v12 = vadd.f32 %v3043_v21, %v6809_v25  ;;  %3925 = vmatprep.mubr.bf16.mxu0 %v6285_v8  ;;  %v4091_v27 = vmul.f32 0.01, %v2969_v18  ;;  %v4093_v29 = vmul.f32 0.01, %v3042_v19  ;;  %v2972_v30 = vpop.f32.mrf.mxu1  ;;  %v3045_v31 = vpop.f32.mrf.mxu0 }
 0x421   : > { %4603 = vst [vmem:[%s6714_s15 + $0x138] sm:$0xff] %v4330_v24  ;;  %4605 = vst [vmem:[%s6714_s15 + $0x148] sm:$0xff] %v4332_v26  ;;  %v4092_v32 = vmul.f32 0.01, %v2971_v11  ;;  %v2973_v33 = vadd.f32 %v2972_v30, %v6776_v46  ;;  %v3046_v34 = vadd.f32 %v3045_v31, %v6780_v47 }
 0x422   : > { %v4094_v63 = vmul.f32 0.01, %v3044_v12  ;;  %3953 = vmatpush1.bf16.msra.mxu1 %v5969_v17  ;;  %v4363_v35 = vmax.f32 %v2969_v18, %v4091_v27  ;;  %v4365_v36 = vmax.f32 %v3042_v19, %v4093_v29  ;;  %v2974_v37 = vpop.f32.mrf.mxu1  ;;  %v3047_v38 = vpop.f32.mrf.mxu0  ;;  %v5978_v29 = vld [vmem:[#allocation13 + $0x190] ss:$136 sps:$4 sm:$0xff]  }
 0x423   : > { %3954 = vmatprep.subr.bf16.mxu1 %v5974_v4  ;;  %v4364_v40 = vmax.f32 %v2971_v11, %v4092_v32  ;;  %v4125_v42 = vmul.f32 0.01, %v2973_v33  ;;  %v4127_v44 = vmul.f32 0.01, %v3046_v34  ;;  %v2975_v48 = vadd.f32 %v2974_v37, %v6805_v5 }
 0x424   : > { %v4366_v41 = vmax.f32 %v3044_v12, %v4094_v63  ;;  %4636 = vst [vmem:[%s6714_s15 + $0x240] sm:$0xff] %v4363_v35  ;;  %4638 = vst [vmem:[%s6714_s15 + $0x250] sm:$0xff] %v4365_v36  ;;  %v3048_v49 = vadd.f32 %v3047_v38, %v6809_v25  ;;  %v2978_v50 = vpop.f32.mrf.mxu1  ;;  %v3051_v51 = vpop.f32.mrf.mxu0 }
 0x425   : > { %3853 = vmatmul.mubr.bf16.gmra.mxu1 %v6573_v59  ;;  %4637 = vst [vmem:[%s6714_s15 + $0x248] sm:$0xff] %v4364_v40  ;;  %v4397_v52 = vmax.f32 %v2973_v33, %v4125_v42  ;;  %v4399_v53 = vmax.f32 %v3046_v34, %v4127_v44  ;;  %v2979_v55 = vadd.f32 %v2978_v50, %v6776_v46  ;;  %v4126_v62 = vmul.f32 0.01, %v2975_v48  ;;  %v5983_v33 = vld [vmem:[#allocation13 + $0x84] ss:$136 sps:$4 sm:$0xff]  }
 0x426   : > { %4639 = vst [vmem:[%s6714_s15 + $0x258] sm:$0xff] %v4366_v41  ;;  %v3052_v56 = vadd.f32 %v3051_v51, %v6780_v47  ;;  %3926 = vmatmul.mubr.bf16.gmra.mxu0 %v6573_v59  ;;  %v4128_v0 = vmul.f32 0.01, %v3048_v49  ;;  %3955 = vmatpush1.bf16.msra.mxu1 %v5972_v39  ;;  %v2980_v3 = vpop.f32.mrf.mxu1  ;;  %v3053_v6 = vpop.f32.mrf.mxu0  ;;  %v6877_v42 = vld [vmem:[#allocation15 + $0x8] sm:$0xff] }
 0x427   : > { %3862 = vmatprep.mubr.bf16.mxu1 %v6285_v8  ;;  %4670 = vst [vmem:[%s6714_s15 + $0x350] sm:$0xff] %v4397_v52  ;;  %4672 = vst [vmem:[%s6714_s15 + $0x360] sm:$0xff] %v4399_v53  ;;  %v4159_v10 = vmul.f32 0.01, %v2979_v55  ;;  %v2981_v14 = vadd.f32 %v2980_v3, %v6805_v5  ;;  %v3054_v15 = vadd.f32 %v3053_v6, %v6809_v25  ;;  %3956 = vmatprep.subr.bf16.mxu1 %v5977_v45  ;;  %v5981_v50 = vld [vmem:[#allocation13 + $0x80] ss:$136 sps:$4 sm:$0xff]  }
 0x428   : > { %v4161_v13 = vmul.f32 0.01, %v3052_v56  ;;  %3935 = vmatprep.mubr.bf16.mxu0 %v6285_v8  ;;  %v4398_v16 = vmax.f32 %v2975_v48, %v4126_v62  ;;  %v4400_v17 = vmax.f32 %v3048_v49, %v4128_v0  ;;  %v2982_v18 = vpop.f32.mrf.mxu1  ;;  %v3055_v19 = vpop.f32.mrf.mxu0  ;;  %v6885_v6 = vrot.slane %v6877_v42, %v6668_v60 }
 0x429   : > { %v4431_v20 = vmax.f32 %v2979_v55, %v4159_v10  ;;  %v4160_v4 = vmul.f32 0.01, %v2981_v14  ;;  %v4162_v24 = vmul.f32 0.01, %v3054_v15  ;;  %v2983_v26 = vadd.f32 %v2982_v18, %v6776_v46 }
 0x42a   : > { %v4433_v21 = vmax.f32 %v3052_v56, %v4161_v13  ;;  %4671 = vst [vmem:[%s6714_s15 + $0x358] sm:$0xff] %v4398_v16  ;;  %4673 = vst [vmem:[%s6714_s15 + $0x368] sm:$0xff] %v4400_v17  ;;  %v3056_v11 = vadd.f32 %v3055_v19, %v6780_v47  ;;  %3957 = vmatpush1.bf16.msra.mxu1 %v5975_v9  ;;  %v2984_v12 = vpop.f32.mrf.mxu1  ;;  %v3057_v27 = vpop.f32.mrf.mxu0  ;;  %v6889_v9 = vrot.slane %v6877_v42, %v6671_v61 }
 0x42b   : > { %4704 = vst [vmem:[%s6714_s15 + $0x460] sm:$0xff] %v4431_v20  ;;  %v4432_v30 = vmax.f32 %v2981_v14, %v4160_v4  ;;  %v4434_v31 = vmax.f32 %v3054_v15, %v4162_v24  ;;  %v2985_v32 = vadd.f32 %v2984_v12, %v6805_v5  ;;  %v3058_v63 = vadd.f32 %v3057_v27, %v6809_v25 }
 0x42c   : > { %4706 = vst [vmem:[%s6714_s15 + $0x470] sm:$0xff] %v4433_v21  ;;  %3958 = vmatprep.subr.bf16.mxu1 %v5980_v54  ;;  %v4193_v34 = vmul.f32 0.01, %v2983_v26  ;;  %v4195_v35 = vmul.f32 0.01, %v3056_v11  ;;  %v2988_v36 = vpop.f32.mrf.mxu1  ;;  %v3061_v37 = vpop.f32.mrf.mxu0  ;;  %v6897_v19 = vrot.slane %v6877_v42, %v6678_v1  ;;  %v6901_v20 = vrot.slane %v6877_v42, %v6681_v2 }
 0x42d   : > { %3863 = vmatmul.mubr.bf16.gmra.mxu1 %v6579_v7  ;;  %4705 = vst [vmem:[%s6714_s15 + $0x468] sm:$0xff] %v4432_v30  ;;  %4707 = vst [vmem:[%s6714_s15 + $0x478] sm:$0xff] %v4434_v31  ;;  %v4194_v38 = vmul.f32 0.01, %v2985_v32  ;;  %v4196_v39 = vmul.f32 0.01, %v3058_v63  ;;  %v2989_v40 = vadd.f32 %v2988_v36, %v6776_v46  ;;  %v3062_v41 = vadd.f32 %v3061_v37, %v6780_v47 }
 0x42e   : > { %3936 = vmatmul.mubr.bf16.gmra.mxu0 %v6579_v7  ;;  %3978 = vmatprep.mubr.bf16.mxu1 %v6285_v8  ;;  %v4465_v44 = vmax.f32 %v2983_v26, %v4193_v34  ;;  %v4467_v45 = vmax.f32 %v3056_v11, %v4195_v35  ;;  %v2990_v48 = vpop.f32.mrf.mxu1  ;;  %v3063_v49 = vpop.f32.mrf.mxu0 }
 0x42f   : > { %3959 = vmatpush1.bf16.msra.mxu1 %v5978_v29  ;;  %v4466_v51 = vmax.f32 %v2985_v32, %v4194_v38  ;;  %v4468_v52 = vmax.f32 %v3058_v63, %v4196_v39  ;;  %v4227_v53 = vmul.f32 0.01, %v2989_v40  ;;  %v4229_v55 = vmul.f32 0.01, %v3062_v41 }
 0x430   : > { %3960 = vmatprep.subr.bf16.mxu1 %v5983_v33  ;;  %4738 = vst [vmem:[%s6714_s15 + $0x570] sm:$0xff] %v4465_v44  ;;  %4740 = vst [vmem:[%s6714_s15 + $0x580] sm:$0xff] %v4467_v45  ;;  %v2991_v56 = vadd.f32 %v2990_v48, %v6805_v5  ;;  %v3064_v62 = vadd.f32 %v3063_v49, %v6809_v25  ;;  %v2992_v0 = vpop.f32.mrf.mxu1  ;;  %v3065_v3 = vpop.f32.mrf.mxu0 }
 0x431   : > { %4739 = vst [vmem:[%s6714_s15 + $0x578] sm:$0xff] %v4466_v51  ;;  %4741 = vst [vmem:[%s6714_s15 + $0x588] sm:$0xff] %v4468_v52  ;;  %v4499_v10 = vmax.f32 %v2989_v40, %v4227_v53  ;;  %v4501_v13 = vmax.f32 %v3062_v41, %v4229_v55  ;;  %v2993_v14 = vadd.f32 %v2992_v0, %v6776_v46 }
 0x432   : > { %v3066_v15 = vadd.f32 %v3065_v3, %v6780_v47  ;;  %v4228_v54 = vmul.f32 0.01, %v2991_v56  ;;  %v4230_v16 = vmul.f32 0.01, %v3064_v62  ;;  %v2994_v17 = vpop.f32.mrf.mxu1  ;;  %v3067_v18 = vpop.f32.mrf.mxu0 }
 0x433   : > { %3961 = vmatpush1.bf16.msra.mxu1 %v5981_v50  ;;  %4772 = vst [vmem:[%s6714_s15 + $0x680] sm:$0xff] %v4499_v10  ;;  %4774 = vst [vmem:[%s6714_s15 + $0x690] sm:$0xff] %v4501_v13  ;;  %v4261_v46 = vmul.f32 0.01, %v2993_v14  ;;  %v2995_v47 = vadd.f32 %v2994_v17, %v6805_v5  ;;  %v3068_v4 = vadd.f32 %v3067_v18, %v6809_v25 }
 0x434   : > { %v4263_v21 = vmul.f32 0.01, %v3066_v15  ;;  %v4500_v24 = vmax.f32 %v2991_v56, %v4228_v54  ;;  %v4502_v26 = vmax.f32 %v3064_v62, %v4230_v16  ;;  %v3104_v11 = vpop.f32.mrf.mxu1  ;;  %v3177_v12 = vpop.f32.mrf.mxu0 }
 0x435   : > { %v4533_v27 = vmax.f32 %v2993_v14, %v4261_v46  ;;  %v4262_v30 = vmul.f32 0.01, %v2995_v47  ;;  %v4264_v31 = vmul.f32 0.01, %v3068_v4  ;;  %v3105_v32 = vadd.f32 %v3104_v11, %v6885_v6 }
 0x436   : > { %v4535_v29 = vmax.f32 %v3066_v15, %v4263_v21  ;;  %3979 = vmatmul.mubr.bf16.vlgmr.msra.gmra.mxu1 %v6557_v28  ;;  %4773 = vst [vmem:[%s6714_s15 + $0x688] sm:$0xff] %v4500_v24  ;;  %4775 = vst [vmem:[%s6714_s15 + $0x698] sm:$0xff] %v4502_v26  ;;  %v3178_v5 = vadd.f32 %v3177_v12, %v6889_v9  ;;  %v3106_v25 = vpop.f32.mrf.mxu1  ;;  %v3179_v63 = vpop.f32.mrf.mxu0 }
 0x437   : > { %3988 = vmatprep.mubr.bf16.mxu1 %v6285_v8  ;;  %4806 = vst [vmem:[%s6714_s15 + $0x790] sm:$0xff] %v4533_v27  ;;  %v4534_v33 = vmax.f32 %v2995_v47, %v4262_v30  ;;  %v4536_v34 = vmax.f32 %v3068_v4, %v4264_v31  ;;  %v3107_v35 = vadd.f32 %v3106_v25, %v6897_v19  ;;  %v4027_v36 = vmul.f32 0.01, %v3105_v32 }
 0x438   : > { %4808 = vst [vmem:[%s6714_s15 + $0x7a0] sm:$0xff] %v4535_v29  ;;  %v3180_v28 = vadd.f32 %v3179_v63, %v6901_v20  ;;  %v4029_v37 = vmul.f32 0.01, %v3178_v5  ;;  %v3108_v38 = vpop.f32.mrf.mxu1  ;;  %v3181_v39 = vpop.f32.mrf.mxu0 }
 0x439   : > { %4807 = vst [vmem:[%s6714_s15 + $0x798] sm:$0xff] %v4534_v33  ;;  %4809 = vst [vmem:[%s6714_s15 + $0x7a8] sm:$0xff] %v4536_v34  ;;  %v4028_v40 = vmul.f32 0.01, %v3107_v35  ;;  %v3109_v44 = vadd.f32 %v3108_v38, %v6885_v6  ;;  %v3182_v45 = vadd.f32 %v3181_v39, %v6889_v9  ;;  %v4299_v48 = vmax.f32 %v3105_v32, %v4027_v36 }
 0x43a   : > { %v4030_v41 = vmul.f32 0.01, %v3180_v28  ;;  %v4301_v49 = vmax.f32 %v3178_v5, %v4029_v37  ;;  %v3110_v50 = vpop.f32.mrf.mxu1  ;;  %v3183_v51 = vpop.f32.mrf.mxu0 }
 0x43b   : > { %v4300_v52 = vmax.f32 %v3107_v35, %v4028_v40  ;;  %v4061_v55 = vmul.f32 0.01, %v3109_v44  ;;  %v4063_v56 = vmul.f32 0.01, %v3182_v45  ;;  %4571 = vst [vmem:[%s6714_s15 + $0x40] sm:$0xff] %v4299_v48  ;;  %v3111_v62 = vadd.f32 %v3110_v50, %v6897_v19 }
 0x43c   : > { %v4302_v53 = vmax.f32 %v3180_v28, %v4030_v41  ;;  %4573 = vst [vmem:[%s6714_s15 + $0x50] sm:$0xff] %v4301_v49  ;;  %v3184_v0 = vadd.f32 %v3183_v51, %v6901_v20  ;;  %v3114_v3 = vpop.f32.mrf.mxu1  ;;  %v3187_v10 = vpop.f32.mrf.mxu0 }
 0x43d   : > { %4572 = vst [vmem:[%s6714_s15 + $0x48] sm:$0xff] %v4300_v52  ;;  %v4333_v13 = vmax.f32 %v3109_v44, %v4061_v55  ;;  %v4335_v14 = vmax.f32 %v3182_v45, %v4063_v56  ;;  %v3115_v15 = vadd.f32 %v3114_v3, %v6885_v6  ;;  %v3188_v54 = vadd.f32 %v3187_v10, %v6889_v9 }
 0x43e   : > { %4574 = vst [vmem:[%s6714_s15 + $0x58] sm:$0xff] %v4302_v53  ;;  %3989 = vmatmul.mubr.bf16.gmra.mxu1 %v6565_v43  ;;  %v4062_v16 = vmul.f32 0.01, %v3111_v62  ;;  %v4064_v17 = vmul.f32 0.01, %v3184_v0  ;;  %v3116_v18 = vpop.f32.mrf.mxu1  ;;  %v3189_v46 = vpop.f32.mrf.mxu0 }
 0x43f   : > { %3998 = vmatprep.mubr.bf16.mxu1 %v6285_v8  ;;  %4606 = vst [vmem:[%s6714_s15 + $0x150] sm:$0xff] %v4333_v13  ;;  %4608 = vst [vmem:[%s6714_s15 + $0x160] sm:$0xff] %v4335_v14  ;;  %v4095_v21 = vmul.f32 0.01, %v3115_v15  ;;  %v4097_v47 = vmul.f32 0.01, %v3188_v54  ;;  %v3117_v4 = vadd.f32 %v3116_v18, %v6897_v19  ;;  %v3190_v24 = vadd.f32 %v3189_v46, %v6901_v20 }
 0x440   : > { %v4334_v26 = vmax.f32 %v3111_v62, %v4062_v16  ;;  %v4336_v43 = vmax.f32 %v3184_v0, %v4064_v17  ;;  %v3118_v11 = vpop.f32.mrf.mxu1  ;;  %v3191_v12 = vpop.f32.mrf.mxu0 }
 0x441   : > { %v4367_v27 = vmax.f32 %v3115_v15, %v4095_v21  ;;  %v4369_v29 = vmax.f32 %v3188_v54, %v4097_v47  ;;  %v4096_v30 = vmul.f32 0.01, %v3117_v4  ;;  %v4098_v31 = vmul.f32 0.01, %v3190_v24 }
 0x442   : > { %4607 = vst [vmem:[%s6714_s15 + $0x158] sm:$0xff] %v4334_v26  ;;  %4609 = vst [vmem:[%s6714_s15 + $0x168] sm:$0xff] %v4336_v43  ;;  %v3119_v32 = vadd.f32 %v3118_v11, %v6885_v6  ;;  %v3192_v5 = vadd.f32 %v3191_v12, %v6889_v9  ;;  %v3120_v25 = vpop.f32.mrf.mxu1  ;;  %v3193_v63 = vpop.f32.mrf.mxu0 }
 0x443   : > { %4640 = vst [vmem:[%s6714_s15 + $0x260] sm:$0xff] %v4367_v27  ;;  %4642 = vst [vmem:[%s6714_s15 + $0x270] sm:$0xff] %v4369_v29  ;;  %v4368_v33 = vmax.f32 %v3117_v4, %v4096_v30  ;;  %v4370_v34 = vmax.f32 %v3190_v24, %v4098_v31  ;;  %v3121_v35 = vadd.f32 %v3120_v25, %v6897_v19 }
 0x444   : > { %v3194_v28 = vadd.f32 %v3193_v63, %v6901_v20  ;;  %v4129_v36 = vmul.f32 0.01, %v3119_v32  ;;  %v4131_v37 = vmul.f32 0.01, %v3192_v5  ;;  %v3124_v38 = vpop.f32.mrf.mxu1  ;;  %v3197_v39 = vpop.f32.mrf.mxu0 }
 0x445   : > { %4641 = vst [vmem:[%s6714_s15 + $0x268] sm:$0xff] %v4368_v33  ;;  %4643 = vst [vmem:[%s6714_s15 + $0x278] sm:$0xff] %v4370_v34  ;;  %v4130_v40 = vmul.f32 0.01, %v3121_v35  ;;  %v3125_v44 = vadd.f32 %v3124_v38, %v6885_v6  ;;  %v3198_v45 = vadd.f32 %v3197_v39, %v6889_v9  ;;  %v6976_v38 = vrot.slane %v6877_v42, %v6762_v23 }
 0x446   : > { %v4132_v41 = vmul.f32 0.01, %v3194_v28  ;;  %3999 = vmatmul.mubr.bf16.gmra.mxu1 %v6573_v59  ;;  %v4401_v48 = vmax.f32 %v3119_v32, %v4129_v36  ;;  %v4403_v49 = vmax.f32 %v3192_v5, %v4131_v37  ;;  %v3126_v50 = vpop.f32.mrf.mxu1  ;;  %v3199_v51 = vpop.f32.mrf.mxu0  ;;  %v6972_v37 = vrot.slane %v6877_v42, %v6759_v22 }
 0x447   : > { %4008 = vmatprep.mubr.bf16.mxu1 %v6285_v8  ;;  %v4402_v52 = vmax.f32 %v3121_v35, %v4130_v40  ;;  %v4163_v55 = vmul.f32 0.01, %v3125_v44  ;;  %v4165_v56 = vmul.f32 0.01, %v3198_v45  ;;  %v3127_v62 = vadd.f32 %v3126_v50, %v6897_v19 }
 0x448   : > { %v4404_v53 = vmax.f32 %v3194_v28, %v4132_v41  ;;  %4674 = vst [vmem:[%s6714_s15 + $0x370] sm:$0xff] %v4401_v48  ;;  %4676 = vst [vmem:[%s6714_s15 + $0x380] sm:$0xff] %v4403_v49  ;;  %v3200_v59 = vadd.f32 %v3199_v51, %v6901_v20  ;;  %v3128_v0 = vpop.f32.mrf.mxu1  ;;  %v3201_v3 = vpop.f32.mrf.mxu0  ;;  %v6984_v51 = vrot.slane %v6877_v42, %v6789_v57 }
 0x449   : > { %4675 = vst [vmem:[%s6714_s15 + $0x378] sm:$0xff] %v4402_v52  ;;  %v4435_v10 = vmax.f32 %v3125_v44, %v4163_v55  ;;  %v4437_v13 = vmax.f32 %v3198_v45, %v4165_v56  ;;  %v3129_v8 = vadd.f32 %v3128_v0, %v6885_v6  ;;  %v3202_v14 = vadd.f32 %v3201_v3, %v6889_v9 }
 0x44a   : > { %4677 = vst [vmem:[%s6714_s15 + $0x388] sm:$0xff] %v4404_v53  ;;  %v4164_v15 = vmul.f32 0.01, %v3127_v62  ;;  %v4166_v54 = vmul.f32 0.01, %v3200_v59  ;;  %v3130_v16 = vpop.f32.mrf.mxu1  ;;  %v3203_v17 = vpop.f32.mrf.mxu0  ;;  %v6988_v52 = vrot.slane %v6877_v42, %v6792_v58 }
 0x44b   : > { %4708 = vst [vmem:[%s6714_s15 + $0x480] sm:$0xff] %v4435_v10  ;;  %4710 = vst [vmem:[%s6714_s15 + $0x490] sm:$0xff] %v4437_v13  ;;  %v4197_v18 = vmul.f32 0.01, %v3129_v8  ;;  %v4199_v46 = vmul.f32 0.01, %v3202_v14  ;;  %v3131_v21 = vadd.f32 %v3130_v16, %v6897_v19  ;;  %v3204_v47 = vadd.f32 %v3203_v17, %v6901_v20 }
 0x44c   : > { %v4436_v4 = vmax.f32 %v3127_v62, %v4164_v15  ;;  %v4438_v24 = vmax.f32 %v3200_v59, %v4166_v54  ;;  %v3134_v26 = vpop.f32.mrf.mxu1  ;;  %v3207_v43 = vpop.f32.mrf.mxu0 }
 0x44d   : > { %v4469_v11 = vmax.f32 %v3129_v8, %v4197_v18  ;;  %v4471_v12 = vmax.f32 %v3202_v14, %v4199_v46  ;;  %v4198_v27 = vmul.f32 0.01, %v3131_v21  ;;  %v4200_v29 = vmul.f32 0.01, %v3204_v47 }
 0x44e   : > { %4009 = vmatmul.mubr.bf16.gmra.mxu1 %v6579_v7  ;;  %4709 = vst [vmem:[%s6714_s15 + $0x488] sm:$0xff] %v4436_v4  ;;  %4711 = vst [vmem:[%s6714_s15 + $0x498] sm:$0xff] %v4438_v24  ;;  %v3135_v30 = vadd.f32 %v3134_v26, %v6885_v6  ;;  %v3208_v31 = vadd.f32 %v3207_v43, %v6889_v9  ;;  %v3136_v32 = vpop.f32.mrf.mxu1  ;;  %v3209_v5 = vpop.f32.mrf.mxu0 }
 0x44f   : > { %4742 = vst [vmem:[%s6714_s15 + $0x590] sm:$0xff] %v4469_v11  ;;  %4744 = vst [vmem:[%s6714_s15 + $0x5a0] sm:$0xff] %v4471_v12  ;;  %v4470_v25 = vmax.f32 %v3131_v21, %v4198_v27  ;;  %v4472_v63 = vmax.f32 %v3204_v47, %v4200_v29  ;;  %v3137_v33 = vadd.f32 %v3136_v32, %v6897_v19 }
 0x450   : > { %v3210_v34 = vadd.f32 %v3209_v5, %v6901_v20  ;;  %v4231_v35 = vmul.f32 0.01, %v3135_v30  ;;  %v4233_v7 = vmul.f32 0.01, %v3208_v31  ;;  %v3138_v28 = vpop.f32.mrf.mxu1  ;;  %v3211_v36 = vpop.f32.mrf.mxu0 }
 0x451   : > { %4743 = vst [vmem:[%s6714_s15 + $0x598] sm:$0xff] %v4470_v25  ;;  %4745 = vst [vmem:[%s6714_s15 + $0x5a8] sm:$0xff] %v4472_v63  ;;  %v4232_v39 = vmul.f32 0.01, %v3137_v33  ;;  %v3139_v41 = vadd.f32 %v3138_v28, %v6885_v6  ;;  %v3212_v44 = vadd.f32 %v3211_v36, %v6889_v9 }
 0x452   : > { %v4234_v40 = vmul.f32 0.01, %v3210_v34  ;;  %v4503_v45 = vmax.f32 %v3135_v30, %v4231_v35  ;;  %v4505_v48 = vmax.f32 %v3208_v31, %v4233_v7  ;;  %v3140_v49 = vpop.f32.mrf.mxu1  ;;  %v3213_v50 = vpop.f32.mrf.mxu0 }
 0x453   : > { %v4504_v53 = vmax.f32 %v3137_v33, %v4232_v39  ;;  %v4265_v56 = vmul.f32 0.01, %v3139_v41  ;;  %v4267_v6 = vmul.f32 0.01, %v3212_v44  ;;  %v3141_v9 = vadd.f32 %v3140_v49, %v6897_v19 }
 0x454   : > { %v4506_v55 = vmax.f32 %v3210_v34, %v4234_v40  ;;  %4776 = vst [vmem:[%s6714_s15 + $0x6a0] sm:$0xff] %v4503_v45  ;;  %4778 = vst [vmem:[%s6714_s15 + $0x6b0] sm:$0xff] %v4505_v48  ;;  %v3214_v62 = vadd.f32 %v3213_v50, %v6901_v20  ;;  %v3250_v59 = vpop.f32.mrf.mxu1  ;;  %v3323_v0 = vpop.f32.mrf.mxu0 }
 0x455   : > { %4777 = vst [vmem:[%s6714_s15 + $0x6a8] sm:$0xff] %v4504_v53  ;;  %v4537_v3 = vmax.f32 %v3139_v41, %v4265_v56  ;;  %v4539_v10 = vmax.f32 %v3212_v44, %v4267_v6  ;;  %v3251_v42 = vadd.f32 %v3250_v59, %v6972_v37  ;;  %v3324_v13 = vadd.f32 %v3323_v0, %v6976_v38 }
 0x456   : > { %4779 = vst [vmem:[%s6714_s15 + $0x6b8] sm:$0xff] %v4506_v55  ;;  %v4266_v8 = vmul.f32 0.01, %v3141_v9  ;;  %v4268_v14 = vmul.f32 0.01, %v3214_v62  ;;  %v3252_v15 = vpop.f32.mrf.mxu1  ;;  %v3325_v54 = vpop.f32.mrf.mxu0 }
 0x457   : > { %4810 = vst [vmem:[%s6714_s15 + $0x7b0] sm:$0xff] %v4537_v3  ;;  %4812 = vst [vmem:[%s6714_s15 + $0x7c0] sm:$0xff] %v4539_v10  ;;  %v4031_v19 = vmul.f32 0.01, %v3251_v42  ;;  %v4033_v20 = vmul.f32 0.01, %v3324_v13  ;;  %v3253_v16 = vadd.f32 %v3252_v15, %v6984_v51  ;;  %v3326_v17 = vadd.f32 %v3325_v54, %v6988_v52 }
 0x458   : > { %v4538_v18 = vmax.f32 %v3141_v9, %v4266_v8  ;;  %v4540_v46 = vmax.f32 %v3214_v62, %v4268_v14  ;;  %v3254_v21 = vpop.f32.mrf.mxu1  ;;  %v3327_v47 = vpop.f32.mrf.mxu0 }
 0x459   : > { %v4303_v4 = vmax.f32 %v3251_v42, %v4031_v19  ;;  %v4305_v24 = vmax.f32 %v3324_v13, %v4033_v20  ;;  %v4032_v26 = vmul.f32 0.01, %v3253_v16  ;;  %v4034_v43 = vmul.f32 0.01, %v3326_v17 }
 0x45a   : > { %4811 = vst [vmem:[%s6714_s15 + $0x7b8] sm:$0xff] %v4538_v18  ;;  %4813 = vst [vmem:[%s6714_s15 + $0x7c8] sm:$0xff] %v4540_v46  ;;  %v3255_v11 = vadd.f32 %v3254_v21, %v6972_v37  ;;  %v3328_v12 = vadd.f32 %v3327_v47, %v6976_v38  ;;  %v3256_v27 = vpop.f32.mrf.mxu1  ;;  %v3329_v29 = vpop.f32.mrf.mxu0 }
 0x45b   : > { %4575 = vst [vmem:[%s6714_s15 + $0x60] sm:$0xff] %v4303_v4  ;;  %4577 = vst [vmem:[%s6714_s15 + $0x70] sm:$0xff] %v4305_v24  ;;  %v4304_v30 = vmax.f32 %v3253_v16, %v4032_v26  ;;  %v4306_v31 = vmax.f32 %v3326_v17, %v4034_v43  ;;  %v3257_v32 = vadd.f32 %v3256_v27, %v6984_v51 }
 0x45c   : > { %v3330_v5 = vadd.f32 %v3329_v29, %v6988_v52  ;;  %v4065_v25 = vmul.f32 0.01, %v3255_v11  ;;  %v4067_v63 = vmul.f32 0.01, %v3328_v12  ;;  %v3260_v33 = vpop.f32.mrf.mxu1  ;;  %v3333_v34 = vpop.f32.mrf.mxu0 }
 0x45d   : > { %4576 = vst [vmem:[%s6714_s15 + $0x68] sm:$0xff] %v4304_v30  ;;  %4578 = vst [vmem:[%s6714_s15 + $0x78] sm:$0xff] %v4306_v31  ;;  %v4066_v35 = vmul.f32 0.01, %v3257_v32  ;;  %v3261_v28 = vadd.f32 %v3260_v33, %v6972_v37  ;;  %v3334_v36 = vadd.f32 %v3333_v34, %v6976_v38 }
 0x45e   : > { %v4068_v7 = vmul.f32 0.01, %v3330_v5  ;;  %v4337_v39 = vmax.f32 %v3255_v11, %v4065_v25  ;;  %v4339_v40 = vmax.f32 %v3328_v12, %v4067_v63  ;;  %v3262_v41 = vpop.f32.mrf.mxu1  ;;  %v3335_v44 = vpop.f32.mrf.mxu0 }
 0x45f   : > { %v4338_v45 = vmax.f32 %v3257_v32, %v4066_v35  ;;  %v4099_v49 = vmul.f32 0.01, %v3261_v28  ;;  %v4101_v50 = vmul.f32 0.01, %v3334_v36  ;;  %v3263_v53 = vadd.f32 %v3262_v41, %v6984_v51 }
 0x460   : > { %v4340_v48 = vmax.f32 %v3330_v5, %v4068_v7  ;;  %4610 = vst [vmem:[%s6714_s15 + $0x170] sm:$0xff] %v4337_v39  ;;  %4612 = vst [vmem:[%s6714_s15 + $0x180] sm:$0xff] %v4339_v40  ;;  %v3336_v55 = vadd.f32 %v3335_v44, %v6988_v52  ;;  %v3264_v56 = vpop.f32.mrf.mxu1  ;;  %v3337_v6 = vpop.f32.mrf.mxu0 }
 0x461   : > { %4611 = vst [vmem:[%s6714_s15 + $0x178] sm:$0xff] %v4338_v45  ;;  %v4371_v9 = vmax.f32 %v3261_v28, %v4099_v49  ;;  %v4373_v62 = vmax.f32 %v3334_v36, %v4101_v50  ;;  %v3265_v59 = vadd.f32 %v3264_v56, %v6972_v37  ;;  %v3338_v0 = vadd.f32 %v3337_v6, %v6976_v38 }
 0x462   : > { %4613 = vst [vmem:[%s6714_s15 + $0x188] sm:$0xff] %v4340_v48  ;;  %v4100_v3 = vmul.f32 0.01, %v3263_v53  ;;  %v4102_v10 = vmul.f32 0.01, %v3336_v55  ;;  %v3266_v42 = vpop.f32.mrf.mxu1  ;;  %v3339_v13 = vpop.f32.mrf.mxu0 }
 0x463   : > { %4644 = vst [vmem:[%s6714_s15 + $0x280] sm:$0xff] %v4371_v9  ;;  %4646 = vst [vmem:[%s6714_s15 + $0x290] sm:$0xff] %v4373_v62  ;;  %v4133_v8 = vmul.f32 0.01, %v3265_v59  ;;  %v4135_v14 = vmul.f32 0.01, %v3338_v0  ;;  %v3267_v15 = vadd.f32 %v3266_v42, %v6984_v51  ;;  %v3340_v54 = vadd.f32 %v3339_v13, %v6988_v52 }
 0x464   : > { %v4372_v19 = vmax.f32 %v3263_v53, %v4100_v3  ;;  %v4374_v20 = vmax.f32 %v3336_v55, %v4102_v10  ;;  %v3270_v16 = vpop.f32.mrf.mxu1  ;;  %v3343_v17 = vpop.f32.mrf.mxu0  ;;  %v7046_v9 = vld [vmem:[#allocation15 + $0x10] sm:$0xff] }
 0x465   : > { %v4405_v18 = vmax.f32 %v3265_v59, %v4133_v8  ;;  %v4407_v46 = vmax.f32 %v3338_v0, %v4135_v14  ;;  %v4134_v21 = vmul.f32 0.01, %v3267_v15  ;;  %v4136_v47 = vmul.f32 0.01, %v3340_v54 }
 0x466   : > { %4645 = vst [vmem:[%s6714_s15 + $0x288] sm:$0xff] %v4372_v19  ;;  %4647 = vst [vmem:[%s6714_s15 + $0x298] sm:$0xff] %v4374_v20  ;;  %v3271_v4 = vadd.f32 %v3270_v16, %v6972_v37  ;;  %v3344_v24 = vadd.f32 %v3343_v17, %v6976_v38  ;;  %v3272_v26 = vpop.f32.mrf.mxu1  ;;  %v3345_v43 = vpop.f32.mrf.mxu0  ;;  %v7054_v20 = vrot.slane %v7046_v9, %v6668_v60 }
 0x467   : > { %4678 = vst [vmem:[%s6714_s15 + $0x390] sm:$0xff] %v4405_v18  ;;  %4680 = vst [vmem:[%s6714_s15 + $0x3a0] sm:$0xff] %v4407_v46  ;;  %v4406_v11 = vmax.f32 %v3267_v15, %v4134_v21  ;;  %v4408_v12 = vmax.f32 %v3340_v54, %v4136_v47  ;;  %v3273_v27 = vadd.f32 %v3272_v26, %v6984_v51 }
 0x468   : > { %v3346_v29 = vadd.f32 %v3345_v43, %v6988_v52  ;;  %v4167_v30 = vmul.f32 0.01, %v3271_v4  ;;  %v4169_v31 = vmul.f32 0.01, %v3344_v24  ;;  %v3274_v32 = vpop.f32.mrf.mxu1  ;;  %v3347_v5 = vpop.f32.mrf.mxu0  ;;  %v7058_v16 = vrot.slane %v7046_v9, %v6671_v61 }
 0x469   : > { %4679 = vst [vmem:[%s6714_s15 + $0x398] sm:$0xff] %v4406_v11  ;;  %4681 = vst [vmem:[%s6714_s15 + $0x3a8] sm:$0xff] %v4408_v12  ;;  %v4168_v25 = vmul.f32 0.01, %v3273_v27  ;;  %v3275_v33 = vadd.f32 %v3274_v32, %v6972_v37  ;;  %v3348_v34 = vadd.f32 %v3347_v5, %v6976_v38 }
 0x46a   : > { %v4170_v63 = vmul.f32 0.01, %v3346_v29  ;;  %v4439_v35 = vmax.f32 %v3271_v4, %v4167_v30  ;;  %v4441_v7 = vmax.f32 %v3344_v24, %v4169_v31  ;;  %v3276_v28 = vpop.f32.mrf.mxu1  ;;  %v3349_v36 = vpop.f32.mrf.mxu0 }
 0x46b   : > { %v4440_v39 = vmax.f32 %v3273_v27, %v4168_v25  ;;  %v4201_v41 = vmul.f32 0.01, %v3275_v33  ;;  %v4203_v44 = vmul.f32 0.01, %v3348_v34  ;;  %v3277_v45 = vadd.f32 %v3276_v28, %v6984_v51 }
 0x46c   : > { %v4442_v40 = vmax.f32 %v3346_v29, %v4170_v63  ;;  %4712 = vst [vmem:[%s6714_s15 + $0x4a0] sm:$0xff] %v4439_v35  ;;  %4714 = vst [vmem:[%s6714_s15 + $0x4b0] sm:$0xff] %v4441_v7  ;;  %v3350_v48 = vadd.f32 %v3349_v36, %v6988_v52  ;;  %v3280_v49 = vpop.f32.mrf.mxu1  ;;  %v3353_v50 = vpop.f32.mrf.mxu0 }
 0x46d   : > { %4713 = vst [vmem:[%s6714_s15 + $0x4a8] sm:$0xff] %v4440_v39  ;;  %v4473_v53 = vmax.f32 %v3275_v33, %v4201_v41  ;;  %v4475_v55 = vmax.f32 %v3348_v34, %v4203_v44  ;;  %v3281_v56 = vadd.f32 %v3280_v49, %v6972_v37  ;;  %v3354_v6 = vadd.f32 %v3353_v50, %v6976_v38 }
 0x46e   : > { %4715 = vst [vmem:[%s6714_s15 + $0x4b8] sm:$0xff] %v4442_v40  ;;  %v4202_v62 = vmul.f32 0.01, %v3277_v45  ;;  %v4204_v59 = vmul.f32 0.01, %v3350_v48  ;;  %v3282_v0 = vpop.f32.mrf.mxu1  ;;  %v3355_v3 = vpop.f32.mrf.mxu0 }
 0x46f   : > { %4746 = vst [vmem:[%s6714_s15 + $0x5b0] sm:$0xff] %v4473_v53  ;;  %4748 = vst [vmem:[%s6714_s15 + $0x5c0] sm:$0xff] %v4475_v55  ;;  %v4235_v10 = vmul.f32 0.01, %v3281_v56  ;;  %v4237_v42 = vmul.f32 0.01, %v3354_v6  ;;  %v3283_v13 = vadd.f32 %v3282_v0, %v6984_v51  ;;  %v3356_v8 = vadd.f32 %v3355_v3, %v6988_v52 }
 0x470   : > { %v4474_v14 = vmax.f32 %v3277_v45, %v4202_v62  ;;  %v4476_v15 = vmax.f32 %v3350_v48, %v4204_v59  ;;  %v3284_v54 = vpop.f32.mrf.mxu1  ;;  %v3357_v19 = vpop.f32.mrf.mxu0 }
 0x471   : > { %v4507_v17 = vmax.f32 %v3281_v56, %v4235_v10  ;;  %v4509_v18 = vmax.f32 %v3354_v6, %v4237_v42  ;;  %v4236_v46 = vmul.f32 0.01, %v3283_v13  ;;  %v4238_v21 = vmul.f32 0.01, %v3356_v8 }
 0x472   : > { %4747 = vst [vmem:[%s6714_s15 + $0x5b8] sm:$0xff] %v4474_v14  ;;  %4749 = vst [vmem:[%s6714_s15 + $0x5c8] sm:$0xff] %v4476_v15  ;;  %v3285_v47 = vadd.f32 %v3284_v54, %v6972_v37  ;;  %v3358_v4 = vadd.f32 %v3357_v19, %v6976_v38  ;;  %v3286_v24 = vpop.f32.mrf.mxu1  ;;  %v3359_v26 = vpop.f32.mrf.mxu0  ;;  %v7070_v37 = vrot.slane %v7046_v9, %v6678_v1 }
 0x473   : > { %4780 = vst [vmem:[%s6714_s15 + $0x6c0] sm:$0xff] %v4507_v17  ;;  %4782 = vst [vmem:[%s6714_s15 + $0x6d0] sm:$0xff] %v4509_v18  ;;  %v4508_v43 = vmax.f32 %v3283_v13, %v4236_v46  ;;  %v4510_v11 = vmax.f32 %v3356_v8, %v4238_v21  ;;  %v3287_v12 = vadd.f32 %v3286_v24, %v6984_v51 }
 0x474   : > { %v3360_v27 = vadd.f32 %v3359_v26, %v6988_v52  ;;  %v4269_v29 = vmul.f32 0.01, %v3285_v47  ;;  %v4271_v30 = vmul.f32 0.01, %v3358_v4  ;;  %v3396_v31 = vpop.f32.mrf.mxu1  ;;  %v3469_v32 = vpop.f32.mrf.mxu0  ;;  %v7074_v38 = vrot.slane %v7046_v9, %v6681_v2 }
 0x475   : > { %4781 = vst [vmem:[%s6714_s15 + $0x6c8] sm:$0xff] %v4508_v43  ;;  %4783 = vst [vmem:[%s6714_s15 + $0x6d8] sm:$0xff] %v4510_v11  ;;  %v4270_v5 = vmul.f32 0.01, %v3287_v12  ;;  %v3397_v52 = vadd.f32 %v3396_v31, %v7054_v20  ;;  %v3470_v25 = vadd.f32 %v3469_v32, %v7058_v16 }
 0x476   : > { %v4272_v51 = vmul.f32 0.01, %v3360_v27  ;;  %v4541_v63 = vmax.f32 %v3285_v47, %v4269_v29  ;;  %v4543_v33 = vmax.f32 %v3358_v4, %v4271_v30  ;;  %v3398_v34 = vpop.f32.mrf.mxu1  ;;  %v3471_v35 = vpop.f32.mrf.mxu0 }
 0x477   : > { %v4542_v7 = vmax.f32 %v3287_v12, %v4270_v5  ;;  %v4035_v36 = vmul.f32 0.01, %v3397_v52  ;;  %v4037_v39 = vmul.f32 0.01, %v3470_v25  ;;  %v3399_v40 = vadd.f32 %v3398_v34, %v7070_v37 }
 0x478   : > { %v4544_v28 = vmax.f32 %v3360_v27, %v4272_v51  ;;  %4814 = vst [vmem:[%s6714_s15 + $0x7d0] sm:$0xff] %v4541_v63  ;;  %4816 = vst [vmem:[%s6714_s15 + $0x7e0] sm:$0xff] %v4543_v33  ;;  %v3472_v41 = vadd.f32 %v3471_v35, %v7074_v38  ;;  %v3400_v44 = vpop.f32.mrf.mxu1  ;;  %v3473_v45 = vpop.f32.mrf.mxu0 }
 0x479   : > { %4815 = vst [vmem:[%s6714_s15 + $0x7d8] sm:$0xff] %v4542_v7  ;;  %v4307_v48 = vmax.f32 %v3397_v52, %v4035_v36  ;;  %v4309_v49 = vmax.f32 %v3470_v25, %v4037_v39  ;;  %v3401_v50 = vadd.f32 %v3400_v44, %v7054_v20  ;;  %v3474_v53 = vadd.f32 %v3473_v45, %v7058_v16 }
 0x47a   : > { %4817 = vst [vmem:[%s6714_s15 + $0x7e8] sm:$0xff] %v4544_v28  ;;  %v4036_v55 = vmul.f32 0.01, %v3399_v40  ;;  %v4038_v56 = vmul.f32 0.01, %v3472_v41  ;;  %v3402_v6 = vpop.f32.mrf.mxu1  ;;  %v3475_v62 = vpop.f32.mrf.mxu0 }
 0x47b   : > { %4579 = vst [vmem:[%s6714_s15 + $0x80] sm:$0xff] %v4307_v48  ;;  %4581 = vst [vmem:[%s6714_s15 + $0x90] sm:$0xff] %v4309_v49  ;;  %v4069_v59 = vmul.f32 0.01, %v3401_v50  ;;  %v4071_v0 = vmul.f32 0.01, %v3474_v53  ;;  %v3403_v3 = vadd.f32 %v3402_v6, %v7070_v37  ;;  %v3476_v10 = vadd.f32 %v3475_v62, %v7074_v38 }
 0x47c   : > { %v4308_v42 = vmax.f32 %v3399_v40, %v4036_v55  ;;  %v4310_v13 = vmax.f32 %v3472_v41, %v4038_v56  ;;  %v3406_v8 = vpop.f32.mrf.mxu1  ;;  %v3479_v14 = vpop.f32.mrf.mxu0 }
 0x47d   : > { %v4341_v15 = vmax.f32 %v3401_v50, %v4069_v59  ;;  %v4343_v54 = vmax.f32 %v3474_v53, %v4071_v0  ;;  %v4070_v19 = vmul.f32 0.01, %v3403_v3  ;;  %v4072_v17 = vmul.f32 0.01, %v3476_v10 }
 0x47e   : > { %4580 = vst [vmem:[%s6714_s15 + $0x88] sm:$0xff] %v4308_v42  ;;  %4582 = vst [vmem:[%s6714_s15 + $0x98] sm:$0xff] %v4310_v13  ;;  %v3407_v18 = vadd.f32 %v3406_v8, %v7054_v20  ;;  %v3480_v46 = vadd.f32 %v3479_v14, %v7058_v16  ;;  %v3408_v21 = vpop.f32.mrf.mxu1  ;;  %v3481_v47 = vpop.f32.mrf.mxu0 }
 0x47f   : > { %4614 = vst [vmem:[%s6714_s15 + $0x190] sm:$0xff] %v4341_v15  ;;  %4616 = vst [vmem:[%s6714_s15 + $0x1a0] sm:$0xff] %v4343_v54  ;;  %v4342_v4 = vmax.f32 %v3403_v3, %v4070_v19  ;;  %v4344_v24 = vmax.f32 %v3476_v10, %v4072_v17  ;;  %v3409_v26 = vadd.f32 %v3408_v21, %v7070_v37 }
 0x480   : > { %v3482_v43 = vadd.f32 %v3481_v47, %v7074_v38  ;;  %v4103_v11 = vmul.f32 0.01, %v3407_v18  ;;  %v4105_v12 = vmul.f32 0.01, %v3480_v46  ;;  %v3410_v27 = vpop.f32.mrf.mxu1  ;;  %v3483_v29 = vpop.f32.mrf.mxu0 }
 0x481   : > { %4615 = vst [vmem:[%s6714_s15 + $0x198] sm:$0xff] %v4342_v4  ;;  %4617 = vst [vmem:[%s6714_s15 + $0x1a8] sm:$0xff] %v4344_v24  ;;  %v4104_v30 = vmul.f32 0.01, %v3409_v26  ;;  %v3411_v32 = vadd.f32 %v3410_v27, %v7054_v20  ;;  %v3484_v5 = vadd.f32 %v3483_v29, %v7058_v16 }
 0x482   : > { %v4106_v31 = vmul.f32 0.01, %v3482_v43  ;;  %v4375_v51 = vmax.f32 %v3407_v18, %v4103_v11  ;;  %v4377_v52 = vmax.f32 %v3480_v46, %v4105_v12  ;;  %v3412_v25 = vpop.f32.mrf.mxu1  ;;  %v3485_v63 = vpop.f32.mrf.mxu0 }
 0x483   : > { %v4376_v33 = vmax.f32 %v3409_v26, %v4104_v30  ;;  %v4137_v35 = vmul.f32 0.01, %v3411_v32  ;;  %v4139_v7 = vmul.f32 0.01, %v3484_v5  ;;  %v3413_v28 = vadd.f32 %v3412_v25, %v7070_v37 }
 0x484   : > { %v4378_v34 = vmax.f32 %v3482_v43, %v4106_v31  ;;  %4648 = vst [vmem:[%s6714_s15 + $0x2a0] sm:$0xff] %v4375_v51  ;;  %4650 = vst [vmem:[%s6714_s15 + $0x2b0] sm:$0xff] %v4377_v52  ;;  %v3486_v36 = vadd.f32 %v3485_v63, %v7074_v38  ;;  %v3416_v39 = vpop.f32.mrf.mxu1  ;;  %v3489_v40 = vpop.f32.mrf.mxu0 }
 0x485   : > { %4649 = vst [vmem:[%s6714_s15 + $0x2a8] sm:$0xff] %v4376_v33  ;;  %v4409_v41 = vmax.f32 %v3411_v32, %v4137_v35  ;;  %v4411_v44 = vmax.f32 %v3484_v5, %v4139_v7  ;;  %v3417_v45 = vadd.f32 %v3416_v39, %v7054_v20  ;;  %v3490_v48 = vadd.f32 %v3489_v40, %v7058_v16 }
 0x486   : > { %4651 = vst [vmem:[%s6714_s15 + $0x2b8] sm:$0xff] %v4378_v34  ;;  %v4138_v49 = vmul.f32 0.01, %v3413_v28  ;;  %v4140_v50 = vmul.f32 0.01, %v3486_v36  ;;  %v3418_v53 = vpop.f32.mrf.mxu1  ;;  %v3491_v55 = vpop.f32.mrf.mxu0  ;;  %v7138_v39 = vrot.slane %v7046_v9, %v6762_v23 }
 0x487   : > { %4682 = vst [vmem:[%s6714_s15 + $0x3b0] sm:$0xff] %v4409_v41  ;;  %4684 = vst [vmem:[%s6714_s15 + $0x3c0] sm:$0xff] %v4411_v44  ;;  %v4171_v56 = vmul.f32 0.01, %v3417_v45  ;;  %v4173_v6 = vmul.f32 0.01, %v3490_v48  ;;  %v3419_v62 = vadd.f32 %v3418_v53, %v7070_v37  ;;  %v3492_v59 = vadd.f32 %v3491_v55, %v7074_v38 }
 0x488   : > { %v4410_v0 = vmax.f32 %v3413_v28, %v4138_v49  ;;  %v4412_v3 = vmax.f32 %v3486_v36, %v4140_v50  ;;  %v3420_v10 = vpop.f32.mrf.mxu1  ;;  %v3493_v42 = vpop.f32.mrf.mxu0  ;;  %v7134_v36 = vrot.slane %v7046_v9, %v6759_v22  ;;  %v7146_v55 = vrot.slane %v7046_v9, %v6789_v57 }
 0x489   : > { %v4443_v13 = vmax.f32 %v3417_v45, %v4171_v56  ;;  %v4445_v8 = vmax.f32 %v3490_v48, %v4173_v6  ;;  %v4172_v14 = vmul.f32 0.01, %v3419_v62  ;;  %v4174_v15 = vmul.f32 0.01, %v3492_v59 }
 0x48a   : > { %4683 = vst [vmem:[%s6714_s15 + $0x3b8] sm:$0xff] %v4410_v0  ;;  %4685 = vst [vmem:[%s6714_s15 + $0x3c8] sm:$0xff] %v4412_v3  ;;  %v3421_v54 = vadd.f32 %v3420_v10, %v7054_v20  ;;  %v3494_v19 = vadd.f32 %v3493_v42, %v7058_v16  ;;  %v3422_v17 = vpop.f32.mrf.mxu1  ;;  %v3495_v18 = vpop.f32.mrf.mxu0  ;;  %v7150_v56 = vrot.slane %v7046_v9, %v6792_v58 }
 0x48b   : > { %4716 = vst [vmem:[%s6714_s15 + $0x4c0] sm:$0xff] %v4443_v13  ;;  %4718 = vst [vmem:[%s6714_s15 + $0x4d0] sm:$0xff] %v4445_v8  ;;  %v4444_v46 = vmax.f32 %v3419_v62, %v4172_v14  ;;  %v4446_v21 = vmax.f32 %v3492_v59, %v4174_v15  ;;  %v3423_v47 = vadd.f32 %v3422_v17, %v7070_v37 }
 0x48c   : > { %v3496_v4 = vadd.f32 %v3495_v18, %v7074_v38  ;;  %v4205_v24 = vmul.f32 0.01, %v3421_v54  ;;  %v4207_v26 = vmul.f32 0.01, %v3494_v19  ;;  %v3426_v43 = vpop.f32.mrf.mxu1  ;;  %v3499_v11 = vpop.f32.mrf.mxu0 }
 0x48d   : > { %4717 = vst [vmem:[%s6714_s15 + $0x4c8] sm:$0xff] %v4444_v46  ;;  %4719 = vst [vmem:[%s6714_s15 + $0x4d8] sm:$0xff] %v4446_v21  ;;  %v4206_v12 = vmul.f32 0.01, %v3423_v47  ;;  %v3427_v29 = vadd.f32 %v3426_v43, %v7054_v20  ;;  %v3500_v30 = vadd.f32 %v3499_v11, %v7058_v16 }
 0x48e   : > { %v4208_v27 = vmul.f32 0.01, %v3496_v4  ;;  %v4477_v31 = vmax.f32 %v3421_v54, %v4205_v24  ;;  %v4479_v32 = vmax.f32 %v3494_v19, %v4207_v26  ;;  %v3428_v5 = vpop.f32.mrf.mxu1  ;;  %v3501_v51 = vpop.f32.mrf.mxu0 }
 0x48f   : > { %v4478_v52 = vmax.f32 %v3423_v47, %v4206_v12  ;;  %v4239_v63 = vmul.f32 0.01, %v3427_v29  ;;  %v4241_v33 = vmul.f32 0.01, %v3500_v30  ;;  %v3429_v34 = vadd.f32 %v3428_v5, %v7070_v37 }
 0x490   : > { %v4480_v25 = vmax.f32 %v3496_v4, %v4208_v27  ;;  %4750 = vst [vmem:[%s6714_s15 + $0x5d0] sm:$0xff] %v4477_v31  ;;  %4752 = vst [vmem:[%s6714_s15 + $0x5e0] sm:$0xff] %v4479_v32  ;;  %v3502_v35 = vadd.f32 %v3501_v51, %v7074_v38  ;;  %v3430_v7 = vpop.f32.mrf.mxu1  ;;  %v3503_v28 = vpop.f32.mrf.mxu0 }
 0x491   : > { %4751 = vst [vmem:[%s6714_s15 + $0x5d8] sm:$0xff] %v4478_v52  ;;  %v4511_v40 = vmax.f32 %v3427_v29, %v4239_v63  ;;  %v4513_v41 = vmax.f32 %v3500_v30, %v4241_v33  ;;  %v3431_v44 = vadd.f32 %v3430_v7, %v7054_v20  ;;  %v3504_v45 = vadd.f32 %v3503_v28, %v7058_v16 }
 0x492   : > { %4753 = vst [vmem:[%s6714_s15 + $0x5e8] sm:$0xff] %v4480_v25  ;;  %v4240_v48 = vmul.f32 0.01, %v3429_v34  ;;  %v4242_v49 = vmul.f32 0.01, %v3502_v35  ;;  %v3432_v50 = vpop.f32.mrf.mxu1  ;;  %v3505_v53 = vpop.f32.mrf.mxu0 }
 0x493   : > { %4784 = vst [vmem:[%s6714_s15 + $0x6e0] sm:$0xff] %v4511_v40  ;;  %4786 = vst [vmem:[%s6714_s15 + $0x6f0] sm:$0xff] %v4513_v41  ;;  %v4273_v6 = vmul.f32 0.01, %v3431_v44  ;;  %v4275_v20 = vmul.f32 0.01, %v3504_v45  ;;  %v3433_v16 = vadd.f32 %v3432_v50, %v7070_v37  ;;  %v3506_v62 = vadd.f32 %v3505_v53, %v7074_v38 }
 0x494   : > { %v4512_v59 = vmax.f32 %v3429_v34, %v4240_v48  ;;  %v4514_v0 = vmax.f32 %v3502_v35, %v4242_v49  ;;  %v3542_v3 = vpop.f32.mrf.mxu1  ;;  %v3615_v10 = vpop.f32.mrf.mxu0 }
 0x495   : > { %v4545_v42 = vmax.f32 %v3431_v44, %v4273_v6  ;;  %v4547_v13 = vmax.f32 %v3504_v45, %v4275_v20  ;;  %v4274_v8 = vmul.f32 0.01, %v3433_v16  ;;  %v4276_v9 = vmul.f32 0.01, %v3506_v62 }
 0x496   : > { %4785 = vst [vmem:[%s6714_s15 + $0x6e8] sm:$0xff] %v4512_v59  ;;  %4787 = vst [vmem:[%s6714_s15 + $0x6f8] sm:$0xff] %v4514_v0  ;;  %v3543_v14 = vadd.f32 %v3542_v3, %v7134_v36  ;;  %v3616_v37 = vadd.f32 %v3615_v10, %v7138_v39  ;;  %v3544_v15 = vpop.f32.mrf.mxu1  ;;  %v3617_v54 = vpop.f32.mrf.mxu0 }
 0x497   : > { %4818 = vst [vmem:[%s6714_s15 + $0x7f0] sm:$0xff] %v4545_v42  ;;  %4820 = vst [vmem:[%s6714_s15 + $0x800] sm:$0xff] %v4547_v13  ;;  %v4546_v38 = vmax.f32 %v3433_v16, %v4274_v8  ;;  %v4548_v19 = vmax.f32 %v3506_v62, %v4276_v9  ;;  %v3545_v17 = vadd.f32 %v3544_v15, %v7146_v55 }
 0x498   : > { %v3618_v18 = vadd.f32 %v3617_v54, %v7150_v56  ;;  %v4039_v46 = vmul.f32 0.01, %v3543_v14  ;;  %v4041_v21 = vmul.f32 0.01, %v3616_v37  ;;  %v3546_v47 = vpop.f32.mrf.mxu1  ;;  %v3619_v4 = vpop.f32.mrf.mxu0 }
 0x499   : > { %4819 = vst [vmem:[%s6714_s15 + $0x7f8] sm:$0xff] %v4546_v38  ;;  %4821 = vst [vmem:[%s6714_s15 + $0x808] sm:$0xff] %v4548_v19  ;;  %v4040_v24 = vmul.f32 0.01, %v3545_v17  ;;  %v3547_v43 = vadd.f32 %v3546_v47, %v7134_v36  ;;  %v3620_v11 = vadd.f32 %v3619_v4, %v7138_v39 }
 0x49a   : > { %v4042_v26 = vmul.f32 0.01, %v3618_v18  ;;  %v4311_v12 = vmax.f32 %v3543_v14, %v4039_v46  ;;  %v4313_v27 = vmax.f32 %v3616_v37, %v4041_v21  ;;  %v3548_v29 = vpop.f32.mrf.mxu1  ;;  %v3621_v30 = vpop.f32.mrf.mxu0 }
 0x49b   : > { %v4312_v31 = vmax.f32 %v3545_v17, %v4040_v24  ;;  %v4073_v5 = vmul.f32 0.01, %v3547_v43  ;;  %v4075_v51 = vmul.f32 0.01, %v3620_v11  ;;  %v3549_v52 = vadd.f32 %v3548_v29, %v7146_v55 }
 0x49c   : > { %v4314_v32 = vmax.f32 %v3618_v18, %v4042_v26  ;;  %4583 = vst [vmem:[%s6714_s15 + $0xa0] sm:$0xff] %v4311_v12  ;;  %4585 = vst [vmem:[%s6714_s15 + $0xb0] sm:$0xff] %v4313_v27  ;;  %v3622_v25 = vadd.f32 %v3621_v30, %v7150_v56  ;;  %v3552_v63 = vpop.f32.mrf.mxu1  ;;  %v3625_v33 = vpop.f32.mrf.mxu0 }
 0x49d   : > { %4584 = vst [vmem:[%s6714_s15 + $0xa8] sm:$0xff] %v4312_v31  ;;  %v4345_v34 = vmax.f32 %v3547_v43, %v4073_v5  ;;  %v4347_v35 = vmax.f32 %v3620_v11, %v4075_v51  ;;  %v3553_v7 = vadd.f32 %v3552_v63, %v7134_v36  ;;  %v3626_v28 = vadd.f32 %v3625_v33, %v7138_v39 }
 0x49e   : > { %4586 = vst [vmem:[%s6714_s15 + $0xb8] sm:$0xff] %v4314_v32  ;;  %v4074_v40 = vmul.f32 0.01, %v3549_v52  ;;  %v4076_v41 = vmul.f32 0.01, %v3622_v25  ;;  %v3554_v44 = vpop.f32.mrf.mxu1  ;;  %v3627_v45 = vpop.f32.mrf.mxu0 }
 0x49f   : > { %4618 = vst [vmem:[%s6714_s15 + $0x1b0] sm:$0xff] %v4345_v34  ;;  %4620 = vst [vmem:[%s6714_s15 + $0x1c0] sm:$0xff] %v4347_v35  ;;  %v4107_v48 = vmul.f32 0.01, %v3553_v7  ;;  %v4109_v49 = vmul.f32 0.01, %v3626_v28  ;;  %v3555_v50 = vadd.f32 %v3554_v44, %v7146_v55  ;;  %v3628_v53 = vadd.f32 %v3627_v45, %v7150_v56 }
 0x4a0   : > { %v4346_v6 = vmax.f32 %v3549_v52, %v4074_v40  ;;  %v4348_v20 = vmax.f32 %v3622_v25, %v4076_v41  ;;  %v3556_v16 = vpop.f32.mrf.mxu1  ;;  %v3629_v62 = vpop.f32.mrf.mxu0 }
 0x4a1   : > { %v4379_v59 = vmax.f32 %v3553_v7, %v4107_v48  ;;  %v4381_v0 = vmax.f32 %v3626_v28, %v4109_v49  ;;  %v4108_v3 = vmul.f32 0.01, %v3555_v50  ;;  %v4110_v10 = vmul.f32 0.01, %v3628_v53 }
 0x4a2   : > { %4619 = vst [vmem:[%s6714_s15 + $0x1b8] sm:$0xff] %v4346_v6  ;;  %4621 = vst [vmem:[%s6714_s15 + $0x1c8] sm:$0xff] %v4348_v20  ;;  %v3557_v42 = vadd.f32 %v3556_v16, %v7134_v36  ;;  %v3630_v13 = vadd.f32 %v3629_v62, %v7138_v39  ;;  %v3558_v8 = vpop.f32.mrf.mxu1  ;;  %v3631_v9 = vpop.f32.mrf.mxu0 }
 0x4a3   : > { %4652 = vst [vmem:[%s6714_s15 + $0x2c0] sm:$0xff] %v4379_v59  ;;  %4654 = vst [vmem:[%s6714_s15 + $0x2d0] sm:$0xff] %v4381_v0  ;;  %v4380_v14 = vmax.f32 %v3555_v50, %v4108_v3  ;;  %v4382_v37 = vmax.f32 %v3628_v53, %v4110_v10  ;;  %v3559_v15 = vadd.f32 %v3558_v8, %v7146_v55  ;;  %v7204_v59 = vld [vmem:[#allocation15 + $0x18] sm:$0xff] }
 0x4a4   : > { %v3632_v54 = vadd.f32 %v3631_v9, %v7150_v56  ;;  %v4141_v38 = vmul.f32 0.01, %v3557_v42  ;;  %v4143_v19 = vmul.f32 0.01, %v3630_v13  ;;  %v3562_v17 = vpop.f32.mrf.mxu1  ;;  %v3635_v18 = vpop.f32.mrf.mxu0 }
 0x4a5   : > { %4653 = vst [vmem:[%s6714_s15 + $0x2c8] sm:$0xff] %v4380_v14  ;;  %4655 = vst [vmem:[%s6714_s15 + $0x2d8] sm:$0xff] %v4382_v37  ;;  %v4142_v46 = vmul.f32 0.01, %v3559_v15  ;;  %v3563_v47 = vadd.f32 %v3562_v17, %v7134_v36  ;;  %v3636_v4 = vadd.f32 %v3635_v18, %v7138_v39  ;;  %v7220_v17 = vrot.slane %v7204_v59, %v6671_v61 }
 0x4a6   : > { %v4144_v21 = vmul.f32 0.01, %v3632_v54  ;;  %v4413_v24 = vmax.f32 %v3557_v42, %v4141_v38  ;;  %v4415_v26 = vmax.f32 %v3630_v13, %v4143_v19  ;;  %v3564_v43 = vpop.f32.mrf.mxu1  ;;  %v3637_v11 = vpop.f32.mrf.mxu0  ;;  %v7216_v19 = vrot.slane %v7204_v59, %v6668_v60 }
 0x4a7   : > { %v4414_v12 = vmax.f32 %v3559_v15, %v4142_v46  ;;  %v4175_v29 = vmul.f32 0.01, %v3563_v47  ;;  %v4177_v30 = vmul.f32 0.01, %v3636_v4  ;;  %v3565_v31 = vadd.f32 %v3564_v43, %v7146_v55 }
 0x4a8   : > { %v4416_v27 = vmax.f32 %v3632_v54, %v4144_v21  ;;  %4686 = vst [vmem:[%s6714_s15 + $0x3d0] sm:$0xff] %v4413_v24  ;;  %4688 = vst [vmem:[%s6714_s15 + $0x3e0] sm:$0xff] %v4415_v26  ;;  %v3638_v32 = vadd.f32 %v3637_v11, %v7150_v56  ;;  %v3566_v5 = vpop.f32.mrf.mxu1  ;;  %v3639_v51 = vpop.f32.mrf.mxu0  ;;  %v7228_v61 = vrot.slane %v7204_v59, %v6678_v1 }
 0x4a9   : > { %4687 = vst [vmem:[%s6714_s15 + $0x3d8] sm:$0xff] %v4414_v12  ;;  %v4447_v52 = vmax.f32 %v3563_v47, %v4175_v29  ;;  %v4449_v25 = vmax.f32 %v3636_v4, %v4177_v30  ;;  %v3567_v63 = vadd.f32 %v3566_v5, %v7134_v36  ;;  %v3640_v33 = vadd.f32 %v3639_v51, %v7138_v39 }
 0x4aa   : > { %4689 = vst [vmem:[%s6714_s15 + $0x3e8] sm:$0xff] %v4416_v27  ;;  %v4176_v34 = vmul.f32 0.01, %v3565_v31  ;;  %v4178_v35 = vmul.f32 0.01, %v3638_v32  ;;  %v3568_v7 = vpop.f32.mrf.mxu1  ;;  %v3641_v28 = vpop.f32.mrf.mxu0  ;;  %v7232_v11 = vrot.slane %v7204_v59, %v6681_v2 }
 0x4ab   : > { %4720 = vst [vmem:[%s6714_s15 + $0x4e0] sm:$0xff] %v4447_v52  ;;  %4722 = vst [vmem:[%s6714_s15 + $0x4f0] sm:$0xff] %v4449_v25  ;;  %v4209_v40 = vmul.f32 0.01, %v3567_v63  ;;  %v4211_v41 = vmul.f32 0.01, %v3640_v33  ;;  %v3569_v44 = vadd.f32 %v3568_v7, %v7146_v55  ;;  %v3642_v45 = vadd.f32 %v3641_v28, %v7150_v56 }
 0x4ac   : > { %v4448_v48 = vmax.f32 %v3565_v31, %v4176_v34  ;;  %v4450_v49 = vmax.f32 %v3638_v32, %v4178_v35  ;;  %v3572_v50 = vpop.f32.mrf.mxu1  ;;  %v3645_v53 = vpop.f32.mrf.mxu0 }
 0x4ad   : > { %v4481_v6 = vmax.f32 %v3567_v63, %v4209_v40  ;;  %v4483_v20 = vmax.f32 %v3640_v33, %v4211_v41  ;;  %v4210_v16 = vmul.f32 0.01, %v3569_v44  ;;  %v4212_v62 = vmul.f32 0.01, %v3642_v45 }
 0x4ae   : > { %4721 = vst [vmem:[%s6714_s15 + $0x4e8] sm:$0xff] %v4448_v48  ;;  %4723 = vst [vmem:[%s6714_s15 + $0x4f8] sm:$0xff] %v4450_v49  ;;  %v3573_v0 = vadd.f32 %v3572_v50, %v7134_v36  ;;  %v3646_v3 = vadd.f32 %v3645_v53, %v7138_v39  ;;  %v3574_v10 = vpop.f32.mrf.mxu1  ;;  %v3647_v42 = vpop.f32.mrf.mxu0 }
 0x4af   : > { %4754 = vst [vmem:[%s6714_s15 + $0x5f0] sm:$0xff] %v4481_v6  ;;  %4756 = vst [vmem:[%s6714_s15 + $0x600] sm:$0xff] %v4483_v20  ;;  %v4482_v13 = vmax.f32 %v3569_v44, %v4210_v16  ;;  %v4484_v8 = vmax.f32 %v3642_v45, %v4212_v62  ;;  %v3575_v9 = vadd.f32 %v3574_v10, %v7146_v55 }
 0x4b0   : > { %v3648_v14 = vadd.f32 %v3647_v42, %v7150_v56  ;;  %v4243_v37 = vmul.f32 0.01, %v3573_v0  ;;  %v4245_v15 = vmul.f32 0.01, %v3646_v3  ;;  %v3576_v54 = vpop.f32.mrf.mxu1  ;;  %v3649_v38 = vpop.f32.mrf.mxu0 }
 0x4b1   : > { %4755 = vst [vmem:[%s6714_s15 + $0x5f8] sm:$0xff] %v4482_v13  ;;  %4757 = vst [vmem:[%s6714_s15 + $0x608] sm:$0xff] %v4484_v8  ;;  %v4244_v18 = vmul.f32 0.01, %v3575_v9  ;;  %v3577_v21 = vadd.f32 %v3576_v54, %v7134_v36  ;;  %v3650_v47 = vadd.f32 %v3649_v38, %v7138_v39 }
 0x4b2   : > { %v4246_v46 = vmul.f32 0.01, %v3648_v14  ;;  %v4515_v4 = vmax.f32 %v3573_v0, %v4243_v37  ;;  %v4517_v24 = vmax.f32 %v3646_v3, %v4245_v15  ;;  %v3578_v26 = vpop.f32.mrf.mxu1  ;;  %v3651_v43 = vpop.f32.mrf.mxu0 }
 0x4b3   : > { %v4516_v12 = vmax.f32 %v3575_v9, %v4244_v18  ;;  %v4277_v29 = vmul.f32 0.01, %v3577_v21  ;;  %v4279_v36 = vmul.f32 0.01, %v3650_v47  ;;  %v3579_v39 = vadd.f32 %v3578_v26, %v7146_v55 }
 0x4b4   : > { %v4518_v27 = vmax.f32 %v3648_v14, %v4246_v46  ;;  %4788 = vst [vmem:[%s6714_s15 + $0x700] sm:$0xff] %v4515_v4  ;;  %4790 = vst [vmem:[%s6714_s15 + $0x710] sm:$0xff] %v4517_v24  ;;  %v3652_v30 = vadd.f32 %v3651_v43, %v7150_v56  ;;  %v3688_v31 = vpop.f32.mrf.mxu1  ;;  %v3761_v32 = vpop.f32.mrf.mxu0 }
 0x4b5   : > { %4789 = vst [vmem:[%s6714_s15 + $0x708] sm:$0xff] %v4516_v12  ;;  %v4549_v5 = vmax.f32 %v3577_v21, %v4277_v29  ;;  %v4551_v51 = vmax.f32 %v3650_v47, %v4279_v36  ;;  %v3689_v2 = vadd.f32 %v3688_v31, %v7216_v19  ;;  %v3762_v52 = vadd.f32 %v3761_v32, %v7220_v17 }
 0x4b6   : > { %4791 = vst [vmem:[%s6714_s15 + $0x718] sm:$0xff] %v4518_v27  ;;  %v4278_v25 = vmul.f32 0.01, %v3579_v39  ;;  %v4280_v63 = vmul.f32 0.01, %v3652_v30  ;;  %v3690_v33 = vpop.f32.mrf.mxu1  ;;  %v3763_v34 = vpop.f32.mrf.mxu0 }
 0x4b7   : > { %4822 = vst [vmem:[%s6714_s15 + $0x810] sm:$0xff] %v4549_v5  ;;  %4824 = vst [vmem:[%s6714_s15 + $0x820] sm:$0xff] %v4551_v51  ;;  %v4043_v55 = vmul.f32 0.01, %v3689_v2  ;;  %v4045_v56 = vmul.f32 0.01, %v3762_v52  ;;  %v3691_v35 = vadd.f32 %v3690_v33, %v7228_v61  ;;  %v3764_v7 = vadd.f32 %v3763_v34, %v7232_v11 }
 0x4b8   : > { %v4550_v28 = vmax.f32 %v3579_v39, %v4278_v25  ;;  %v4552_v40 = vmax.f32 %v3652_v30, %v4280_v63  ;;  %v3692_v41 = vpop.f32.mrf.mxu1  ;;  %v3765_v44 = vpop.f32.mrf.mxu0 }
 0x4b9   : > { %v4315_v45 = vmax.f32 %v3689_v2, %v4043_v55  ;;  %v4317_v48 = vmax.f32 %v3762_v52, %v4045_v56  ;;  %v4044_v49 = vmul.f32 0.01, %v3691_v35  ;;  %v4046_v50 = vmul.f32 0.01, %v3764_v7 }
 0x4ba   : > { %4823 = vst [vmem:[%s6714_s15 + $0x818] sm:$0xff] %v4550_v28  ;;  %4825 = vst [vmem:[%s6714_s15 + $0x828] sm:$0xff] %v4552_v40  ;;  %v3693_v53 = vadd.f32 %v3692_v41, %v7216_v19  ;;  %v3766_v6 = vadd.f32 %v3765_v44, %v7220_v17  ;;  %v3694_v20 = vpop.f32.mrf.mxu1  ;;  %v3767_v16 = vpop.f32.mrf.mxu0 }
 0x4bb   : > { %4587 = vst [vmem:[%s6714_s15 + $0xc0] sm:$0xff] %v4315_v45  ;;  %4589 = vst [vmem:[%s6714_s15 + $0xd0] sm:$0xff] %v4317_v48  ;;  %v4316_v62 = vmax.f32 %v3691_v35, %v4044_v49  ;;  %v4318_v0 = vmax.f32 %v3764_v7, %v4046_v50  ;;  %v3695_v3 = vadd.f32 %v3694_v20, %v7228_v61 }
 0x4bc   : > { %v3768_v10 = vadd.f32 %v3767_v16, %v7232_v11  ;;  %v4077_v42 = vmul.f32 0.01, %v3693_v53  ;;  %v4079_v13 = vmul.f32 0.01, %v3766_v6  ;;  %v3698_v8 = vpop.f32.mrf.mxu1  ;;  %v3771_v9 = vpop.f32.mrf.mxu0 }
 0x4bd   : > { %4588 = vst [vmem:[%s6714_s15 + $0xc8] sm:$0xff] %v4316_v62  ;;  %4590 = vst [vmem:[%s6714_s15 + $0xd8] sm:$0xff] %v4318_v0  ;;  %v4078_v14 = vmul.f32 0.01, %v3695_v3  ;;  %v3699_v15 = vadd.f32 %v3698_v8, %v7216_v19  ;;  %v3772_v54 = vadd.f32 %v3771_v9, %v7220_v17 }
 0x4be   : > { %v4080_v37 = vmul.f32 0.01, %v3768_v10  ;;  %v4349_v38 = vmax.f32 %v3693_v53, %v4077_v42  ;;  %v4351_v18 = vmax.f32 %v3766_v6, %v4079_v13  ;;  %v3700_v46 = vpop.f32.mrf.mxu1  ;;  %v3773_v21 = vpop.f32.mrf.mxu0 }
 0x4bf   : > { %v4350_v47 = vmax.f32 %v3695_v3, %v4078_v14  ;;  %v4111_v24 = vmul.f32 0.01, %v3699_v15  ;;  %v4113_v26 = vmul.f32 0.01, %v3772_v54  ;;  %v3701_v43 = vadd.f32 %v3700_v46, %v7228_v61 }
 0x4c0   : > { %v4352_v4 = vmax.f32 %v3768_v10, %v4080_v37  ;;  %4622 = vst [vmem:[%s6714_s15 + $0x1d0] sm:$0xff] %v4349_v38  ;;  %4624 = vst [vmem:[%s6714_s15 + $0x1e0] sm:$0xff] %v4351_v18  ;;  %v3774_v12 = vadd.f32 %v3773_v21, %v7232_v11  ;;  %v3702_v27 = vpop.f32.mrf.mxu1  ;;  %v3775_v29 = vpop.f32.mrf.mxu0 }
 0x4c1   : > { %4623 = vst [vmem:[%s6714_s15 + $0x1d8] sm:$0xff] %v4350_v47  ;;  %v4383_v36 = vmax.f32 %v3699_v15, %v4111_v24  ;;  %v4385_v39 = vmax.f32 %v3772_v54, %v4113_v26  ;;  %v3703_v30 = vadd.f32 %v3702_v27, %v7216_v19  ;;  %v3776_v31 = vadd.f32 %v3775_v29, %v7220_v17 }
 0x4c2   : > { %4625 = vst [vmem:[%s6714_s15 + $0x1e8] sm:$0xff] %v4352_v4  ;;  %v4112_v32 = vmul.f32 0.01, %v3701_v43  ;;  %v4114_v5 = vmul.f32 0.01, %v3774_v12  ;;  %v3704_v51 = vpop.f32.mrf.mxu1  ;;  %v3777_v2 = vpop.f32.mrf.mxu0 }
 0x4c3   : > { %4656 = vst [vmem:[%s6714_s15 + $0x2e0] sm:$0xff] %v4383_v36  ;;  %4658 = vst [vmem:[%s6714_s15 + $0x2f0] sm:$0xff] %v4385_v39  ;;  %v4145_v52 = vmul.f32 0.01, %v3703_v30  ;;  %v4147_v25 = vmul.f32 0.01, %v3776_v31  ;;  %v3705_v63 = vadd.f32 %v3704_v51, %v7228_v61  ;;  %v3778_v33 = vadd.f32 %v3777_v2, %v7232_v11 }
 0x4c4   : > { %v4384_v34 = vmax.f32 %v3701_v43, %v4112_v32  ;;  %v4386_v55 = vmax.f32 %v3774_v12, %v4114_v5  ;;  %v3708_v56 = vpop.f32.mrf.mxu1 }
 0x4c5   : > { %v3781_v35 = vpop.f32.mrf.mxu0  ;;  %v4417_v7 = vmax.f32 %v3703_v30, %v4145_v52  ;;  %v4419_v28 = vmax.f32 %v3776_v31, %v4147_v25  ;;  %v4146_v40 = vmul.f32 0.01, %v3705_v63  ;;  %v4148_v41 = vmul.f32 0.01, %v3778_v33 }
 0x4c6   : > { %4657 = vst [vmem:[%s6714_s15 + $0x2e8] sm:$0xff] %v4384_v34  ;;  %4659 = vst [vmem:[%s6714_s15 + $0x2f8] sm:$0xff] %v4386_v55  ;;  %v3709_v44 = vadd.f32 %v3708_v56, %v7216_v19  ;;  %v3782_v45 = vadd.f32 %v3781_v35, %v7220_v17  ;;  %v3710_v48 = vpop.f32.mrf.mxu1 }
 0x4c7   : > { %v3783_v49 = vpop.f32.mrf.mxu0  ;;  %4690 = vst [vmem:[%s6714_s15 + $0x3f0] sm:$0xff] %v4417_v7  ;;  %4692 = vst [vmem:[%s6714_s15 + $0x400] sm:$0xff] %v4419_v28  ;;  %v4418_v50 = vmax.f32 %v3705_v63, %v4146_v40  ;;  %v4420_v53 = vmax.f32 %v3778_v33, %v4148_v41  ;;  %v3711_v6 = vadd.f32 %v3710_v48, %v7228_v61 }
 0x4c8   : > { %v3784_v20 = vadd.f32 %v3783_v49, %v7232_v11  ;;  %v4179_v16 = vmul.f32 0.01, %v3709_v44  ;;  %v4181_v62 = vmul.f32 0.01, %v3782_v45  ;;  %v3712_v0 = vpop.f32.mrf.mxu1  ;;  %v7296_v33 = vrot.slane %v7204_v59, %v6759_v22 }
 0x4c9   : > { %v3785_v3 = vpop.f32.mrf.mxu0  ;;  %4691 = vst [vmem:[%s6714_s15 + $0x3f8] sm:$0xff] %v4418_v50  ;;  %4693 = vst [vmem:[%s6714_s15 + $0x408] sm:$0xff] %v4420_v53  ;;  %v4180_v10 = vmul.f32 0.01, %v3711_v6  ;;  %v3713_v13 = vadd.f32 %v3712_v0, %v7216_v19  ;;  %v7308_v22 = vrot.slane %v7204_v59, %v6789_v57 }
 0x4ca   : > { %v4182_v42 = vmul.f32 0.01, %v3784_v20  ;;  %v3786_v8 = vadd.f32 %v3785_v3, %v7220_v17  ;;  %v4451_v9 = vmax.f32 %v3709_v44, %v4179_v16  ;;  %v4453_v14 = vmax.f32 %v3782_v45, %v4181_v62  ;;  %v3714_v37 = vpop.f32.mrf.mxu1 }
 0x4cb   : > { %v3787_v15 = vpop.f32.mrf.mxu0  ;;  %v4452_v54 = vmax.f32 %v3711_v6, %v4180_v10  ;;  %v4213_v18 = vmul.f32 0.01, %v3713_v13  ;;  %v3715_v21 = vadd.f32 %v3714_v37, %v7228_v61  ;;  %v7304_v44 = vrot.slane %v7204_v59, %v6762_v23 }
 0x4cc   : > { %v4454_v38 = vmax.f32 %v3784_v20, %v4182_v42  ;;  %v4215_v46 = vmul.f32 0.01, %v3786_v8  ;;  %4724 = vst [vmem:[%s6714_s15 + $0x500] sm:$0xff] %v4451_v9  ;;  %4726 = vst [vmem:[%s6714_s15 + $0x510] sm:$0xff] %v4453_v14  ;;  %v3788_v47 = vadd.f32 %v3787_v15, %v7232_v11  ;;  %v3718_v4 = vpop.f32.mrf.mxu1  ;;  %v7316_v6 = vrot.slane %v7204_v59, %v6792_v58 }
 0x4cd   : > { %v3791_v24 = vpop.f32.mrf.mxu0  ;;  %4725 = vst [vmem:[%s6714_s15 + $0x508] sm:$0xff] %v4452_v54  ;;  %v4485_v26 = vmax.f32 %v3713_v13, %v4213_v18  ;;  %v3719_v12 = vadd.f32 %v3718_v4, %v7216_v19  ;;  %v4214_v29 = vmul.f32 0.01, %v3715_v21 }
 0x4ce   : > { %4727 = vst [vmem:[%s6714_s15 + $0x518] sm:$0xff] %v4454_v38  ;;  %v4487_v43 = vmax.f32 %v3786_v8, %v4215_v46  ;;  %v3792_v27 = vadd.f32 %v3791_v24, %v7220_v17  ;;  %v4216_v36 = vmul.f32 0.01, %v3788_v47  ;;  %v3720_v39 = vpop.f32.mrf.mxu1 }
 0x4cf   : > { %v3793_v30 = vpop.f32.mrf.mxu0  ;;  %4758 = vst [vmem:[%s6714_s15 + $0x610] sm:$0xff] %v4485_v26  ;;  %v4247_v31 = vmul.f32 0.01, %v3719_v12  ;;  %v3721_v5 = vadd.f32 %v3720_v39, %v7228_v61  ;;  %v4486_v2 = vmax.f32 %v3715_v21, %v4214_v29 }
 0x4d0   : > { %4760 = vst [vmem:[%s6714_s15 + $0x620] sm:$0xff] %v4487_v43  ;;  %v4249_v32 = vmul.f32 0.01, %v3792_v27  ;;  %v3794_v51 = vadd.f32 %v3793_v30, %v7232_v11  ;;  %v4488_v52 = vmax.f32 %v3788_v47, %v4216_v36  ;;  %v3722_v25 = vpop.f32.mrf.mxu1 }
 0x4d1   : > { %v3795_v63 = vpop.f32.mrf.mxu0  ;;  %v4519_v34 = vmax.f32 %v3719_v12, %v4247_v31  ;;  %v4248_v56 = vmul.f32 0.01, %v3721_v5  ;;  %4759 = vst [vmem:[%s6714_s15 + $0x618] sm:$0xff] %v4486_v2  ;;  %v3723_v7 = vadd.f32 %v3722_v25, %v7216_v19 }
 0x4d2   : > { %v4521_v55 = vmax.f32 %v3792_v27, %v4249_v32  ;;  %v4250_v35 = vmul.f32 0.01, %v3794_v51  ;;  %4761 = vst [vmem:[%s6714_s15 + $0x628] sm:$0xff] %v4488_v52  ;;  %v3796_v28 = vadd.f32 %v3795_v63, %v7220_v17  ;;  %v3724_v40 = vpop.f32.mrf.mxu1 }
 0x4d3   : > { %v3797_v41 = vpop.f32.mrf.mxu0  ;;  %4792 = vst [vmem:[%s6714_s15 + $0x720] sm:$0xff] %v4519_v34  ;;  %v4520_v45 = vmax.f32 %v3721_v5, %v4248_v56  ;;  %v3725_v19 = vadd.f32 %v3724_v40, %v7228_v61  ;;  %v4281_v17 = vmul.f32 0.01, %v3723_v7 }
 0x4d4   : > { %4794 = vst [vmem:[%s6714_s15 + $0x730] sm:$0xff] %v4521_v55  ;;  %v4522_v48 = vmax.f32 %v3794_v51, %v4250_v35  ;;  %v3798_v49 = vadd.f32 %v3797_v41, %v7232_v11  ;;  %v4283_v50 = vmul.f32 0.01, %v3796_v28 }
 0x4d5   : > { %v3834_v53 = vpop.f32.mrf.mxu1  ;;  %4793 = vst [vmem:[%s6714_s15 + $0x728] sm:$0xff] %v4520_v45  ;;  %v4282_v23 = vmul.f32 0.01, %v3725_v19  ;;  %v3907_v16 = vpop.f32.mrf.mxu0  ;;  %v4553_v61 = vmax.f32 %v3723_v7, %v4281_v17 }
 0x4d6   : > { %4795 = vst [vmem:[%s6714_s15 + $0x738] sm:$0xff] %v4522_v48  ;;  %v4284_v57 = vmul.f32 0.01, %v3798_v49  ;;  %v3835_v20 = vadd.f32 %v3834_v53, %v7296_v33  ;;  %v4555_v11 = vmax.f32 %v3796_v28, %v4283_v50  ;;  %v3908_v62 = vadd.f32 %v3907_v16, %v7304_v44 }
 0x4d7   : > { %v3836_v0 = vpop.f32.mrf.mxu1  ;;  %v4554_v3 = vmax.f32 %v3725_v19, %v4282_v23  ;;  %v3909_v42 = vpop.f32.mrf.mxu0  ;;  %4826 = vst [vmem:[%s6714_s15 + $0x830] sm:$0xff] %v4553_v61 }
 0x4d8   : > { %v4556_v10 = vmax.f32 %v3798_v49, %v4284_v57  ;;  %v4047_v58 = vmul.f32 0.01, %v3835_v20  ;;  %v3837_v59 = vadd.f32 %v3836_v0, %v7308_v22  ;;  %4828 = vst [vmem:[%s6714_s15 + $0x840] sm:$0xff] %v4555_v11  ;;  %v4049_v13 = vmul.f32 0.01, %v3908_v62 }
 0x4d9   : > { %v3910_v8 = vadd.f32 %v3909_v42, %v7316_v6  ;;  %v3838_v9 = vpop.f32.mrf.mxu1  ;;  %4827 = vst [vmem:[%s6714_s15 + $0x838] sm:$0xff] %v4554_v3  ;;  %v3911_v54 = vpop.f32.mrf.mxu0 }
 0x4da   : > { %4829 = vst [vmem:[%s6714_s15 + $0x848] sm:$0xff] %v4556_v10  ;;  %v4319_v14 = vmax.f32 %v3835_v20, %v4047_v58  ;;  %v4048_v37 = vmul.f32 0.01, %v3837_v59  ;;  %v3839_v15 = vadd.f32 %v3838_v9, %v7296_v33  ;;  %v4321_v38 = vmax.f32 %v3908_v62, %v4049_v13 }
 0x4db   : > { %v4050_v18 = vmul.f32 0.01, %v3910_v8  ;;  %v3912_v46 = vadd.f32 %v3911_v54, %v7304_v44  ;;  %v3840_v21 = vpop.f32.mrf.mxu1  ;;  %v3913_v26 = vpop.f32.mrf.mxu0 }
 0x4dc   : > { %4591 = vst [vmem:[%s6714_s15 + $0xe0] sm:$0xff] %v4319_v14  ;;  %v4320_v47 = vmax.f32 %v3837_v59, %v4048_v37  ;;  %v4081_v4 = vmul.f32 0.01, %v3839_v15  ;;  %v3841_v24 = vadd.f32 %v3840_v21, %v7308_v22  ;;  %4593 = vst [vmem:[%s6714_s15 + $0xf0] sm:$0xff] %v4321_v38  ;;  %v3914_v27 = vadd.f32 %v3913_v26, %v7316_v6 }
 0x4dd   : > { %v4322_v43 = vmax.f32 %v3910_v8, %v4050_v18  ;;  %v4083_v12 = vmul.f32 0.01, %v3912_v46  ;;  %v3844_v29 = vpop.f32.mrf.mxu1  ;;  %v3917_v31 = vpop.f32.mrf.mxu0 }
 0x4de   : > { %4592 = vst [vmem:[%s6714_s15 + $0xe8] sm:$0xff] %v4320_v47  ;;  %v4353_v36 = vmax.f32 %v3839_v15, %v4081_v4  ;;  %v4082_v39 = vmul.f32 0.01, %v3841_v24  ;;  %v3845_v30 = vadd.f32 %v3844_v29, %v7296_v33  ;;  %v4084_v5 = vmul.f32 0.01, %v3914_v27 }
 0x4df   : > { %4594 = vst [vmem:[%s6714_s15 + $0xf8] sm:$0xff] %v4322_v43  ;;  %v4355_v32 = vmax.f32 %v3912_v46, %v4083_v12  ;;  %v3918_v51 = vadd.f32 %v3917_v31, %v7304_v44  ;;  %v3846_v2 = vpop.f32.mrf.mxu1  ;;  %v3919_v34 = vpop.f32.mrf.mxu0 }
 0x4e0   : > { %4626 = vst [vmem:[%s6714_s15 + $0x1f0] sm:$0xff] %v4353_v36  ;;  %v4354_v52 = vmax.f32 %v3841_v24, %v4082_v39  ;;  %v4115_v25 = vmul.f32 0.01, %v3845_v30  ;;  %v3847_v63 = vadd.f32 %v3846_v2, %v7308_v22  ;;  %v4356_v55 = vmax.f32 %v3914_v27, %v4084_v5 }
 0x4e1   : > { %4628 = vst [vmem:[%s6714_s15 + $0x200] sm:$0xff] %v4355_v32  ;;  %v4117_v56 = vmul.f32 0.01, %v3918_v51  ;;  %v3920_v35 = vadd.f32 %v3919_v34, %v7316_v6  ;;  %v3848_v7 = vpop.f32.mrf.mxu1  ;;  %v3921_v45 = vpop.f32.mrf.mxu0 }
 0x4e2   : > { %4627 = vst [vmem:[%s6714_s15 + $0x1f8] sm:$0xff] %v4354_v52  ;;  %v4387_v28 = vmax.f32 %v3845_v30, %v4115_v25  ;;  %v4116_v40 = vmul.f32 0.01, %v3847_v63  ;;  %v3849_v41 = vadd.f32 %v3848_v7, %v7296_v33  ;;  %4629 = vst [vmem:[%s6714_s15 + $0x208] sm:$0xff] %v4356_v55  ;;  %v3922_v49 = vadd.f32 %v3921_v45, %v7304_v44 }
 0x4e3   : > { %v4389_v48 = vmax.f32 %v3918_v51, %v4117_v56  ;;  %v4118_v19 = vmul.f32 0.01, %v3920_v35  ;;  %v3850_v17 = vpop.f32.mrf.mxu1  ;;  %v3923_v57 = vpop.f32.mrf.mxu0 }
 0x4e4   : > { %4660 = vst [vmem:[%s6714_s15 + $0x300] sm:$0xff] %v4387_v28  ;;  %v4388_v50 = vmax.f32 %v3847_v63, %v4116_v40  ;;  %v4149_v53 = vmul.f32 0.01, %v3849_v41  ;;  %v3851_v23 = vadd.f32 %v3850_v17, %v7308_v22  ;;  %v4151_v16 = vmul.f32 0.01, %v3922_v49 }
 0x4e5   : > { %4662 = vst [vmem:[%s6714_s15 + $0x310] sm:$0xff] %v4389_v48  ;;  %v4390_v20 = vmax.f32 %v3920_v35, %v4118_v19  ;;  %v3924_v61 = vadd.f32 %v3923_v57, %v7316_v6  ;;  %v3854_v11 = vpop.f32.mrf.mxu1 }
 0x4e6   : > { %4661 = vst [vmem:[%s6714_s15 + $0x308] sm:$0xff] %v4388_v50  ;;  %v4421_v62 = vmax.f32 %v3849_v41, %v4149_v53  ;;  %v4150_v0 = vmul.f32 0.01, %v3851_v23  ;;  %v3855_v3 = vadd.f32 %v3854_v11, %v7296_v33  ;;  %v3927_v10 = vpop.f32.mrf.mxu0  ;;  %v4423_v58 = vmax.f32 %v3922_v49, %v4151_v16  ;;  %v1242_v41 = vld [vmem:[#allocation15 + $0x20] sm:$0x3] }
 0x4e7   : > { %4663 = vst [vmem:[%s6714_s15 + $0x318] sm:$0xff] %v4390_v20  ;;  %v4152_v59 = vmul.f32 0.01, %v3924_v61  ;;  %v3928_v42 = vadd.f32 %v3927_v10, %v7304_v44  ;;  %v3856_v13 = vpop.f32.mrf.mxu1  ;;  %v7379_v11 = vrot.slane %v1242_v41, %v6668_v60 }
 0x4e8   : > { %4694 = vst [vmem:[%s6714_s15 + $0x410] sm:$0xff] %v4421_v62  ;;  %v4422_v8 = vmax.f32 %v3851_v23, %v4150_v0  ;;  %v4183_v9 = vmul.f32 0.01, %v3855_v3  ;;  %v3857_v14 = vadd.f32 %v3856_v13, %v7308_v22  ;;  %v3929_v37 = vpop.f32.mrf.mxu0  ;;  %4696 = vst [vmem:[%s6714_s15 + $0x420] sm:$0xff] %v4423_v58 }
 0x4e9   : > { %v4424_v15 = vmax.f32 %v3924_v61, %v4152_v59  ;;  %v4185_v54 = vmul.f32 0.01, %v3928_v42  ;;  %v3930_v38 = vadd.f32 %v3929_v37, %v7316_v6  ;;  %v3858_v18 = vpop.f32.mrf.mxu1 }
 0x4ea   : > { %4695 = vst [vmem:[%s6714_s15 + $0x418] sm:$0xff] %v4422_v8  ;;  %v4455_v46 = vmax.f32 %v3855_v3, %v4183_v9  ;;  %v4184_v21 = vmul.f32 0.01, %v3857_v14  ;;  %v3859_v47 = vadd.f32 %v3858_v18, %v7296_v33  ;;  %v3931_v4 = vpop.f32.mrf.mxu0 }
 0x4eb   : > { %4697 = vst [vmem:[%s6714_s15 + $0x428] sm:$0xff] %v4424_v15  ;;  %v4457_v24 = vmax.f32 %v3928_v42, %v4185_v54  ;;  %v4186_v26 = vmul.f32 0.01, %v3930_v38  ;;  %v3932_v43 = vadd.f32 %v3931_v4, %v7304_v44  ;;  %v3860_v12 = vpop.f32.mrf.mxu1 }
 0x4ec   : > { %4728 = vst [vmem:[%s6714_s15 + $0x520] sm:$0xff] %v4455_v46  ;;  %v4456_v27 = vmax.f32 %v3857_v14, %v4184_v21  ;;  %v4217_v29 = vmul.f32 0.01, %v3859_v47  ;;  %v3861_v36 = vadd.f32 %v3860_v12, %v7308_v22  ;;  %v3933_v39 = vpop.f32.mrf.mxu0 }
 0x4ed   : > { %4730 = vst [vmem:[%s6714_s15 + $0x530] sm:$0xff] %v4457_v24  ;;  %v4458_v30 = vmax.f32 %v3930_v38, %v4186_v26  ;;  %v4219_v31 = vmul.f32 0.01, %v3932_v43  ;;  %v3934_v32 = vadd.f32 %v3933_v39, %v7316_v6  ;;  %v3864_v5 = vpop.f32.mrf.mxu1 }
 0x4ee   : > { %4729 = vst [vmem:[%s6714_s15 + $0x528] sm:$0xff] %v4456_v27  ;;  %v4489_v51 = vmax.f32 %v3859_v47, %v4217_v29  ;;  %v4218_v2 = vmul.f32 0.01, %v3861_v36  ;;  %v3865_v52 = vadd.f32 %v3864_v5, %v7296_v33  ;;  %v3937_v25 = vpop.f32.mrf.mxu0 }
 0x4ef   : > { %4731 = vst [vmem:[%s6714_s15 + $0x538] sm:$0xff] %v4458_v30  ;;  %v4491_v63 = vmax.f32 %v3932_v43, %v4219_v31  ;;  %v4220_v34 = vmul.f32 0.01, %v3934_v32  ;;  %v3938_v55 = vadd.f32 %v3937_v25, %v7304_v44  ;;  %v3866_v56 = vpop.f32.mrf.mxu1 }
 0x4f0   : > { %4762 = vst [vmem:[%s6714_s15 + $0x630] sm:$0xff] %v4489_v51  ;;  %v4490_v35 = vmax.f32 %v3861_v36, %v4218_v2  ;;  %v4251_v7 = vmul.f32 0.01, %v3865_v52  ;;  %v3867_v28 = vadd.f32 %v3866_v56, %v7308_v22  ;;  %v3939_v40 = vpop.f32.mrf.mxu0 }
 0x4f1   : > { %4764 = vst [vmem:[%s6714_s15 + $0x640] sm:$0xff] %v4491_v63  ;;  %v4492_v45 = vmax.f32 %v3934_v32, %v4220_v34  ;;  %v4253_v48 = vmul.f32 0.01, %v3938_v55  ;;  %v3940_v19 = vadd.f32 %v3939_v40, %v7316_v6  ;;  %v3868_v49 = vpop.f32.mrf.mxu1 }
 0x4f2   : > { %4763 = vst [vmem:[%s6714_s15 + $0x638] sm:$0xff] %v4490_v35  ;;  %v4523_v17 = vmax.f32 %v3865_v52, %v4251_v7  ;;  %v4252_v50 = vmul.f32 0.01, %v3867_v28  ;;  %v3869_v53 = vadd.f32 %v3868_v49, %v7296_v33  ;;  %v3941_v23 = vpop.f32.mrf.mxu0 }
 0x4f3   : > { %4765 = vst [vmem:[%s6714_s15 + $0x648] sm:$0xff] %v4492_v45  ;;  %v4525_v57 = vmax.f32 %v3938_v55, %v4253_v48  ;;  %v4254_v20 = vmul.f32 0.01, %v3940_v19  ;;  %v3942_v16 = vadd.f32 %v3941_v23, %v7304_v44  ;;  %v3870_v61 = vpop.f32.mrf.mxu1  ;;  %v7386_v44 = vrot.slane %v1242_v41, %v6678_v1 }
 0x4f4   : > { %4796 = vst [vmem:[%s6714_s15 + $0x740] sm:$0xff] %v4523_v17  ;;  %v4524_v62 = vmax.f32 %v3867_v28, %v4252_v50  ;;  %v4285_v0 = vmul.f32 0.01, %v3869_v53  ;;  %v3871_v3 = vadd.f32 %v3870_v61, %v7308_v22  ;;  %v3943_v10 = vpop.f32.mrf.mxu0 }
 0x4f5   : > { %4798 = vst [vmem:[%s6714_s15 + $0x750] sm:$0xff] %v4525_v57  ;;  %v4526_v33 = vmax.f32 %v3940_v19, %v4254_v20  ;;  %v4287_v58 = vmul.f32 0.01, %v3942_v16  ;;  %v3944_v59 = vadd.f32 %v3943_v10, %v7316_v6 }
 0x4f6   : > { %4797 = vst [vmem:[%s6714_s15 + $0x748] sm:$0xff] %v4524_v62  ;;  %v4557_v60 = vmax.f32 %v3869_v53, %v4285_v0  ;;  %v4286_v42 = vmul.f32 0.01, %v3871_v3  ;;  %v3980_v13 = vpop.f32.mrf.mxu1 }
 0x4f7   : > { %4799 = vst [vmem:[%s6714_s15 + $0x758] sm:$0xff] %v4526_v33  ;;  %v4559_v8 = vmax.f32 %v3942_v16, %v4287_v58  ;;  %v4288_v9 = vmul.f32 0.01, %v3944_v59  ;;  %v3981_v22 = vadd.f32 %v3980_v13, %v7379_v11 }
 0x4f8   : > { %4830 = vst [vmem:[%s6714_s15 + $0x850] sm:$0xff] %v4557_v60  ;;  %v4558_v14 = vmax.f32 %v3871_v3, %v4286_v42  ;;  %v3982_v37 = vpop.f32.mrf.mxu1 }
 0x4f9   : > { %4832 = vst [vmem:[%s6714_s15 + $0x860] sm:$0xff] %v4559_v8  ;;  %v4560_v6 = vmax.f32 %v3944_v59, %v4288_v9  ;;  %v4051_v1 = vmul.f32 0.01, %v3981_v22  ;;  %v3983_v15 = vadd.f32 %v3982_v37, %v7386_v44 }
 0x4fa   : > { %4831 = vst [vmem:[%s6714_s15 + $0x858] sm:$0xff] %v4558_v14  ;;  %v3984_v54 = vpop.f32.mrf.mxu1 }
 0x4fb   : > { %4833 = vst [vmem:[%s6714_s15 + $0x868] sm:$0xff] %v4560_v6  ;;  %v4323_v38 = vmax.f32 %v3981_v22, %v4051_v1  ;;  %v4052_v18 = vmul.f32 0.01, %v3983_v15  ;;  %v3985_v46 = vadd.f32 %v3984_v54, %v7379_v11 }
 0x4fc   : > { %v3986_v21 = vpop.f32.mrf.mxu1 }
 0x4fd   : > { %4595 = vst [vmem:[%s6714_s15 + $0x100] sm:$0xff] %v4323_v38  ;;  %v4324_v47 = vmax.f32 %v3983_v15, %v4052_v18  ;;  %v4085_v4 = vmul.f32 0.01, %v3985_v46  ;;  %v3987_v24 = vadd.f32 %v3986_v21, %v7386_v44 }
 0x4fe   : > { %v3990_v26 = vpop.f32.mrf.mxu1 }
 0x4ff   : > { %4597 = vst.msk [vmem:[%s6714_s15 + $0x108] sm:$0xff] %vm4596_vm0, %v4324_v47  ;;  %v4357_v43 = vmax.f32 %v3985_v46, %v4085_v4  ;;  %v4086_v12 = vmul.f32 0.01, %v3987_v24  ;;  %v3991_v27 = vadd.f32 %v3990_v26, %v7379_v11 }
 0x500   : > { %v3992_v29 = vpop.f32.mrf.mxu1 }
 0x501   : > { %4630 = vst [vmem:[%s6714_s15 + $0x210] sm:$0xff] %v4357_v43  ;;  %v4358_v36 = vmax.f32 %v3987_v24, %v4086_v12  ;;  %v4119_v39 = vmul.f32 0.01, %v3991_v27  ;;  %v3993_v30 = vadd.f32 %v3992_v29, %v7386_v44 }
 0x502   : > { %v3994_v31 = vpop.f32.mrf.mxu1 }
 0x503   : > { %4631 = vst.msk [vmem:[%s6714_s15 + $0x218] sm:$0xff] %vm4596_vm0, %v4358_v36  ;;  %v4391_v32 = vmax.f32 %v3991_v27, %v4119_v39  ;;  %v4120_v5 = vmul.f32 0.01, %v3993_v30  ;;  %v3995_v51 = vadd.f32 %v3994_v31, %v7379_v11 }
 0x504   : > { %v3996_v2 = vpop.f32.mrf.mxu1 }
 0x505   : > { %4664 = vst [vmem:[%s6714_s15 + $0x320] sm:$0xff] %v4391_v32  ;;  %v4392_v52 = vmax.f32 %v3993_v30, %v4120_v5  ;;  %v4153_v25 = vmul.f32 0.01, %v3995_v51  ;;  %v3997_v63 = vadd.f32 %v3996_v2, %v7386_v44 }
 0x506   : > { %v4000_v34 = vpop.f32.mrf.mxu1 }
 0x507   : > { %4665 = vst.msk [vmem:[%s6714_s15 + $0x328] sm:$0xff] %vm4596_vm0, %v4392_v52  ;;  %v4425_v55 = vmax.f32 %v3995_v51, %v4153_v25  ;;  %v4154_v56 = vmul.f32 0.01, %v3997_v63  ;;  %v4001_v35 = vadd.f32 %v4000_v34, %v7379_v11 }
 0x508   : > { %v4002_v7 = vpop.f32.mrf.mxu1 }
 0x509   : > { %4698 = vst [vmem:[%s6714_s15 + $0x430] sm:$0xff] %v4425_v55  ;;  %v4426_v28 = vmax.f32 %v3997_v63, %v4154_v56  ;;  %v4187_v40 = vmul.f32 0.01, %v4001_v35  ;;  %v4003_v41 = vadd.f32 %v4002_v7, %v7386_v44 }
 0x50a   : > { %v4004_v45 = vpop.f32.mrf.mxu1 }
 0x50b   : > { %4699 = vst.msk [vmem:[%s6714_s15 + $0x438] sm:$0xff] %vm4596_vm0, %v4426_v28  ;;  %v4459_v48 = vmax.f32 %v4001_v35, %v4187_v40  ;;  %v4188_v19 = vmul.f32 0.01, %v4003_v41  ;;  %v4005_v49 = vadd.f32 %v4004_v45, %v7379_v11 }
 0x50c   : > { %v4006_v17 = vpop.f32.mrf.mxu1 }
 0x50d   : > { %4732 = vst [vmem:[%s6714_s15 + $0x540] sm:$0xff] %v4459_v48  ;;  %v4460_v50 = vmax.f32 %v4003_v41, %v4188_v19  ;;  %v4221_v53 = vmul.f32 0.01, %v4005_v49  ;;  %v4007_v23 = vadd.f32 %v4006_v17, %v7386_v44 }
 0x50e   : > { %v4010_v57 = vpop.f32.mrf.mxu1 }
 0x50f   : > { %4733 = vst.msk [vmem:[%s6714_s15 + $0x548] sm:$0xff] %vm4596_vm0, %v4460_v50  ;;  %v4493_v20 = vmax.f32 %v4005_v49, %v4221_v53  ;;  %v4222_v16 = vmul.f32 0.01, %v4007_v23  ;;  %v4011_v61 = vadd.f32 %v4010_v57, %v7379_v11 }
 0x510   : > { %v4012_v62 = vpop.f32.mrf.mxu1 }
 0x511   : > { %4766 = vst [vmem:[%s6714_s15 + $0x650] sm:$0xff] %v4493_v20  ;;  %v4494_v0 = vmax.f32 %v4007_v23, %v4222_v16  ;;  %v4255_v3 = vmul.f32 0.01, %v4011_v61  ;;  %v4013_v10 = vadd.f32 %v4012_v62, %v7386_v44 }
 0x512   : > { %v4014_v33 = vpop.f32.mrf.mxu1 }
 0x513   : > { %4767 = vst.msk [vmem:[%s6714_s15 + $0x658] sm:$0xff] %vm4596_vm0, %v4494_v0  ;;  %v4527_v58 = vmax.f32 %v4011_v61, %v4255_v3  ;;  %v4256_v59 = vmul.f32 0.01, %v4013_v10  ;;  %v4015_v60 = vadd.f32 %v4014_v33, %v7379_v11 }
 0x514   : > { %v4016_v42 = vpop.f32.mrf.mxu1 }
 0x515   : > { %4800 = vst [vmem:[%s6714_s15 + $0x760] sm:$0xff] %v4527_v58  ;;  %v4528_v13 = vmax.f32 %v4013_v10, %v4256_v59  ;;  %v4289_v8 = vmul.f32 0.01, %v4015_v60  ;;  %v4017_v9 = vadd.f32 %v4016_v42, %v7386_v44 }
 0x517   : > { %4801 = vst.msk [vmem:[%s6714_s15 + $0x768] sm:$0xff] %vm4596_vm0, %v4528_v13  ;;  %v4561_v22 = vmax.f32 %v4015_v60, %v4289_v8  ;;  %v4290_v14 = vmul.f32 0.01, %v4017_v9 }
 0x519   : > { %4834 = vst [vmem:[%s6714_s15 + $0x870] sm:$0xff] %v4561_v22  ;;  %v4562_v37 = vmax.f32 %v4017_v9, %v4290_v14 }
 0x51b   : > { %4835 = vst.msk [vmem:[%s6714_s15 + $0x878] sm:$0xff] %vm4596_vm0, %v4562_v37 }
 0x51c PF: > { %p23_p8 = scmp.ge.s32.totalorder %s6463_s23, 6   ;;  %s7477_s30 = smov %s6262_s10 }
 0x51d   : > { %s7478_s10 = smov %s6266_s11  ;;  %s7479_s11 = smov %s6475_s21 }
 0x51e   : > { %s7480_s12 = smov %s6463_s23  ;;  %25 = sbr.rel (!%p23_p8) target bundleno = 7 (0x7), region = 128 }
 0x523   :  { %4860 = vsyncpa [#allocation3], 1 }
 0x524   :  { %4862 = vsyncpa [#allocation3 + $0x1], 1 }
 0x525   :  { %4863 = vsyncpa [#allocation5], 1 }
 0x526   :  { %4864 = vsyncpa [#allocation8], 1 }
 0x527   :  { %4865 = vsyncpa [#allocation11], 1 }
 0x528   :  { %4866 = vsyncpa [#allocation14], 1 }

</bundles_post_ra>
